<compile_context>
chip_gen: v6e
topology: v6e:2x2x1
jax: 0.10.0
libtpu: 0.0.40
codegen_flags: <defaults>
</compile_context>

<pallas_src>
import jax
import jax.numpy as jnp
from jax.experimental import pallas as pl
from jax.experimental.pallas import tpu as pltpu

IMAGE_SIZE = 28
D_IN = IMAGE_SIZE ** 2                      # 784

# Logical layer sizes of the PyTorch module (6 Linear layers).
RAW_DIMS = [D_IN, 512, 128, 50, 128, 512, D_IN]
# ReLU after raw layers 0, 1, 3, 4 (none after bottleneck layer 2 or final 5).
_RAW_RELU_AFTER = (True, True, False, True, True, False)

# Fused layout used by the kernel: raw layers 2 (128->50) and 3 (50->128) are
# folded into a single 128->128 affine layer (no activation between them).
FUSED_DIMS = [D_IN, 512, 128, 128, 512, D_IN]
_FUSED_RELU_AFTER = (True, True, True, True, False)


def _autoencoder_kernel(x_ref,
                        w1_ref, b1_ref, w2_ref, b2_ref, w3_ref, b3_ref,
                        w4_ref, b4_ref, w5_ref, b5_ref,
                        o_ref):
    """Five fused Linear(+ReLU) layers; bf16 MXU inputs, f32 accumulation."""
    w_refs = (w1_ref, w2_ref, w3_ref, w4_ref, w5_ref)
    b_refs = (b1_ref, b2_ref, b3_ref, b4_ref, b5_ref)

    h = x_ref[...].astype(jnp.bfloat16)            # f32 (TB, 784) -> bf16 in VMEM
    for i in range(5):
        acc = jnp.dot(h, w_refs[i][...],
                      preferred_element_type=jnp.float32) + b_refs[i][...]
        if _FUSED_RELU_AFTER[i]:
            # Re-cast to bf16 right away: halves spill traffic; the next dot
            # needs bf16 inputs anyway.
            h = jnp.maximum(acc, 0.0).astype(jnp.bfloat16)
        else:
            h = acc                                # final layer, no ReLU
    o_ref[...] = h.astype(o_ref.dtype)             # bf16 writeback


def init_raw_params(key):
    """Six (W, b) pairs in f32 matching nn.Linear's default init range.

    PyTorch stores W as (out, in); we keep the transposed (in, out) layout so
    forward is y = x @ W + b."""
    raw = []
    for i in range(6):
        d_in, d_out = RAW_DIMS[i], RAW_DIMS[i + 1]
        key, kw, kb = jax.random.split(key, 3)
        bound = 1.0 / (d_in ** 0.5)
        w = jax.random.uniform(kw, (d_in, d_out), jnp.float32, -bound, bound)
        b = jax.random.uniform(kb, (d_out,), jnp.float32, -bound, bound)
        raw.append((w, b))
    return raw


def prepare_params(raw):
    """Fold the bottleneck linears (in f32) and cast weights to bf16.

    Returns flat [w1, b1, ..., w5, b5]: bf16 (in, out) weights, f32 (1, out)
    biases."""
    (w1, b1), (w2, b2), (w3, b3), (w4, b4), (w5, b5), (w6, b6) = raw
    w34 = w3 @ w4                       # (128, 50) @ (50, 128) -> (128, 128)
    b34 = b3 @ w4 + b4
    flat = []
    for w, b in ((w1, b1), (w2, b2), (w34, b34), (w5, b5), (w6, b6)):
        flat.append(w.astype(jnp.bfloat16))
        flat.append(b.reshape(1, -1).astype(jnp.float32))
    return flat


def _round_up(x, m):
    return ((x + m - 1) // m) * m


def _weight_specs(params, single_buffer):
    if single_buffer:
        # Constant index_map -> block never changes; single-buffer it.
        return [pl.BlockSpec(p.shape, lambda i: (0, 0),
                             pipeline_mode=pl.Buffered(1)) for p in params]
    return [pl.BlockSpec(p.shape, lambda i: (0, 0)) for p in params]


def autoencoder_forward(x, params, *, batch_tile=512):
    """x: (N, C, H, W) or (N, 784) -> (N, 784) f32, like the PyTorch forward.

    batch_tile=512 keeps per-grid-step overhead (~0.35us) negligible and still
    fits easily in VMEM on v5e/v6e/v7x (< ~12 MiB including resident weights).
    """
    n = x.shape[0]
    x2d = x.reshape(n, -1)
    assert x2d.shape[1] == D_IN
    if x2d.dtype != jnp.float32:
        x2d = x2d.astype(jnp.float32)

    batch_tile = max(16, _round_up(batch_tile, 16))
    tb = min(batch_tile, _round_up(n, 16))
    # v7x megacore: make sure the ("parallel",) batch grid has >= 2 steps
    # whenever the batch allows it so both TensorCores get work.
    if n > 16 and _round_up(n, tb) // tb < 2:
        tb = _round_up((n + 1) // 2, 16)
    n_pad = _round_up(n, tb)
    x_pad = x2d if n_pad == n else jnp.pad(x2d, ((0, n_pad - n), (0, 0)))

    grid = (n_pad // tb,)
    flops = 2 * n_pad * sum(k * m for k, m in zip(FUSED_DIMS[:-1], FUSED_DIMS[1:]))
    bytes_accessed = (n_pad * D_IN * 4            # f32 input read
                      + n_pad * D_IN * 2          # bf16 output write
                      + sum(int(p.size) * p.dtype.itemsize for p in params))
    cost = pl.CostEstimate(flops=flops, transcendentals=0,
                           bytes_accessed=bytes_accessed)

    def _call(single_buffer_weights):
        in_specs = [pl.BlockSpec((tb, D_IN), lambda i: (i, 0))]
        in_specs += _weight_specs(params, single_buffer_weights)
        return pl.pallas_call(
            _autoencoder_kernel,
            out_shape=jax.ShapeDtypeStruct((n_pad, D_IN), jnp.bfloat16),
            grid=grid,
            in_specs=in_specs,
            out_specs=pl.BlockSpec((tb, D_IN), lambda i: (i, 0)),
            compiler_params=pltpu.CompilerParams(
                dimension_semantics=("parallel",),
                vmem_limit_bytes=32 << 20,
            ),
            cost_estimate=cost,
        )(x_pad, *params)

    try:
        out_pad = _call(True)       # single-buffered, VMEM-resident weights
    except Exception:               # Buffered(1) unsupported -> default buffering
        out_pad = _call(False)

    # Single fused pass: slice off batch padding and upcast bf16 -> f32.
    return out_pad[:n].astype(jnp.float32)


def autoencoder_reference_fused(x, params):
    """Pure-JAX reference with math identical to the kernel (fused, bf16)."""
    h = x.reshape(x.shape[0], -1).astype(jnp.bfloat16)
    ws, bs = params[0::2], params[1::2]
    for i in range(5):
        acc = jnp.dot(h, ws[i], preferred_element_type=jnp.float32) + bs[i]
        h = jnp.maximum(acc, 0.0).astype(jnp.bfloat16) if _FUSED_RELU_AFTER[i] else acc
    return h.astype(jnp.float32)


def autoencoder_reference_f32(x, raw_params):
    """Full-precision, unfused reference matching the PyTorch module math."""
    h = x.reshape(x.shape[0], -1).astype(jnp.float32)
    for (w, b), relu in zip(raw_params, _RAW_RELU_AFTER):
        h = h @ w + b
        if relu:
            h = jnp.maximum(h, 0.0)
    return h


if __name__ == "__main__":
    key = jax.random.PRNGKey(0)
    k_params, k_x = jax.random.split(key)

    raw_params = init_raw_params(k_params)
    params = prepare_params(raw_params)

    # Small batch of MNIST-shaped inputs (N, C, H, W) = (2, 1, 28, 28).
    x = jax.random.normal(k_x, (2, 1, IMAGE_SIZE, IMAGE_SIZE), jnp.float32)

    out = autoencoder_forward(x, params)
    out = jax.block_until_ready(out)
    assert out.shape == (2, D_IN), out.shape

    # Tight check against the identical-math JAX reference.
    ref = autoencoder_reference_fused(x, params)
    assert jnp.allclose(out, ref, atol=1e-2, rtol=1e-2), "mismatch vs fused reference"

    # Loose sanity check against the full-f32, unfused PyTorch-equivalent math
    # (bf16 weights/activations diverge from true f32 at the ~1e-2 level).
    ref32 = autoencoder_reference_f32(x, raw_params)
    assert jnp.allclose(out, ref32, atol=1e-1, rtol=1e-1), "mismatch vs f32 reference"

    print("KERNEL_OK")
</pallas_src>

<mosaic_0001>
module attributes {stable_mosaic.version = 11 : i64} {
  func.func @_autoencoder_kernel(%arg0: i32, %arg1: memref<16x784xf32, #tpu.memory_space<vmem>>, %arg2: memref<784x512xbf16, #tpu.memory_space<vmem>>, %arg3: memref<1x512xf32, #tpu.memory_space<vmem>>, %arg4: memref<512x128xbf16, #tpu.memory_space<vmem>>, %arg5: memref<1x128xf32, #tpu.memory_space<vmem>>, %arg6: memref<128x128xbf16, #tpu.memory_space<vmem>>, %arg7: memref<1x128xf32, #tpu.memory_space<vmem>>, %arg8: memref<128x512xbf16, #tpu.memory_space<vmem>>, %arg9: memref<1x512xf32, #tpu.memory_space<vmem>>, %arg10: memref<512x784xbf16, #tpu.memory_space<vmem>>, %arg11: memref<1x784xf32, #tpu.memory_space<vmem>>, %arg12: memref<16x784xbf16, #tpu.memory_space<vmem>>) attributes {dimension_semantics = [#tpu.dimension_semantics<parallel>], iteration_bounds = array<i64: 1>, scalar_prefetch = 0 : i64, scratch_operands = 0 : i64, tpu.core_type = #tpu.core_type<tc>, window_params = [{transform_indices = @transform_0, window_bounds = array<i64: 16, 784>}, {pipeline_mode = #tpu.pipeline_mode<synchronous>, transform_indices = @transform_1, window_bounds = array<i64: 784, 512>}, {pipeline_mode = #tpu.pipeline_mode<synchronous>, transform_indices = @transform_2, window_bounds = array<i64: 1, 512>}, {pipeline_mode = #tpu.pipeline_mode<synchronous>, transform_indices = @transform_3, window_bounds = array<i64: 512, 128>}, {pipeline_mode = #tpu.pipeline_mode<synchronous>, transform_indices = @transform_4, window_bounds = array<i64: 1, 128>}, {pipeline_mode = #tpu.pipeline_mode<synchronous>, transform_indices = @transform_5, window_bounds = array<i64: 128, 128>}, {pipeline_mode = #tpu.pipeline_mode<synchronous>, transform_indices = @transform_6, window_bounds = array<i64: 1, 128>}, {pipeline_mode = #tpu.pipeline_mode<synchronous>, transform_indices = @transform_7, window_bounds = array<i64: 128, 512>}, {pipeline_mode = #tpu.pipeline_mode<synchronous>, transform_indices = @transform_8, window_bounds = array<i64: 1, 512>}, {pipeline_mode = #tpu.pipeline_mode<synchronous>, transform_indices = @transform_9, window_bounds = array<i64: 512, 784>}, {pipeline_mode = #tpu.pipeline_mode<synchronous>, transform_indices = @transform_10, window_bounds = array<i64: 1, 784>}, {transform_indices = @transform_11, window_bounds = array<i64: 16, 784>}]} {
    %c0 = arith.constant 0 : index
    %c0_0 = arith.constant 0 : index
    %0 = vector.load %arg1[%c0, %c0_0] : memref<16x784xf32, #tpu.memory_space<vmem>>, vector<16x784xf32>
    %1 = arith.truncf %0 : vector<16x784xf32> to vector<16x784xbf16>
    %c0_1 = arith.constant 0 : index
    %c0_2 = arith.constant 0 : index
    %2 = vector.load %arg2[%c0_1, %c0_2] : memref<784x512xbf16, #tpu.memory_space<vmem>>, vector<784x512xbf16>
    %cst = arith.constant dense<0.000000e+00> : vector<16x512xf32>
    %3 = tpu.matmul %1, %2, %cst {dimension_numbers = #tpu.dot_dimension_numbers<[1], [0], [0], [1], [0, 0, 1, 1], [], []>} : vector<16x784xbf16>, vector<784x512xbf16>, vector<16x512xf32> -> vector<16x512xf32>
    %c0_3 = arith.constant 0 : index
    %c0_4 = arith.constant 0 : index
    %4 = vector.load %arg3[%c0_3, %c0_4] : memref<1x512xf32, #tpu.memory_space<vmem>>, vector<1x512xf32>
    %5 = vector.broadcast %4 : vector<1x512xf32> to vector<16x512xf32>
    %6 = arith.addf %3, %5 : vector<16x512xf32>
    %cst_5 = arith.constant 0.000000e+00 : f32
    %7 = vector.broadcast %cst_5 : f32 to vector<16x512xf32>
    %8 = arith.maximumf %6, %7 : vector<16x512xf32>
    %9 = arith.truncf %8 : vector<16x512xf32> to vector<16x512xbf16>
    %c0_6 = arith.constant 0 : index
    %c0_7 = arith.constant 0 : index
    %10 = vector.load %arg4[%c0_6, %c0_7] : memref<512x128xbf16, #tpu.memory_space<vmem>>, vector<512x128xbf16>
    %cst_8 = arith.constant dense<0.000000e+00> : vector<16x128xf32>
    %11 = tpu.matmul %9, %10, %cst_8 {dimension_numbers = #tpu.dot_dimension_numbers<[1], [0], [0], [1], [0, 0, 1, 1], [], []>} : vector<16x512xbf16>, vector<512x128xbf16>, vector<16x128xf32> -> vector<16x128xf32>
    %c0_9 = arith.constant 0 : index
    %c0_10 = arith.constant 0 : index
    %12 = vector.load %arg5[%c0_9, %c0_10] : memref<1x128xf32, #tpu.memory_space<vmem>>, vector<1x128xf32>
    %13 = vector.broadcast %12 : vector<1x128xf32> to vector<16x128xf32>
    %14 = arith.addf %11, %13 : vector<16x128xf32>
    %cst_11 = arith.constant 0.000000e+00 : f32
    %15 = vector.broadcast %cst_11 : f32 to vector<16x128xf32>
    %16 = arith.maximumf %14, %15 : vector<16x128xf32>
    %17 = arith.truncf %16 : vector<16x128xf32> to vector<16x128xbf16>
    %c0_12 = arith.constant 0 : index
    %c0_13 = arith.constant 0 : index
    %18 = vector.load %arg6[%c0_12, %c0_13] : memref<128x128xbf16, #tpu.memory_space<vmem>>, vector<128x128xbf16>
    %cst_14 = arith.constant dense<0.000000e+00> : vector<16x128xf32>
    %19 = tpu.matmul %17, %18, %cst_14 {dimension_numbers = #tpu.dot_dimension_numbers<[1], [0], [0], [1], [0, 0, 1, 1], [], []>} : vector<16x128xbf16>, vector<128x128xbf16>, vector<16x128xf32> -> vector<16x128xf32>
    %c0_15 = arith.constant 0 : index
    %c0_16 = arith.constant 0 : index
    %20 = vector.load %arg7[%c0_15, %c0_16] : memref<1x128xf32, #tpu.memory_space<vmem>>, vector<1x128xf32>
    %21 = vector.broadcast %20 : vector<1x128xf32> to vector<16x128xf32>
    %22 = arith.addf %19, %21 : vector<16x128xf32>
    %cst_17 = arith.constant 0.000000e+00 : f32
    %23 = vector.broadcast %cst_17 : f32 to vector<16x128xf32>
    %24 = arith.maximumf %22, %23 : vector<16x128xf32>
    %25 = arith.truncf %24 : vector<16x128xf32> to vector<16x128xbf16>
    %c0_18 = arith.constant 0 : index
    %c0_19 = arith.constant 0 : index
    %26 = vector.load %arg8[%c0_18, %c0_19] : memref<128x512xbf16, #tpu.memory_space<vmem>>, vector<128x512xbf16>
    %cst_20 = arith.constant dense<0.000000e+00> : vector<16x512xf32>
    %27 = tpu.matmul %25, %26, %cst_20 {dimension_numbers = #tpu.dot_dimension_numbers<[1], [0], [0], [1], [0, 0, 1, 1], [], []>} : vector<16x128xbf16>, vector<128x512xbf16>, vector<16x512xf32> -> vector<16x512xf32>
    %c0_21 = arith.constant 0 : index
    %c0_22 = arith.constant 0 : index
    %28 = vector.load %arg9[%c0_21, %c0_22] : memref<1x512xf32, #tpu.memory_space<vmem>>, vector<1x512xf32>
    %29 = vector.broadcast %28 : vector<1x512xf32> to vector<16x512xf32>
    %30 = arith.addf %27, %29 : vector<16x512xf32>
    %cst_23 = arith.constant 0.000000e+00 : f32
    %31 = vector.broadcast %cst_23 : f32 to vector<16x512xf32>
    %32 = arith.maximumf %30, %31 : vector<16x512xf32>
    %33 = arith.truncf %32 : vector<16x512xf32> to vector<16x512xbf16>
    %c0_24 = arith.constant 0 : index
    %c0_25 = arith.constant 0 : index
    %34 = vector.load %arg10[%c0_24, %c0_25] : memref<512x784xbf16, #tpu.memory_space<vmem>>, vector<512x784xbf16>
    %cst_26 = arith.constant dense<0.000000e+00> : vector<16x784xf32>
    %35 = tpu.matmul %33, %34, %cst_26 {dimension_numbers = #tpu.dot_dimension_numbers<[1], [0], [0], [1], [0, 0, 1, 1], [], []>} : vector<16x512xbf16>, vector<512x784xbf16>, vector<16x784xf32> -> vector<16x784xf32>
    %c0_27 = arith.constant 0 : index
    %c0_28 = arith.constant 0 : index
    %36 = vector.load %arg11[%c0_27, %c0_28] : memref<1x784xf32, #tpu.memory_space<vmem>>, vector<1x784xf32>
    %37 = vector.broadcast %36 : vector<1x784xf32> to vector<16x784xf32>
    %38 = arith.addf %35, %37 : vector<16x784xf32>
    %39 = arith.truncf %38 : vector<16x784xf32> to vector<16x784xbf16>
    %c0_29 = arith.constant 0 : index
    %c0_30 = arith.constant 0 : index
    %40 = vector.load %arg12[%c0_29, %c0_30] : memref<16x784xbf16, #tpu.memory_space<vmem>>, vector<16x784xbf16>
    tpu.vector_store %arg12[%c0_29, %c0_30], %39 {strides = array<i32>} : memref<16x784xbf16, #tpu.memory_space<vmem>>, vector<16x784xbf16>,
    return
  }
  func.func @transform_0(%arg0: i32) -> (i32, i32) {
    %c0_i32 = arith.constant 0 : i32
    %c0_i32_0 = arith.constant 0 : i32
    return %arg0, %c0_i32 : i32, i32
  }
  func.func @transform_1(%arg0: i32) -> (i32, i32) {
    %c0_i32 = arith.constant 0 : i32
    %c0_i32_0 = arith.constant 0 : i32
    %c0_i32_1 = arith.constant 0 : i32
    return %c0_i32, %c0_i32_0 : i32, i32
  }
  func.func @transform_2(%arg0: i32) -> (i32, i32) {
    %c0_i32 = arith.constant 0 : i32
    %c0_i32_0 = arith.constant 0 : i32
    %c0_i32_1 = arith.constant 0 : i32
    return %c0_i32, %c0_i32_0 : i32, i32
  }
  func.func @transform_3(%arg0: i32) -> (i32, i32) {
    %c0_i32 = arith.constant 0 : i32
    %c0_i32_0 = arith.constant 0 : i32
    %c0_i32_1 = arith.constant 0 : i32
    return %c0_i32, %c0_i32_0 : i32, i32
  }
  func.func @transform_4(%arg0: i32) -> (i32, i32) {
    %c0_i32 = arith.constant 0 : i32
    %c0_i32_0 = arith.constant 0 : i32
    %c0_i32_1 = arith.constant 0 : i32
    return %c0_i32, %c0_i32_0 : i32, i32
  }
  func.func @transform_5(%arg0: i32) -> (i32, i32) {
    %c0_i32 = arith.constant 0 : i32
    %c0_i32_0 = arith.constant 0 : i32
    %c0_i32_1 = arith.constant 0 : i32
    return %c0_i32, %c0_i32_0 : i32, i32
  }
  func.func @transform_6(%arg0: i32) -> (i32, i32) {
    %c0_i32 = arith.constant 0 : i32
    %c0_i32_0 = arith.constant 0 : i32
    %c0_i32_1 = arith.constant 0 : i32
    return %c0_i32, %c0_i32_0 : i32, i32
  }
  func.func @transform_7(%arg0: i32) -> (i32, i32) {
    %c0_i32 = arith.constant 0 : i32
    %c0_i32_0 = arith.constant 0 : i32
    %c0_i32_1 = arith.constant 0 : i32
    return %c0_i32, %c0_i32_0 : i32, i32
  }
  func.func @transform_8(%arg0: i32) -> (i32, i32) {
    %c0_i32 = arith.constant 0 : i32
    %c0_i32_0 = arith.constant 0 : i32
    %c0_i32_1 = arith.constant 0 : i32
    return %c0_i32, %c0_i32_0 : i32, i32
  }
  func.func @transform_9(%arg0: i32) -> (i32, i32) {
    %c0_i32 = arith.constant 0 : i32
    %c0_i32_0 = arith.constant 0 : i32
    %c0_i32_1 = arith.constant 0 : i32
    return %c0_i32, %c0_i32_0 : i32, i32
  }
  func.func @transform_10(%arg0: i32) -> (i32, i32) {
    %c0_i32 = arith.constant 0 : i32
    %c0_i32_0 = arith.constant 0 : i32
    %c0_i32_1 = arith.constant 0 : i32
    return %c0_i32, %c0_i32_0 : i32, i32
  }
  func.func @transform_11(%arg0: i32) -> (i32, i32) {
    %c0_i32 = arith.constant 0 : i32
    %c0_i32_0 = arith.constant 0 : i32
    return %arg0, %c0_i32 : i32, i32
  }
}

module attributes {stable_mosaic.version = 11 : i64} {
  func.func @_autoencoder_kernel(%arg0: i32, %arg1: memref<16x784xf32, #tpu.memory_space<vmem>>, %arg2: memref<784x512xbf16, #tpu.memory_space<vmem>>, %arg3: memref<1x512xf32, #tpu.memory_space<vmem>>, %arg4: memref<512x128xbf16, #tpu.memory_space<vmem>>, %arg5: memref<1x128xf32, #tpu.memory_space<vmem>>, %arg6: memref<128x128xbf16, #tpu.memory_space<vmem>>, %arg7: memref<1x128xf32, #tpu.memory_space<vmem>>, %arg8: memref<128x512xbf16, #tpu.memory_space<vmem>>, %arg9: memref<1x512xf32, #tpu.memory_space<vmem>>, %arg10: memref<512x784xbf16, #tpu.memory_space<vmem>>, %arg11: memref<1x784xf32, #tpu.memory_space<vmem>>, %arg12: memref<16x784xbf16, #tpu.memory_space<vmem>>) attributes {dimension_semantics = [#tpu.dimension_semantics<parallel>], iteration_bounds = array<i64: 1>, scalar_prefetch = 0 : i64, scratch_operands = 0 : i64, tpu.core_type = #tpu.core_type<tc>, window_params = [{transform_indices = @transform_0, window_bounds = array<i64: 16, 784>}, {pipeline_mode = #tpu.pipeline_mode<synchronous>, transform_indices = @transform_1, window_bounds = array<i64: 784, 512>}, {pipeline_mode = #tpu.pipeline_mode<synchronous>, transform_indices = @transform_2, window_bounds = array<i64: 1, 512>}, {pipeline_mode = #tpu.pipeline_mode<synchronous>, transform_indices = @transform_3, window_bounds = array<i64: 512, 128>}, {pipeline_mode = #tpu.pipeline_mode<synchronous>, transform_indices = @transform_4, window_bounds = array<i64: 1, 128>}, {pipeline_mode = #tpu.pipeline_mode<synchronous>, transform_indices = @transform_5, window_bounds = array<i64: 128, 128>}, {pipeline_mode = #tpu.pipeline_mode<synchronous>, transform_indices = @transform_6, window_bounds = array<i64: 1, 128>}, {pipeline_mode = #tpu.pipeline_mode<synchronous>, transform_indices = @transform_7, window_bounds = array<i64: 128, 512>}, {pipeline_mode = #tpu.pipeline_mode<synchronous>, transform_indices = @transform_8, window_bounds = array<i64: 1, 512>}, {pipeline_mode = #tpu.pipeline_mode<synchronous>, transform_indices = @transform_9, window_bounds = array<i64: 512, 784>}, {pipeline_mode = #tpu.pipeline_mode<synchronous>, transform_indices = @transform_10, window_bounds = array<i64: 1, 784>}, {transform_indices = @transform_11, window_bounds = array<i64: 16, 784>}]} {
    %c0 = arith.constant 0 : index
    %c0_0 = arith.constant 0 : index
    %0 = vector.load %arg1[%c0, %c0_0] : memref<16x784xf32, #tpu.memory_space<vmem>>, vector<16x784xf32>
    %1 = arith.truncf %0 : vector<16x784xf32> to vector<16x784xbf16>
    %c0_1 = arith.constant 0 : index
    %c0_2 = arith.constant 0 : index
    %2 = vector.load %arg2[%c0_1, %c0_2] : memref<784x512xbf16, #tpu.memory_space<vmem>>, vector<784x512xbf16>
    %cst = arith.constant dense<0.000000e+00> : vector<16x512xf32>
    %3 = tpu.matmul %1, %2, %cst {dimension_numbers = #tpu.dot_dimension_numbers<[1], [0], [0], [1], [0, 0, 1, 1], [], []>} : vector<16x784xbf16>, vector<784x512xbf16>, vector<16x512xf32> -> vector<16x512xf32>
    %c0_3 = arith.constant 0 : index
    %c0_4 = arith.constant 0 : index
    %4 = vector.load %arg3[%c0_3, %c0_4] : memref<1x512xf32, #tpu.memory_space<vmem>>, vector<1x512xf32>
    %5 = vector.broadcast %4 : vector<1x512xf32> to vector<16x512xf32>
    %6 = arith.addf %3, %5 : vector<16x512xf32>
    %cst_5 = arith.constant 0.000000e+00 : f32
    %7 = vector.broadcast %cst_5 : f32 to vector<16x512xf32>
    %8 = arith.maximumf %6, %7 : vector<16x512xf32>
    %9 = arith.truncf %8 : vector<16x512xf32> to vector<16x512xbf16>
    %c0_6 = arith.constant 0 : index
    %c0_7 = arith.constant 0 : index
    %10 = vector.load %arg4[%c0_6, %c0_7] : memref<512x128xbf16, #tpu.memory_space<vmem>>, vector<512x128xbf16>
    %cst_8 = arith.constant dense<0.000000e+00> : vector<16x128xf32>
    %11 = tpu.matmul %9, %10, %cst_8 {dimension_numbers = #tpu.dot_dimension_numbers<[1], [0], [0], [1], [0, 0, 1, 1], [], []>} : vector<16x512xbf16>, vector<512x128xbf16>, vector<16x128xf32> -> vector<16x128xf32>
    %c0_9 = arith.constant 0 : index
    %c0_10 = arith.constant 0 : index
    %12 = vector.load %arg5[%c0_9, %c0_10] : memref<1x128xf32, #tpu.memory_space<vmem>>, vector<1x128xf32>
    %13 = vector.broadcast %12 : vector<1x128xf32> to vector<16x128xf32>
    %14 = arith.addf %11, %13 : vector<16x128xf32>
    %cst_11 = arith.constant 0.000000e+00 : f32
    %15 = vector.broadcast %cst_11 : f32 to vector<16x128xf32>
    %16 = arith.maximumf %14, %15 : vector<16x128xf32>
    %17 = arith.truncf %16 : vector<16x128xf32> to vector<16x128xbf16>
    %c0_12 = arith.constant 0 : index
    %c0_13 = arith.constant 0 : index
    %18 = vector.load %arg6[%c0_12, %c0_13] : memref<128x128xbf16, #tpu.memory_space<vmem>>, vector<128x128xbf16>
    %cst_14 = arith.constant dense<0.000000e+00> : vector<16x128xf32>
    %19 = tpu.matmul %17, %18, %cst_14 {dimension_numbers = #tpu.dot_dimension_numbers<[1], [0], [0], [1], [0, 0, 1, 1], [], []>} : vector<16x128xbf16>, vector<128x128xbf16>, vector<16x128xf32> -> vector<16x128xf32>
    %c0_15 = arith.constant 0 : index
    %c0_16 = arith.constant 0 : index
    %20 = vector.load %arg7[%c0_15, %c0_16] : memref<1x128xf32, #tpu.memory_space<vmem>>, vector<1x128xf32>
    %21 = vector.broadcast %20 : vector<1x128xf32> to vector<16x128xf32>
    %22 = arith.addf %19, %21 : vector<16x128xf32>
    %cst_17 = arith.constant 0.000000e+00 : f32
    %23 = vector.broadcast %cst_17 : f32 to vector<16x128xf32>
    %24 = arith.maximumf %22, %23 : vector<16x128xf32>
    %25 = arith.truncf %24 : vector<16x128xf32> to vector<16x128xbf16>
    %c0_18 = arith.constant 0 : index
    %c0_19 = arith.constant 0 : index
    %26 = vector.load %arg8[%c0_18, %c0_19] : memref<128x512xbf16, #tpu.memory_space<vmem>>, vector<128x512xbf16>
    %cst_20 = arith.constant dense<0.000000e+00> : vector<16x512xf32>
    %27 = tpu.matmul %25, %26, %cst_20 {dimension_numbers = #tpu.dot_dimension_numbers<[1], [0], [0], [1], [0, 0, 1, 1], [], []>} : vector<16x128xbf16>, vector<128x512xbf16>, vector<16x512xf32> -> vector<16x512xf32>
    %c0_21 = arith.constant 0 : index
    %c0_22 = arith.constant 0 : index
    %28 = vector.load %arg9[%c0_21, %c0_22] : memref<1x512xf32, #tpu.memory_space<vmem>>, vector<1x512xf32>
    %29 = vector.broadcast %28 : vector<1x512xf32> to vector<16x512xf32>
    %30 = arith.addf %27, %29 : vector<16x512xf32>
    %cst_23 = arith.constant 0.000000e+00 : f32
    %31 = vector.broadcast %cst_23 : f32 to vector<16x512xf32>
    %32 = arith.maximumf %30, %31 : vector<16x512xf32>
    %33 = arith.truncf %32 : vector<16x512xf32> to vector<16x512xbf16>
    %c0_24 = arith.constant 0 : index
    %c0_25 = arith.constant 0 : index
    %34 = vector.load %arg10[%c0_24, %c0_25] : memref<512x784xbf16, #tpu.memory_space<vmem>>, vector<512x784xbf16>
    %cst_26 = arith.constant dense<0.000000e+00> : vector<16x784xf32>
    %35 = tpu.matmul %33, %34, %cst_26 {dimension_numbers = #tpu.dot_dimension_numbers<[1], [0], [0], [1], [0, 0, 1, 1], [], []>} : vector<16x512xbf16>, vector<512x784xbf16>, vector<16x784xf32> -> vector<16x784xf32>
    %c0_27 = arith.constant 0 : index
    %c0_28 = arith.constant 0 : index
    %36 = vector.load %arg11[%c0_27, %c0_28] : memref<1x784xf32, #tpu.memory_space<vmem>>, vector<1x784xf32>
    %37 = vector.broadcast %36 : vector<1x784xf32> to vector<16x784xf32>
    %38 = arith.addf %35, %37 : vector<16x784xf32>
    %39 = arith.truncf %38 : vector<16x784xf32> to vector<16x784xbf16>
    %c0_29 = arith.constant 0 : index
    %c0_30 = arith.constant 0 : index
    %40 = vector.load %arg12[%c0_29, %c0_30] : memref<16x784xbf16, #tpu.memory_space<vmem>>, vector<16x784xbf16>
    tpu.vector_store %arg12[%c0_29, %c0_30], %39 {strides = array<i32>} : memref<16x784xbf16, #tpu.memory_space<vmem>>, vector<16x784xbf16>,
    return
  }
  func.func @transform_0(%arg0: i32) -> (i32, i32) {
    %c0_i32 = arith.constant 0 : i32
    %c0_i32_0 = arith.constant 0 : i32
    return %arg0, %c0_i32 : i32, i32
  }
  func.func @transform_1(%arg0: i32) -> (i32, i32) {
    %c0_i32 = arith.constant 0 : i32
    %c0_i32_0 = arith.constant 0 : i32
    %c0_i32_1 = arith.constant 0 : i32
    return %c0_i32, %c0_i32_0 : i32, i32
  }
  func.func @transform_2(%arg0: i32) -> (i32, i32) {
    %c0_i32 = arith.constant 0 : i32
    %c0_i32_0 = arith.constant 0 : i32
    %c0_i32_1 = arith.constant 0 : i32
    return %c0_i32, %c0_i32_0 : i32, i32
  }
  func.func @transform_3(%arg0: i32) -> (i32, i32) {
    %c0_i32 = arith.constant 0 : i32
    %c0_i32_0 = arith.constant 0 : i32
    %c0_i32_1 = arith.constant 0 : i32
    return %c0_i32, %c0_i32_0 : i32, i32
  }
  func.func @transform_4(%arg0: i32) -> (i32, i32) {
    %c0_i32 = arith.constant 0 : i32
    %c0_i32_0 = arith.constant 0 : i32
    %c0_i32_1 = arith.constant 0 : i32
    return %c0_i32, %c0_i32_0 : i32, i32
  }
  func.func @transform_5(%arg0: i32) -> (i32, i32) {
    %c0_i32 = arith.constant 0 : i32
    %c0_i32_0 = arith.constant 0 : i32
    %c0_i32_1 = arith.constant 0 : i32
    return %c0_i32, %c0_i32_0 : i32, i32
  }
  func.func @transform_6(%arg0: i32) -> (i32, i32) {
    %c0_i32 = arith.constant 0 : i32
    %c0_i32_0 = arith.constant 0 : i32
    %c0_i32_1 = arith.constant 0 : i32
    return %c0_i32, %c0_i32_0 : i32, i32
  }
  func.func @transform_7(%arg0: i32) -> (i32, i32) {
    %c0_i32 = arith.constant 0 : i32
    %c0_i32_0 = arith.constant 0 : i32
    %c0_i32_1 = arith.constant 0 : i32
    return %c0_i32, %c0_i32_0 : i32, i32
  }
  func.func @transform_8(%arg0: i32) -> (i32, i32) {
    %c0_i32 = arith.constant 0 : i32
    %c0_i32_0 = arith.constant 0 : i32
    %c0_i32_1 = arith.constant 0 : i32
    return %c0_i32, %c0_i32_0 : i32, i32
  }
  func.func @transform_9(%arg0: i32) -> (i32, i32) {
    %c0_i32 = arith.constant 0 : i32
    %c0_i32_0 = arith.constant 0 : i32
    %c0_i32_1 = arith.constant 0 : i32
    return %c0_i32, %c0_i32_0 : i32, i32
  }
  func.func @transform_10(%arg0: i32) -> (i32, i32) {
    %c0_i32 = arith.constant 0 : i32
    %c0_i32_0 = arith.constant 0 : i32
    %c0_i32_1 = arith.constant 0 : i32
    return %c0_i32, %c0_i32_0 : i32, i32
  }
  func.func @transform_11(%arg0: i32) -> (i32, i32) {
    %c0_i32 = arith.constant 0 : i32
    %c0_i32_0 = arith.constant 0 : i32
    return %arg0, %c0_i32 : i32, i32
  }
}

</mosaic_0001>

<bundles_post_ra>
// kernel: tpu_custom_call.1
= control target key start
LH: loop header
LB: loop body
LE: loop exit
PB: predicated region body
PF: predicated region fallthrough
CT: control target
= control target key end

     0   :  { %vm1259_vm0 = vcmask 130048   ;;  %s7305_s0 = inlined_call_operand.vmem [shape: f32[16,784], index: 0, kind: input, shape index: {}]   ;;  %s7306_s1 = inlined_call_operand.vmem [shape: bf16[784,512], index: 1, kind: input, shape index: {}]   ;;  %s7307_s2 = inlined_call_operand.vmem [shape: f32[1,512], index: 2, kind: input, shape index: {}]   ;;  %s7308_s3 = inlined_call_operand.vmem [shape: bf16[512,128], index: 3, kind: input, shape index: {}]   ;;  %s7309_s4 = inlined_call_operand.vmem [shape: f32[1,128], index: 4, kind: input, shape index: {}]   ;;  %s7310_s5 = inlined_call_operand.vmem [shape: bf16[128,128], index: 5, kind: input, shape index: {}]   ;;  %s7311_s6 = inlined_call_operand.vmem [shape: f32[1,128], index: 6, kind: input, shape index: {}]   ;;  %s7312_s7 = inlined_call_operand.vmem [shape: bf16[128,512], index: 7, kind: input, shape index: {}]   ;;  %s7313_s8 = inlined_call_operand.vmem [shape: f32[1,512], index: 8, kind: input, shape index: {}]   ;;  %s7314_s9 = inlined_call_operand.vmem [shape: bf16[512,784], index: 9, kind: input, shape index: {}]   ;;  %s7315_s10 = inlined_call_operand.vmem [shape: f32[1,784], index: 10, kind: input, shape index: {}]   ;;  %s7316_s11 = inlined_call_operand.hbm [shape: bf16[16,784], index: 11, kind: output, shape index: {}]  }
   0x1   :  { %v4883_v0 = vld [vmem:[%s7306_s1 + $0xe4] ss:$16 sps:$4 sm:$0xff]   ;;  %v4887_v2 = vld [vmem:[%s7306_s1 + $0xe0] ss:$16 sps:$4 sm:$0xff]   ;;  %v41_v46 = vld [vmem:[%s7305_s0 + $0x8] sm:$0xff] }
   0x2   :  { %v4885_v1 = vld [vmem:[%s7306_s1 + $0x2e4] ss:$16 sps:$4 sm:$0xff]   ;;  %1263 = vmatprep.subr.bf16.mxu0 %v4883_v0  ;;  %v4888_v3 = vld [vmem:[%s7306_s1 + $0x2e0] ss:$16 sps:$4 sm:$0xff]   ;;  %v43_v48 = vld [vmem:[%s7305_s0 + $0x18] sm:$0xff] }
   0x3   :  { %1306 = vmatprep.subr.bf16.mxu1 %v4885_v1  ;;  %v4889_v4 = vld [vmem:[%s7306_s1 + $0xc4] ss:$16 sps:$4 sm:$0xff]   ;;  %1264 = vmatpush1.bf16.msra.mxu0 %v4887_v2  ;;  %v4893_v6 = vld [vmem:[%s7306_s1 + $0xc0] ss:$16 sps:$4 sm:$0xff]  }
   0x4   :  { %1307 = vmatpush1.bf16.msra.mxu1 %v4888_v3  ;;  %v4891_v5 = vld [vmem:[%s7306_s1 + $0x2c4] ss:$16 sps:$4 sm:$0xff]   ;;  %1265 = vmatprep.subr.bf16.mxu0 %v4889_v4  ;;  %v4894_v7 = vld [vmem:[%s7306_s1 + $0x2c0] ss:$16 sps:$4 sm:$0xff]  }
   0x5   :  { %1308 = vmatprep.subr.bf16.mxu1 %v4891_v5  ;;  %v4895_v8 = vld [vmem:[%s7306_s1 + $0xa4] ss:$16 sps:$4 sm:$0xff]   ;;  %v4899_v10 = vld [vmem:[%s7306_s1 + $0xa0] ss:$16 sps:$4 sm:$0xff]  }
   0x6   :  { %v4897_v9 = vld [vmem:[%s7306_s1 + $0x2a4] ss:$16 sps:$4 sm:$0xff]   ;;  %v4900_v11 = vld [vmem:[%s7306_s1 + $0x2a0] ss:$16 sps:$4 sm:$0xff]  }
   0x7   :  { %1266 = vmatpush1.bf16.msra.mxu0 %v4893_v6  ;;  %v4901_v12 = vld [vmem:[%s7306_s1 + $0x84] ss:$16 sps:$4 sm:$0xff]   ;;  %v4905_v14 = vld [vmem:[%s7306_s1 + $0x80] ss:$16 sps:$4 sm:$0xff]  }
   0x8   :  { %1309 = vmatpush1.bf16.msra.mxu1 %v4894_v7  ;;  %1267 = vmatprep.subr.bf16.mxu0 %v4895_v8  ;;  %v4903_v13 = vld [vmem:[%s7306_s1 + $0x284] ss:$16 sps:$4 sm:$0xff]   ;;  %v4906_v15 = vld [vmem:[%s7306_s1 + $0x280] ss:$16 sps:$4 sm:$0xff]   ;;  %v47_v7 = vld [vmem:[%s7305_s0 + $0x38] sm:$0xff] }
   0x9   :  { %1310 = vmatprep.subr.bf16.mxu1 %v4897_v9  ;;  %v4907_v16 = vld [vmem:[%s7306_s1 + $0x64] ss:$16 sps:$4 sm:$0xff]   ;;  %v4911_v18 = vld [vmem:[%s7306_s1 + $0x60] ss:$16 sps:$4 sm:$0xff]   ;;  %v49_v9 = vld [vmem:[%s7305_s0 + $0x48] sm:$0xff] }
   0xa   :  { %v4909_v17 = vld [vmem:[%s7306_s1 + $0x264] ss:$16 sps:$4 sm:$0xff]   ;;  %v4912_v19 = vld [vmem:[%s7306_s1 + $0x260] ss:$16 sps:$4 sm:$0xff]  }
   0xb   :  { %1268 = vmatpush1.bf16.msra.mxu0 %v4899_v10  ;;  %v4913_v20 = vld [vmem:[%s7306_s1 + $0x44] ss:$16 sps:$4 sm:$0xff]   ;;  %v4917_v22 = vld [vmem:[%s7306_s1 + $0x40] ss:$16 sps:$4 sm:$0xff]  }
   0xc   :  { %1311 = vmatpush1.bf16.msra.mxu1 %v4900_v11  ;;  %1269 = vmatprep.subr.bf16.mxu0 %v4901_v12  ;;  %v4915_v21 = vld [vmem:[%s7306_s1 + $0x244] ss:$16 sps:$4 sm:$0xff]   ;;  %v4918_v23 = vld [vmem:[%s7306_s1 + $0x240] ss:$16 sps:$4 sm:$0xff]  }
   0xd   :  { %1312 = vmatprep.subr.bf16.mxu1 %v4903_v13  ;;  %v4919_v24 = vld [vmem:[%s7306_s1 + $0x24] ss:$16 sps:$4 sm:$0xff]   ;;  %v4923_v26 = vld [vmem:[%s7306_s1 + $0x20] ss:$16 sps:$4 sm:$0xff]  }
   0xe   :  { %v4921_v25 = vld [vmem:[%s7306_s1 + $0x224] ss:$16 sps:$4 sm:$0xff]   ;;  %v4924_v27 = vld [vmem:[%s7306_s1 + $0x220] ss:$16 sps:$4 sm:$0xff]  }
   0xf   :  { %1270 = vmatpush1.bf16.msra.mxu0 %v4905_v14  ;;  %v4925_v28 = vld [vmem:[%s7306_s1 + $0x4] ss:$16 sps:$4 sm:$0xff]   ;;  %v4929_v30 = vld [vmem:[%s7306_s1] ss:$16 sps:$4 sm:$0xff]  }
  0x10   :  { %1313 = vmatpush1.bf16.msra.mxu1 %v4906_v15  ;;  %1271 = vmatprep.subr.bf16.mxu0 %v4907_v16  ;;  %v4927_v29 = vld [vmem:[%s7306_s1 + $0x204] ss:$16 sps:$4 sm:$0xff]   ;;  %v4930_v31 = vld [vmem:[%s7306_s1 + $0x200] ss:$16 sps:$4 sm:$0xff]  }
  0x11   :  { %1314 = vmatprep.subr.bf16.mxu1 %v4909_v17  ;;  %v4931_v32 = vld [vmem:[%s7306_s1 + $0x1e4] ss:$16 sps:$4 sm:$0xff]   ;;  %v4935_v34 = vld [vmem:[%s7306_s1 + $0x1e0] ss:$16 sps:$4 sm:$0xff]   ;;  %v4990_v17 = vld [vmem:[%s7306_s1 + $0xec] ss:$16 sps:$4 sm:$0xff]  }
  0x12   :  { %v4933_v33 = vld [vmem:[%s7306_s1 + $0x3e4] ss:$16 sps:$4 sm:$0xff]   ;;  %v4936_v35 = vld [vmem:[%s7306_s1 + $0x3e0] ss:$16 sps:$4 sm:$0xff]  }
  0x13   :  { %1272 = vmatpush1.bf16.msra.mxu0 %v4911_v18  ;;  %v4937_v36 = vld [vmem:[%s7306_s1 + $0x1c4] ss:$16 sps:$4 sm:$0xff]   ;;  %v4941_v38 = vld [vmem:[%s7306_s1 + $0x1c0] ss:$16 sps:$4 sm:$0xff]  }
  0x14   :  { %1315 = vmatpush1.bf16.msra.mxu1 %v4912_v19  ;;  %1273 = vmatprep.subr.bf16.mxu0 %v4913_v20  ;;  %v4939_v37 = vld [vmem:[%s7306_s1 + $0x3c4] ss:$16 sps:$4 sm:$0xff]   ;;  %v4942_v39 = vld [vmem:[%s7306_s1 + $0x3c0] ss:$16 sps:$4 sm:$0xff]   ;;  %v53_v20 = vld [vmem:[%s7305_s0 + $0x68] sm:$0xff] }
  0x15   :  { %1316 = vmatprep.subr.bf16.mxu1 %v4915_v21  ;;  %v4943_v40 = vld [vmem:[%s7306_s1 + $0x1a4] ss:$16 sps:$4 sm:$0xff]   ;;  %v4947_v42 = vld [vmem:[%s7306_s1 + $0x1a0] ss:$16 sps:$4 sm:$0xff]   ;;  %v5607_v21 = vmov 0  }
  0x16   :  { %v4945_v41 = vld [vmem:[%s7306_s1 + $0x3a4] ss:$16 sps:$4 sm:$0xff]   ;;  %v4948_v43 = vld [vmem:[%s7306_s1 + $0x3a0] ss:$16 sps:$4 sm:$0xff]  }
  0x17   :  { %1274 = vmatpush1.bf16.msra.mxu0 %v4917_v22  ;;  %v4949_v44 = vld [vmem:[%s7306_s1 + $0x184] ss:$16 sps:$4 sm:$0xff]   ;;  %v4953_v50 = vld [vmem:[%s7306_s1 + $0x180] ss:$16 sps:$4 sm:$0xff]  }
  0x18   :  { %1317 = vmatpush1.bf16.msra.mxu1 %v4918_v23  ;;  %1275 = vmatprep.subr.bf16.mxu0 %v4919_v24  ;;  %v4951_v45 = vld [vmem:[%s7306_s1 + $0x384] ss:$16 sps:$4 sm:$0xff]   ;;  %v4954_v51 = vld [vmem:[%s7306_s1 + $0x380] ss:$16 sps:$4 sm:$0xff]   ;;  %v4988_v24 = vld [vmem:[%s7306_s1 + $0xe8] ss:$16 sps:$4 sm:$0xff]  }
  0x19   :  { %1318 = vmatprep.subr.bf16.mxu1 %v4921_v25  ;;  %v48_v47 = vld [vmem:[%s7305_s0 + $0x40] sm:$0xff]  ;;  %v50_v49 = vld [vmem:[%s7305_s0 + $0x50] sm:$0xff] }
  0x1a   :  { %v4955_v52 = vld [vmem:[%s7306_s1 + $0x164] ss:$16 sps:$4 sm:$0xff]   ;;  %v5832_v53 = vpack.c.bf16 %v48_v47, %v41_v46  ;;  %v5834_v54 = vpack.c.bf16 %v50_v49, %v43_v48  ;;  %v4959_v56 = vld [vmem:[%s7306_s1 + $0x160] ss:$16 sps:$4 sm:$0xff]   ;;  %v5018_v47 = vld [vmem:[%s7306_s1 + $0x48] ss:$16 sps:$4 sm:$0xff]  }
  0x1b   :  { %1276 = vmatpush1.bf16.msra.mxu0 %v4923_v26  ;;  %v4957_v55 = vld [vmem:[%s7306_s1 + $0x364] ss:$16 sps:$4 sm:$0xff]   ;;  %v4960_v57 = vld [vmem:[%s7306_s1 + $0x360] ss:$16 sps:$4 sm:$0xff]   ;;  %v4996_v26 = vld [vmem:[%s7306_s1 + $0xcc] ss:$16 sps:$4 sm:$0xff]  }
  0x1c   :  { %1319 = vmatpush1.bf16.msra.mxu1 %v4924_v27  ;;  %1277 = vmatprep.subr.bf16.mxu0 %v4925_v28  ;;  %v4961_v58 = vld [vmem:[%s7306_s1 + $0x144] ss:$16 sps:$4 sm:$0xff]   ;;  %v4965_v60 = vld [vmem:[%s7306_s1 + $0x140] ss:$16 sps:$4 sm:$0xff]   ;;  %v4994_v28 = vld [vmem:[%s7306_s1 + $0xc8] ss:$16 sps:$4 sm:$0xff]  }
  0x1d   :  { %1320 = vmatprep.subr.bf16.mxu1 %v4927_v29  ;;  %1295 = vmatprep.mubr.bf16.mxu0 %v5832_v53  ;;  %v4963_v59 = vld [vmem:[%s7306_s1 + $0x344] ss:$16 sps:$4 sm:$0xff]   ;;  %v4966_v61 = vld [vmem:[%s7306_s1 + $0x340] ss:$16 sps:$4 sm:$0xff]   ;;  %v5026_v49 = vld [vmem:[%s7306_s1 + $0x2c] ss:$16 sps:$4 sm:$0xff]  }
  0x1e   :  { %1338 = vmatprep.mubr.bf16.mxu1 %v5834_v54  ;;  %v4967_v62 = vld [vmem:[%s7306_s1 + $0x124] ss:$16 sps:$4 sm:$0xff]   ;;  %v4971_v0 = vld [vmem:[%s7306_s1 + $0x120] ss:$16 sps:$4 sm:$0xff]  }
  0x1f   :  { %1278 = vmatpush1.bf16.msra.mxu0 %v4929_v30  ;;  %v4969_v63 = vld [vmem:[%s7306_s1 + $0x324] ss:$16 sps:$4 sm:$0xff]   ;;  %v4972_v1 = vld [vmem:[%s7306_s1 + $0x320] ss:$16 sps:$4 sm:$0xff]   ;;  %v5002_v30 = vld [vmem:[%s7306_s1 + $0xac] ss:$16 sps:$4 sm:$0xff]  }
  0x20   :  { %1321 = vmatpush1.bf16.msra.mxu1 %v4930_v31  ;;  %1279 = vmatprep.subr.bf16.mxu0 %v4931_v32  ;;  %v4973_v2 = vld [vmem:[%s7306_s1 + $0x104] ss:$16 sps:$4 sm:$0xff]   ;;  %v4977_v4 = vld [vmem:[%s7306_s1 + $0x100] ss:$16 sps:$4 sm:$0xff]   ;;  %v5000_v32 = vld [vmem:[%s7306_s1 + $0xa8] ss:$16 sps:$4 sm:$0xff]  }
  0x21   :  { %1322 = vmatprep.subr.bf16.mxu1 %v4933_v33  ;;  %v4975_v3 = vld [vmem:[%s7306_s1 + $0x304] ss:$16 sps:$4 sm:$0xff]   ;;  %v4978_v5 = vld [vmem:[%s7306_s1 + $0x300] ss:$16 sps:$4 sm:$0xff]  }
  0x22   :  { %v40_v6 = vld [vmem:[%s7305_s0] sm:$0xff]  ;;  %v42_v8 = vld [vmem:[%s7305_s0 + $0x10] sm:$0xff] }
  0x23   :  { %1280 = vmatpush2.bf16.msra.mxu0 %v4935_v34  ;;  %v4981_v10 = vld [vmem:[%s7306_s1 + $0x4e4] ss:$16 sps:$4 sm:$0xff]   ;;  %v5901_v12 = vpack.c.bf16 %v47_v7, %v40_v6  ;;  %v5903_v13 = vpack.c.bf16 %v49_v9, %v42_v8  ;;  %v4979_v14 = vld [vmem:[%s7306_s1 + $0x4e0] ss:$16 sps:$4 sm:$0xff]   ;;  %v5008_v34 = vld [vmem:[%s7306_s1 + $0x8c] ss:$16 sps:$4 sm:$0xff]  }
  0x24   :  { %1323 = vmatpush2.bf16.msra.mxu1 %v4936_v35  ;;  %1281 = vmatprep.subr.bf16.mxu0 %v4937_v36  ;;  %v4984_v11 = vld [vmem:[%s7306_s1 + $0x604] ss:$16 sps:$4 sm:$0xff]   ;;  %v4982_v15 = vld [vmem:[%s7306_s1 + $0x600] ss:$16 sps:$4 sm:$0xff]   ;;  %v5006_v36 = vld [vmem:[%s7306_s1 + $0x88] ss:$16 sps:$4 sm:$0xff]  }
  0x25   :  { %1324 = vmatprep.subr.bf16.mxu1 %v4939_v37  ;;  %v4987_v16 = vld [vmem:[%s7306_s1 + $0x4c4] ss:$16 sps:$4 sm:$0xff]   ;;  %v4985_v18 = vld [vmem:[%s7306_s1 + $0x4c0] ss:$16 sps:$4 sm:$0xff]   ;;  %v5056_v6 = vld [vmem:[%s7306_s1 + $0x18c] ss:$16 sps:$4 sm:$0xff]  }
  0x26   :  { %v46_v19 = vld [vmem:[%s7305_s0 + $0x30] sm:$0xff]  ;;  %v5054_v8 = vld [vmem:[%s7306_s1 + $0x188] ss:$16 sps:$4 sm:$0xff]  }
  0x27   :  { %1282 = vmatpush2.bf16.msra.mxu0 %v4941_v38  ;;  %v4993_v22 = vld [vmem:[%s7306_s1 + $0x4a4] ss:$16 sps:$4 sm:$0xff]   ;;  %v5932_v23 = vpack.c.bf16 %v53_v20, %v46_v19  ;;  %v4991_v25 = vld [vmem:[%s7306_s1 + $0x4a0] ss:$16 sps:$4 sm:$0xff]   ;;  %v5014_v38 = vld [vmem:[%s7306_s1 + $0x6c] ss:$16 sps:$4 sm:$0xff]  }
  0x28   :  { %1325 = vmatpush2.bf16.msra.mxu1 %v4942_v39  ;;  %1283 = vmatprep.subr.bf16.mxu0 %v4943_v40  ;;  %v4999_v27 = vld [vmem:[%s7306_s1 + $0x484] ss:$16 sps:$4 sm:$0xff]   ;;  %v4997_v29 = vld [vmem:[%s7306_s1 + $0x480] ss:$16 sps:$4 sm:$0xff]   ;;  %v5012_v40 = vld [vmem:[%s7306_s1 + $0x68] ss:$16 sps:$4 sm:$0xff]  }
  0x29   :  { %1326 = vmatprep.subr.bf16.mxu1 %v4945_v41  ;;  %v5005_v31 = vld [vmem:[%s7306_s1 + $0x464] ss:$16 sps:$4 sm:$0xff]   ;;  %v5003_v33 = vld [vmem:[%s7306_s1 + $0x460] ss:$16 sps:$4 sm:$0xff]   ;;  %v45_v41 = vld [vmem:[%s7305_s0 + $0x28] sm:$0xff] }
  0x2a   :  { %v5011_v35 = vld [vmem:[%s7306_s1 + $0x444] ss:$16 sps:$4 sm:$0xff]   ;;  %v5009_v37 = vld [vmem:[%s7306_s1 + $0x440] ss:$16 sps:$4 sm:$0xff]  }
  0x2b   :  { %1284 = vmatpush2.bf16.msra.mxu0 %v4947_v42  ;;  %v5017_v39 = vld [vmem:[%s7306_s1 + $0x424] ss:$16 sps:$4 sm:$0xff]   ;;  %v5021_v48 = vld [vmem:[%s7306_s1 + $0x400] ss:$16 sps:$4 sm:$0xff]  }
  0x2c   :  { %1327 = vmatpush2.bf16.msra.mxu1 %v4948_v43  ;;  %1285 = vmatprep.subr.bf16.mxu0 %v4949_v44  ;;  %v52_v42 = vld [vmem:[%s7305_s0 + $0x60] sm:$0xff] }
  0x2d   :  { %1328 = vmatprep.subr.bf16.mxu1 %v4951_v45  ;;  %v5015_v43 = vld [vmem:[%s7306_s1 + $0x420] ss:$16 sps:$4 sm:$0xff]   ;;  %v5997_v44 = vpack.c.bf16 %v52_v42, %v45_v41  ;;  %v5020_v45 = vld [vmem:[%s7306_s1 + $0x4c] ss:$16 sps:$4 sm:$0xff]   ;;  %v5023_v46 = vld [vmem:[%s7306_s1 + $0x404] ss:$16 sps:$4 sm:$0xff]  }
  0x2e   :  { %v5059_v7 = vld [vmem:[%s7306_s1 + $0x544] ss:$16 sps:$4 sm:$0xff]   ;;  %v5057_v9 = vld [vmem:[%s7306_s1 + $0x540] ss:$16 sps:$4 sm:$0xff]   ;;  %v5101_v41 = vld [vmem:[%s7306_s1 + $0x26c] ss:$16 sps:$4 sm:$0xff]  }
  0x2f   :  { %1286 = vmatpush2.bf16.msra.mxu0 %v4953_v50  ;;  %v5029_v50 = vld [vmem:[%s7306_s1 + $0x5e4] ss:$16 sps:$4 sm:$0xff]   ;;  %v5069_v19 = vld [vmem:[%s7306_s1 + $0x500] ss:$16 sps:$4 sm:$0xff]   ;;  %v5096_v42 = vld [vmem:[%s7306_s1 + $0x4a8] ss:$16 sps:$4 sm:$0xff]  }
  0x30   :  { %1329 = vmatpush2.bf16.msra.mxu1 %v4954_v51  ;;  %1287 = vmatprep.subr.bf16.mxu0 %v4955_v52  ;;  %v5024_v51 = vld [vmem:[%s7306_s1 + $0x28] ss:$16 sps:$4 sm:$0xff]   ;;  %v5027_v52 = vld [vmem:[%s7306_s1 + $0x5e0] ss:$16 sps:$4 sm:$0xff]  }
  0x31   :  { %1330 = vmatprep.subr.bf16.mxu1 %v4957_v55  ;;  %v5035_v55 = vld [vmem:[%s7306_s1 + $0x5c4] ss:$16 sps:$4 sm:$0xff]  }
  0x32   :  { %v44_v20 = vld [vmem:[%s7305_s0 + $0x20] sm:$0xff] }
  0x33   :  { %1288 = vmatpush2.bf16.msra.mxu0 %v4959_v56  ;;  %v5030_v56 = vld [vmem:[%s7306_s1 + $0x8] ss:$16 sps:$4 sm:$0xff]  }
  0x34   :  { %1331 = vmatpush2.bf16.msra.mxu1 %v4960_v57  ;;  %1289 = vmatprep.subr.bf16.mxu0 %v4961_v58  ;;  %v5033_v57 = vld [vmem:[%s7306_s1 + $0x5c0] ss:$16 sps:$4 sm:$0xff]   ;;  %v5038_v58 = vld [vmem:[%s7306_s1 + $0x1ec] ss:$16 sps:$4 sm:$0xff]  }
  0x35   :  { %1332 = vmatprep.subr.bf16.mxu1 %v4963_v59  ;;  %v5041_v59 = vld [vmem:[%s7306_s1 + $0x5a4] ss:$16 sps:$4 sm:$0xff]  }
  0x37   :  { %1290 = vmatpush2.bf16.msra.mxu0 %v4965_v60  ;;  %v5036_v60 = vld [vmem:[%s7306_s1 + $0x1e8] ss:$16 sps:$4 sm:$0xff]  }
  0x38   :  { %1333 = vmatpush2.bf16.msra.mxu1 %v4966_v61  ;;  %1291 = vmatprep.subr.bf16.mxu0 %v4967_v62  ;;  %v5039_v61 = vld [vmem:[%s7306_s1 + $0x5a0] ss:$16 sps:$4 sm:$0xff]   ;;  %v5044_v62 = vld [vmem:[%s7306_s1 + $0x1cc] ss:$16 sps:$4 sm:$0xff]  }
  0x39   :  { %1334 = vmatprep.subr.bf16.mxu1 %v4969_v63  ;;  %v5047_v63 = vld [vmem:[%s7306_s1 + $0x584] ss:$16 sps:$4 sm:$0xff]  }
  0x3b   :  { %1292 = vmatpush2.bf16.msra.mxu0 %v4971_v0  ;;  %v5042_v0 = vld [vmem:[%s7306_s1 + $0x1c8] ss:$16 sps:$4 sm:$0xff]  }
  0x3c   :  { %1335 = vmatpush2.bf16.msra.mxu1 %v4972_v1  ;;  %1293 = vmatprep.subr.bf16.mxu0 %v4973_v2  ;;  %v5045_v1 = vld [vmem:[%s7306_s1 + $0x580] ss:$16 sps:$4 sm:$0xff]   ;;  %v5050_v2 = vld [vmem:[%s7306_s1 + $0x1ac] ss:$16 sps:$4 sm:$0xff]  }
  0x3d   :  { %1336 = vmatprep.subr.bf16.mxu1 %v4975_v3  ;;  %v5053_v3 = vld [vmem:[%s7306_s1 + $0x564] ss:$16 sps:$4 sm:$0xff]  }
  0x3f   :  { %1294 = vmatpush2.bf16.msra.mxu0 %v4977_v4  ;;  %v5048_v4 = vld [vmem:[%s7306_s1 + $0x1a8] ss:$16 sps:$4 sm:$0xff]  }
  0x40   :  { %1337 = vmatpush2.bf16.msra.mxu1 %v4978_v5  ;;  %1349 = vmatprep.subr.bf16.mxu0 %v4981_v10  ;;  %v5051_v5 = vld [vmem:[%s7306_s1 + $0x560] ss:$16 sps:$4 sm:$0xff]   ;;  %v5062_v10 = vld [vmem:[%s7306_s1 + $0x16c] ss:$16 sps:$4 sm:$0xff]  }
  0x41   :  { %1406 = vmatprep.subr.bf16.mxu1 %v4984_v11  ;;  %v5065_v11 = vld [vmem:[%s7306_s1 + $0x524] ss:$16 sps:$4 sm:$0xff]  }
  0x42   :  { %1296 = vmatmul.mubr.bf16.vlgmr.msra.gmra.mxu0 %v5901_v12 }
  0x43   :  { %1339 = vmatmul.mubr.bf16.vlgmr.msra.gmra.mxu1 %v5903_v13  ;;  %1350 = vmatpush1.bf16.msra.mxu0 %v4979_v14  ;;  %v5060_v14 = vld [vmem:[%s7306_s1 + $0x168] ss:$16 sps:$4 sm:$0xff]  }
  0x44   :  { %1407 = vmatpush1.bf16.msra.mxu1 %v4982_v15  ;;  %1351 = vmatprep.subr.bf16.mxu0 %v4987_v16  ;;  %v5063_v15 = vld [vmem:[%s7306_s1 + $0x520] ss:$16 sps:$4 sm:$0xff]   ;;  %v5068_v16 = vld [vmem:[%s7306_s1 + $0x14c] ss:$16 sps:$4 sm:$0xff]  }
  0x45   :  { %1424 = vmatprep.mubr.bf16.mxu1 %v5607_v21  ;;  %1435 = vmatprep.subr.bf16.mxu1 %v4990_v17  ;;  %v5071_v17 = vld [vmem:[%s7306_s1 + $0x504] ss:$16 sps:$4 sm:$0xff]  }
  0x46   :  { %1381 = vmatprep.mubr.bf16.mxu0 %v5997_v44 }
  0x47   :  { %1352 = vmatpush1.bf16.msra.mxu0 %v4985_v18  ;;  %v5066_v18 = vld [vmem:[%s7306_s1 + $0x148] ss:$16 sps:$4 sm:$0xff]  }
  0x48   :  { %1353 = vmatprep.subr.bf16.mxu0 %v4993_v22  ;;  %v51_v22 = vld [vmem:[%s7305_s0 + $0x58] sm:$0xff] }
  0x4b   :  { %4444 = vmatmul.mubr.msk.bf16.vlgmr.msra.gmra.mxu1 %vm1259_vm0, %v5932_v23  ;;  %1354 = vmatpush1.bf16.msra.mxu0 %v4991_v25  ;;  %v5077_v25 = vld [vmem:[%s7306_s1 + $0x2ec] ss:$16 sps:$4 sm:$0xff]  }
  0x4c   :  { %1436 = vmatpush1.bf16.msra.mxu1 %v4988_v24  ;;  %1355 = vmatprep.subr.bf16.mxu0 %v4999_v27  ;;  %v5074_v24 = vld [vmem:[%s7306_s1 + $0x12c] ss:$16 sps:$4 sm:$0xff]   ;;  %v5072_v27 = vld [vmem:[%s7306_s1 + $0x128] ss:$16 sps:$4 sm:$0xff]  }
  0x4d   :  { %1437 = vmatprep.subr.bf16.mxu1 %v4996_v26  ;;  %1467 = vmatprep.mubr.bf16.mxu1 %v5832_v53  ;;  %v5032_v53 = vld [vmem:[%s7306_s1 + $0xc] ss:$16 sps:$4 sm:$0xff]   ;;  %v6120_v26 = vpack.c.bf16 %v51_v22, %v44_v20  ;;  %v5156_v20 = vld [vmem:[%s7306_s1 + $0x568] ss:$16 sps:$4 sm:$0xff]  }
  0x4e   :  { %v5159_v22 = vld [vmem:[%s7306_s1 + $0x328] ss:$16 sps:$4 sm:$0xff]  }
  0x4f   :  { %1356 = vmatpush1.bf16.msra.mxu0 %v4997_v29  ;;  %v5080_v29 = vld [vmem:[%s7306_s1 + $0x10c] ss:$16 sps:$4 sm:$0xff]  }
  0x50   :  { %1438 = vmatpush1.bf16.msra.mxu1 %v4994_v28  ;;  %1357 = vmatprep.subr.bf16.mxu0 %v5005_v31  ;;  %v5075_v28 = vld [vmem:[%s7306_s1 + $0x2e8] ss:$16 sps:$4 sm:$0xff]  }
  0x51   :  { %1439 = vmatprep.subr.bf16.mxu1 %v5002_v30  ;;  %v5083_v30 = vld [vmem:[%s7306_s1 + $0x2cc] ss:$16 sps:$4 sm:$0xff]   ;;  %v5078_v31 = vld [vmem:[%s7306_s1 + $0x108] ss:$16 sps:$4 sm:$0xff]  }
  0x53   :  { %1358 = vmatpush1.bf16.msra.mxu0 %v5003_v33  ;;  %v5086_v33 = vld [vmem:[%s7306_s1 + $0x4ec] ss:$16 sps:$4 sm:$0xff]  }
  0x54   :  { %1440 = vmatpush1.bf16.msra.mxu1 %v5000_v32  ;;  %1359 = vmatprep.subr.bf16.mxu0 %v5011_v35  ;;  %v5081_v32 = vld [vmem:[%s7306_s1 + $0x2c8] ss:$16 sps:$4 sm:$0xff]  }
  0x55   :  { %1441 = vmatprep.subr.bf16.mxu1 %v5008_v34  ;;  %v5089_v34 = vld [vmem:[%s7306_s1 + $0x2ac] ss:$16 sps:$4 sm:$0xff]   ;;  %v5084_v35 = vld [vmem:[%s7306_s1 + $0x4e8] ss:$16 sps:$4 sm:$0xff]  }
  0x57   :  { %1360 = vmatpush1.bf16.msra.mxu0 %v5009_v37  ;;  %v5092_v37 = vld [vmem:[%s7306_s1 + $0x4cc] ss:$16 sps:$4 sm:$0xff]  }
  0x58   :  { %1442 = vmatpush1.bf16.msra.mxu1 %v5006_v36  ;;  %1361 = vmatprep.subr.bf16.mxu0 %v5017_v39  ;;  %v5087_v36 = vld [vmem:[%s7306_s1 + $0x2a8] ss:$16 sps:$4 sm:$0xff]  }
  0x59   :  { %1443 = vmatprep.subr.bf16.mxu1 %v5014_v38  ;;  %v5095_v38 = vld [vmem:[%s7306_s1 + $0x28c] ss:$16 sps:$4 sm:$0xff]   ;;  %v5090_v39 = vld [vmem:[%s7306_s1 + $0x4c8] ss:$16 sps:$4 sm:$0xff]  }
  0x5b   :  { %1362 = vmatpush1.bf16.msra.mxu0 %v5015_v43  ;;  %v5104_v43 = vld [vmem:[%s7306_s1 + $0x48c] ss:$16 sps:$4 sm:$0xff]  }
  0x5c   :  { %1444 = vmatpush1.bf16.msra.mxu1 %v5012_v40  ;;  %1363 = vmatprep.subr.bf16.mxu0 %v5023_v46  ;;  %v5098_v40 = vld [vmem:[%s7306_s1 + $0x4ac] ss:$16 sps:$4 sm:$0xff]   ;;  %v5102_v46 = vld [vmem:[%s7306_s1 + $0x488] ss:$16 sps:$4 sm:$0xff]  }
  0x5d   :  { %1445 = vmatprep.subr.bf16.mxu1 %v5020_v45  ;;  %v5107_v45 = vld [vmem:[%s7306_s1 + $0x24c] ss:$16 sps:$4 sm:$0xff]  }
  0x5f   :  { %1364 = vmatpush1.bf16.msra.mxu0 %v5021_v48  ;;  %v5113_v48 = vld [vmem:[%s7306_s1 + $0x22c] ss:$16 sps:$4 sm:$0xff]  }
  0x60   :  { %1446 = vmatpush1.bf16.msra.mxu1 %v5018_v47  ;;  %1365 = vmatprep.subr.bf16.mxu0 %v5029_v50  ;;  %v5110_v47 = vld [vmem:[%s7306_s1 + $0x46c] ss:$16 sps:$4 sm:$0xff]   ;;  %v5111_v50 = vld [vmem:[%s7306_s1 + $0x228] ss:$16 sps:$4 sm:$0xff]  }
  0x61   :  { %1447 = vmatprep.subr.bf16.mxu1 %v5026_v49  ;;  %v5108_v49 = vld [vmem:[%s7306_s1 + $0x468] ss:$16 sps:$4 sm:$0xff]  }
  0x63   :  { %1366 = vmatpush2.bf16.msra.mxu0 %v5027_v52  ;;  %v5119_v52 = vld [vmem:[%s7306_s1 + $0x20c] ss:$16 sps:$4 sm:$0xff]  }
  0x64   :  { %1448 = vmatpush1.bf16.msra.mxu1 %v5024_v51  ;;  %1367 = vmatprep.subr.bf16.mxu0 %v5035_v55  ;;  %v5116_v51 = vld [vmem:[%s7306_s1 + $0x44c] ss:$16 sps:$4 sm:$0xff]   ;;  %v5117_v55 = vld [vmem:[%s7306_s1 + $0x208] ss:$16 sps:$4 sm:$0xff]  }
  0x65   :  { %1449 = vmatprep.subr.bf16.mxu1 %v5032_v53  ;;  %v5114_v53 = vld [vmem:[%s7306_s1 + $0x448] ss:$16 sps:$4 sm:$0xff]  }
  0x67   :  { %1368 = vmatpush2.bf16.msra.mxu0 %v5033_v57  ;;  %v5125_v57 = vld [vmem:[%s7306_s1 + $0x3ec] ss:$16 sps:$4 sm:$0xff]  }
  0x68   :  { %1450 = vmatpush1.bf16.msra.mxu1 %v5030_v56  ;;  %1369 = vmatprep.subr.bf16.mxu0 %v5041_v59  ;;  %v5122_v56 = vld [vmem:[%s7306_s1 + $0x42c] ss:$16 sps:$4 sm:$0xff]   ;;  %v5123_v59 = vld [vmem:[%s7306_s1 + $0x3e8] ss:$16 sps:$4 sm:$0xff]  }
  0x69   :  { %1451 = vmatprep.subr.bf16.mxu1 %v5038_v58  ;;  %v5120_v58 = vld [vmem:[%s7306_s1 + $0x428] ss:$16 sps:$4 sm:$0xff]  }
  0x6b   :  { %1370 = vmatpush2.bf16.msra.mxu0 %v5039_v61  ;;  %v5131_v61 = vld [vmem:[%s7306_s1 + $0x3cc] ss:$16 sps:$4 sm:$0xff]  }
  0x6c   :  { %1452 = vmatpush2.bf16.msra.mxu1 %v5036_v60  ;;  %1371 = vmatprep.subr.bf16.mxu0 %v5047_v63  ;;  %v5128_v60 = vld [vmem:[%s7306_s1 + $0x40c] ss:$16 sps:$4 sm:$0xff]   ;;  %v5129_v63 = vld [vmem:[%s7306_s1 + $0x3c8] ss:$16 sps:$4 sm:$0xff]  }
  0x6d   :  { %1453 = vmatprep.subr.bf16.mxu1 %v5044_v62  ;;  %v5126_v62 = vld [vmem:[%s7306_s1 + $0x408] ss:$16 sps:$4 sm:$0xff]  }
  0x6f   :  { %1372 = vmatpush2.bf16.msra.mxu0 %v5045_v1  ;;  %v5137_v1 = vld [vmem:[%s7306_s1 + $0x3ac] ss:$16 sps:$4 sm:$0xff]  }
  0x70   :  { %1454 = vmatpush2.bf16.msra.mxu1 %v5042_v0  ;;  %1373 = vmatprep.subr.bf16.mxu0 %v5053_v3  ;;  %v5134_v0 = vld [vmem:[%s7306_s1 + $0x5ec] ss:$16 sps:$4 sm:$0xff]   ;;  %v5135_v3 = vld [vmem:[%s7306_s1 + $0x3a8] ss:$16 sps:$4 sm:$0xff]  }
  0x71   :  { %1455 = vmatprep.subr.bf16.mxu1 %v5050_v2  ;;  %v5132_v2 = vld [vmem:[%s7306_s1 + $0x5e8] ss:$16 sps:$4 sm:$0xff]  }
  0x73   :  { %1374 = vmatpush2.bf16.msra.mxu0 %v5051_v5  ;;  %v5143_v5 = vld [vmem:[%s7306_s1 + $0x38c] ss:$16 sps:$4 sm:$0xff]  }
  0x74   :  { %1456 = vmatpush2.bf16.msra.mxu1 %v5048_v4  ;;  %1375 = vmatprep.subr.bf16.mxu0 %v5059_v7  ;;  %v5140_v4 = vld [vmem:[%s7306_s1 + $0x5cc] ss:$16 sps:$4 sm:$0xff]   ;;  %v5141_v7 = vld [vmem:[%s7306_s1 + $0x388] ss:$16 sps:$4 sm:$0xff]  }
  0x75   :  { %1457 = vmatprep.subr.bf16.mxu1 %v5056_v6  ;;  %v5138_v6 = vld [vmem:[%s7306_s1 + $0x5c8] ss:$16 sps:$4 sm:$0xff]  }
  0x77   :  { %1376 = vmatpush2.bf16.msra.mxu0 %v5057_v9  ;;  %v5149_v9 = vld [vmem:[%s7306_s1 + $0x36c] ss:$16 sps:$4 sm:$0xff]  }
  0x78   :  { %1458 = vmatpush2.bf16.msra.mxu1 %v5054_v8  ;;  %1377 = vmatprep.subr.bf16.mxu0 %v5065_v11  ;;  %v5146_v8 = vld [vmem:[%s7306_s1 + $0x5ac] ss:$16 sps:$4 sm:$0xff]   ;;  %v5147_v11 = vld [vmem:[%s7306_s1 + $0x368] ss:$16 sps:$4 sm:$0xff]  }
  0x79   :  { %1459 = vmatprep.subr.bf16.mxu1 %v5062_v10  ;;  %v5144_v10 = vld [vmem:[%s7306_s1 + $0x5a8] ss:$16 sps:$4 sm:$0xff]  }
  0x7b   :  { %1378 = vmatpush2.bf16.msra.mxu0 %v5063_v15  ;;  %v5155_v15 = vld [vmem:[%s7306_s1 + $0x34c] ss:$16 sps:$4 sm:$0xff]  }
  0x7c   :  { %1460 = vmatpush2.bf16.msra.mxu1 %v5060_v14  ;;  %1379 = vmatprep.subr.bf16.mxu0 %v5071_v17  ;;  %v5152_v14 = vld [vmem:[%s7306_s1 + $0x58c] ss:$16 sps:$4 sm:$0xff]   ;;  %v5153_v17 = vld [vmem:[%s7306_s1 + $0x348] ss:$16 sps:$4 sm:$0xff]  }
  0x7d   :  { %1461 = vmatprep.subr.bf16.mxu1 %v5068_v16  ;;  %v5150_v16 = vld [vmem:[%s7306_s1 + $0x588] ss:$16 sps:$4 sm:$0xff]  }
  0x7f   :  { %1380 = vmatpush2.bf16.msra.mxu0 %v5069_v19  ;;  %v5161_v19 = vld [vmem:[%s7306_s1 + $0x32c] ss:$16 sps:$4 sm:$0xff]  }
  0x80   :  { %1462 = vmatpush2.bf16.msra.mxu1 %v5066_v18  ;;  %1478 = vmatprep.subr.bf16.mxu0 %v5077_v25  ;;  %v5158_v18 = vld [vmem:[%s7306_s1 + $0x56c] ss:$16 sps:$4 sm:$0xff]  }
  0x81   :  { %1463 = vmatprep.subr.bf16.mxu1 %v5074_v24  ;;  %v5164_v24 = vld [vmem:[%s7306_s1 + $0x54c] ss:$16 sps:$4 sm:$0xff]  }
  0x82   :  { %1382 = vmatmul.mubr.bf16.vlgmr.msra.gmra.mxu0 %v6120_v26  ;;  %v5167_v25 = vld [vmem:[%s7306_s1 + $0x30c] ss:$16 sps:$4 sm:$0xff]  }
  0x83   :  { %1479 = vmatpush1.bf16.msra.mxu0 %v5075_v28  ;;  %1510 = vmatprep.mubr.bf16.mxu0 %v5834_v54  ;;  %v5093_v54 = vld [vmem:[%s7306_s1 + $0x288] ss:$16 sps:$4 sm:$0xff]  }
  0x84   :  { %1464 = vmatpush2.bf16.msra.mxu1 %v5072_v27  ;;  %1480 = vmatprep.subr.bf16.mxu0 %v5083_v30  ;;  %v5162_v27 = vld [vmem:[%s7306_s1 + $0x548] ss:$16 sps:$4 sm:$0xff]  }
  0x85   :  { %1465 = vmatprep.subr.bf16.mxu1 %v5080_v29  ;;  %v5165_v28 = vld [vmem:[%s7306_s1 + $0x308] ss:$16 sps:$4 sm:$0xff]   ;;  %v5170_v29 = vld [vmem:[%s7306_s1 + $0x52c] ss:$16 sps:$4 sm:$0xff]  }
  0x86   :  { %v5177_v30 = vld [vmem:[%s7308_s3 + $0x78] sm:$0xff]  }
  0x87   :  { %1481 = vmatpush1.bf16.msra.mxu0 %v5081_v32  ;;  %v5178_v32 = vld [vmem:[%s7308_s3 + $0x38] sm:$0xff]  }
  0x88   :  { %1466 = vmatpush2.bf16.msra.mxu1 %v5078_v31  ;;  %1482 = vmatprep.subr.bf16.mxu0 %v5089_v34  ;;  %v5168_v31 = vld [vmem:[%s7306_s1 + $0x528] ss:$16 sps:$4 sm:$0xff]   ;;  %v5179_v34 = vld [vmem:[%s7308_s3 + $0x70] sm:$0xff]  }
  0x89   :  { %1521 = vmatprep.subr.bf16.mxu1 %v5086_v33  ;;  %v5173_v33 = vld [vmem:[%s7306_s1 + $0x50c] ss:$16 sps:$4 sm:$0xff]  }
  0x8b   :  { %1468 = vmatmul.mubr.bf16.vlgmr.msra.gmra.mxu1 %v5901_v12  ;;  %1483 = vmatpush1.bf16.msra.mxu0 %v5087_v36  ;;  %v5099_v12 = vld [vmem:[%s7306_s1 + $0x268] ss:$16 sps:$4 sm:$0xff]   ;;  %v5180_v36 = vld [vmem:[%s7308_s3 + $0x30] sm:$0xff]  }
  0x8c   :  { %1522 = vmatpush1.bf16.msra.mxu1 %v5084_v35  ;;  %1484 = vmatprep.subr.bf16.mxu0 %v5095_v38  ;;  %v5171_v35 = vld [vmem:[%s7306_s1 + $0x508] ss:$16 sps:$4 sm:$0xff]  }
  0x8d   :  { %1523 = vmatprep.subr.bf16.mxu1 %v5092_v37  ;;  %1553 = vmatprep.mubr.bf16.mxu1 %v5997_v44  ;;  %v5105_v44 = vld [vmem:[%s7306_s1 + $0x248] ss:$16 sps:$4 sm:$0xff]   ;;  %v5176_v37 = vld [vmem:[%s7306_s1 + $0x60c] ss:$16 sps:$4 sm:$0xff]  }
  0x8e   :  { %v5181_v38 = vld [vmem:[%s7308_s3 + $0x68] sm:$0xff]  }
  0x8f   :  { %1485 = vmatpush1.bf16.msra.mxu0 %v5093_v54  ;;  %v5183_v54 = vld [vmem:[%s7308_s3 + $0x60] sm:$0xff]  }
  0x90   :  { %1524 = vmatpush1.bf16.msra.mxu1 %v5090_v39  ;;  %1486 = vmatprep.subr.bf16.mxu0 %v5101_v41  ;;  %v5174_v39 = vld [vmem:[%s7306_s1 + $0x608] ss:$16 sps:$4 sm:$0xff]  }
  0x91   :  { %1525 = vmatprep.subr.bf16.mxu1 %v5098_v40  ;;  %v5184_v40 = vld [vmem:[%s7308_s3 + $0x20] sm:$0xff]   ;;  %v5185_v41 = vld [vmem:[%s7308_s3 + $0x58] sm:$0xff]  }
  0x93   :  { %1487 = vmatpush1.bf16.msra.mxu0 %v5099_v12  ;;  %v5188_v12 = vld [vmem:[%s7308_s3 + $0x10] sm:$0xff]  }
  0x94   :  { %1526 = vmatpush1.bf16.msra.mxu1 %v5096_v42  ;;  %1488 = vmatprep.subr.bf16.mxu0 %v5107_v45  ;;  %v5186_v42 = vld [vmem:[%s7308_s3 + $0x18] sm:$0xff]  }
  0x95   :  { %1527 = vmatprep.subr.bf16.mxu1 %v5104_v43  ;;  %v5193_v43 = vld [vmem:[%s7308_s3 + $0xf8] sm:$0xff]  }
  0x96   :  { %v5194_v45 = vld [vmem:[%s7308_s3 + $0xb8] sm:$0xff]  }
  0x97   :  { %1489 = vmatpush1.bf16.msra.mxu0 %v5105_v44  ;;  %v5191_v44 = vld [vmem:[%s7308_s3 + $0x40] sm:$0xff]  }
  0x98   :  { %1528 = vmatpush1.bf16.msra.mxu1 %v5102_v46  ;;  %1490 = vmatprep.subr.bf16.mxu0 %v5113_v48  ;;  %v5189_v46 = vld [vmem:[%s7308_s3 + $0x48] sm:$0xff]   ;;  %v5195_v48 = vld [vmem:[%s7308_s3 + $0xf0] sm:$0xff]  }
  0x99   :  { %1529 = vmatprep.subr.bf16.mxu1 %v5110_v47  ;;  %v5192_v47 = vld [vmem:[%s7308_s3] sm:$0xff]  }
  0x9b   :  { %1491 = vmatpush1.bf16.msra.mxu0 %v5111_v50  ;;  %v5197_v50 = vld [vmem:[%s7308_s3 + $0xe8] sm:$0xff]  }
  0x9c   :  { %1530 = vmatpush1.bf16.msra.mxu1 %v5108_v49  ;;  %1492 = vmatprep.subr.bf16.mxu0 %v5119_v52  ;;  %v5196_v49 = vld [vmem:[%s7308_s3 + $0xb0] sm:$0xff]  }
  0x9d   :  { %1531 = vmatprep.subr.bf16.mxu1 %v5116_v51  ;;  %v5198_v51 = vld [vmem:[%s7308_s3 + $0xa8] sm:$0xff]  }
  0x9f   :  { %1493 = vmatpush1.bf16.msra.mxu0 %v5117_v55 }
  0xa0   :  { %1532 = vmatpush1.bf16.msra.mxu1 %v5114_v53  ;;  %1494 = vmatprep.subr.bf16.mxu0 %v5125_v57 }
  0xa1   :  { %1533 = vmatprep.subr.bf16.mxu1 %v5122_v56 }
  0xa3   :  { %1495 = vmatpush2.bf16.msra.mxu0 %v5123_v59 }
  0xa4   :  { %1534 = vmatpush1.bf16.msra.mxu1 %v5120_v58  ;;  %1496 = vmatprep.subr.bf16.mxu0 %v5131_v61 }
  0xa5   :  { %1535 = vmatprep.subr.bf16.mxu1 %v5128_v60 }
  0xa7   :  { %1497 = vmatpush2.bf16.msra.mxu0 %v5129_v63 }
  0xa8   :  { %1536 = vmatpush1.bf16.msra.mxu1 %v5126_v62  ;;  %1498 = vmatprep.subr.bf16.mxu0 %v5137_v1 }
  0xa9   :  { %1537 = vmatprep.subr.bf16.mxu1 %v5134_v0 }
  0xab   :  { %1499 = vmatpush2.bf16.msra.mxu0 %v5135_v3 }
  0xac   :  { %1538 = vmatpush2.bf16.msra.mxu1 %v5132_v2  ;;  %1500 = vmatprep.subr.bf16.mxu0 %v5143_v5 }
  0xad   :  { %1539 = vmatprep.subr.bf16.mxu1 %v5140_v4 }
  0xaf   :  { %1501 = vmatpush2.bf16.msra.mxu0 %v5141_v7 }
  0xb0   :  { %1540 = vmatpush2.bf16.msra.mxu1 %v5138_v6  ;;  %1502 = vmatprep.subr.bf16.mxu0 %v5149_v9 }
  0xb1   :  { %1541 = vmatprep.subr.bf16.mxu1 %v5146_v8 }
  0xb3   :  { %1503 = vmatpush2.bf16.msra.mxu0 %v5147_v11 }
  0xb4   :  { %1542 = vmatpush2.bf16.msra.mxu1 %v5144_v10  ;;  %1504 = vmatprep.subr.bf16.mxu0 %v5155_v15 }
  0xb5   :  { %1543 = vmatprep.subr.bf16.mxu1 %v5152_v14 }
  0xb7   :  { %1505 = vmatpush2.bf16.msra.mxu0 %v5153_v17 }
  0xb8   :  { %1544 = vmatpush2.bf16.msra.mxu1 %v5150_v16  ;;  %1506 = vmatprep.subr.bf16.mxu0 %v5161_v19 }
  0xb9   :  { %1545 = vmatprep.subr.bf16.mxu1 %v5158_v18 }
  0xbb   :  { %1507 = vmatpush2.bf16.msra.mxu0 %v5159_v22 }
  0xbc   :  { %1546 = vmatpush2.bf16.msra.mxu1 %v5156_v20  ;;  %1508 = vmatprep.subr.bf16.mxu0 %v5167_v25 }
  0xbd   :  { %1547 = vmatprep.subr.bf16.mxu1 %v5164_v24 }
  0xbf   :  { %1509 = vmatpush2.bf16.msra.mxu0 %v5165_v28 }
  0xc0   :  { %1548 = vmatpush2.bf16.msra.mxu1 %v5162_v27  ;;  %4760 = vmatprep.subr.bf16.mxu0 %v5177_v30 }
  0xc1   :  { %1549 = vmatprep.subr.bf16.mxu1 %v5170_v29 }
  0xc2   :  { %1511 = vmatmul.mubr.bf16.vlgmr.msra.gmra.mxu0 %v5903_v13  ;;  %v5182_v13 = vld [vmem:[%s7308_s3 + $0x28] sm:$0xff]  }
  0xc3   :  { %4761 = vmatpush3.bf16.msra.mxu0 %v5178_v32 }
  0xc4   :  { %1550 = vmatpush2.bf16.msra.mxu1 %v5168_v31  ;;  %4762 = vmatprep.subr.bf16.mxu0 %v5179_v34 }
  0xc5   :  { %1551 = vmatprep.subr.bf16.mxu1 %v5173_v33 }
  0xc7   :  { %4763 = vmatpush3.bf16.msra.mxu0 %v5180_v36 }
  0xc8   :  { %1552 = vmatpush2.bf16.msra.mxu1 %v5171_v35  ;;  %4764 = vmatprep.subr.bf16.mxu0 %v5181_v38 }
  0xc9   :  { %1578 = vmatprep.subr.bf16.mxu1 %v5176_v37 }
  0xcb   :  { %1554 = vmatmul.mubr.bf16.vlgmr.msra.gmra.mxu1 %v6120_v26  ;;  %4765 = vmatpush3.bf16.msra.mxu0 %v5182_v13  ;;  %v5187_v26 = vld [vmem:[%s7308_s3 + $0x50] sm:$0xff]  }
  0xcc   :  { %1579 = vmatpush1.bf16.msra.mxu1 %v5174_v39  ;;  %1596 = vmatprep.mubr.bf16.mxu1 %v5607_v21 }
  0xcd   :  { %4766 = vmatprep.subr.bf16.mxu0 %v5183_v54  ;;  %4782 = vmatprep.subr.bf16.mxu1 %v5193_v43 }
  0xcf   :  { %4767 = vmatpush3.bf16.msra.mxu0 %v5184_v40 }
  0xd0   :  { %4768 = vmatprep.subr.bf16.mxu0 %v5185_v41 }
  0xd3   :  { %4445 = vmatmul.mubr.msk.bf16.vlgmr.msra.gmra.mxu1 %vm1259_vm0, %v5932_v23  ;;  %4769 = vmatpush3.bf16.msra.mxu0 %v5186_v42  ;;  %v5190_v23 = vld [vmem:[%s7308_s3 + $0x8] sm:$0xff]  }
  0xd4   :  { %4770 = vmatprep.subr.bf16.mxu0 %v5187_v26  ;;  %4783 = vmatpush3.bf16.msra.mxu1 %v5194_v45 }
  0xd5   :  { %4784 = vmatprep.subr.bf16.mxu1 %v5195_v48 }
  0xd7   :  { %4771 = vmatpush3.bf16.msra.mxu0 %v5188_v12 }
  0xd8   :  { %4772 = vmatprep.subr.bf16.mxu0 %v5189_v46  ;;  %4785 = vmatpush3.bf16.msra.mxu1 %v5196_v49 }
  0xd9   :  { %4786 = vmatprep.subr.bf16.mxu1 %v5197_v50 }
  0xdb   :  { %4773 = vmatpush3.bf16.msra.mxu0 %v5190_v23 }
  0xdc   :  { %4774 = vmatprep.subr.bf16.mxu0 %v5191_v44 }
  0xdf   :  { %4775 = vmatpush3.bf16.msra.mxu0 %v5192_v47 }
  0xe0   :  { %16 = vsyncpa [#allocation3], 0  ;;  %4787 = vmatpush3.bf16.msra.mxu1 %v5198_v51  ;;  %v5199_v52 = vld [vmem:[%s7308_s3 + $0xe0] sm:$0xff]   ;;  %v5201_v55 = vld [vmem:[%s7308_s3 + $0xd8] sm:$0xff]   ;;  %v259_v0 = vlaneseq  ;;  %vm5609_vm1 = vmmov 0   ;;  %vm4226_vm2 = vcmask 125952  }
  0xe1   :  { %v5200_v53 = vld [vmem:[%s7308_s3 + $0xa0] sm:$0xff]   ;;  %4788 = vmatprep.subr.bf16.mxu1 %v5199_v52  ;;  %v5202_v56 = vld [vmem:[%s7308_s3 + $0x98] sm:$0xff]   ;;  %v5203_v57 = vld [vmem:[%s7308_s3 + $0xd0] sm:$0xff]  }
  0xe2   :  { %v5204_v58 = vld [vmem:[%s7308_s3 + $0x90] sm:$0xff]   ;;  %v5205_v59 = vld [vmem:[%s7308_s3 + $0xc8] sm:$0xff]   ;;  %v5207_v61 = vld [vmem:[%s7308_s3 + $0xc0] sm:$0xff]   ;;  %v6431_v2 = vshrl.u32 %v259_v0, 7 }
  0xe3   :  { %v5206_v60 = vld [vmem:[%s7308_s3 + $0x88] sm:$0xff]   ;;  %v5208_v62 = vld [vmem:[%s7308_s3 + $0x80] sm:$0xff]  }
  0xe4   :  { %4789 = vmatpush3.bf16.msra.mxu1 %v5200_v53  ;;  %v6434_v5 = vsub.s32 1, %v6431_v2  ;;  %v6437_v6 = vsub.s32 0, %v6431_v2  ;;  %v257_v8 = vld [vmem:[%s7307_s2] sm:$0xf]  ;;  %v6445_v49 = vsub.s32 3, %v6431_v2  ;;  %v6448_v50 = vsub.s32 2, %v6431_v2 }
  0xe5   :  { %4790 = vmatprep.subr.bf16.mxu1 %v5201_v55 }
  0xe6   :  { %v266_v10 = vrot.slane %v257_v8, %v6434_v5  ;;  %v262_v11 = vrot.slane %v257_v8, %v6437_v6  ;;  %v274_v55 = vrot.slane %v257_v8, %v6445_v49 }
  0xe8   :  { %4791 = vmatpush3.bf16.msra.mxu1 %v5202_v56  ;;  %v270_v56 = vrot.slane %v257_v8, %v6448_v50 }
  0xe9   :  { %4792 = vmatprep.subr.bf16.mxu1 %v5203_v57 }
  0xec   :  { %4793 = vmatpush3.bf16.msra.mxu1 %v5204_v58 }
  0xed   :  { %4794 = vmatprep.subr.bf16.mxu1 %v5205_v59 }
  0xf0   :  { %4795 = vmatpush3.bf16.msra.mxu1 %v5206_v60 }
  0xf1   :  { %4796 = vmatprep.subr.bf16.mxu1 %v5207_v61 }
  0xf4   :  { %4797 = vmatpush3.bf16.msra.mxu1 %v5208_v62 }
 0x102   :  { %v1297_v3 = vpop.f32.mrf.mxu0 }
 0x103   :  { %v1340_v63 = vpop.f32.mrf.mxu1  ;;  %v1298_v17 = vadd.f32 %v1297_v3, %v262_v11 }
 0x104   :  { %v1299_v7 = vpop.f32.mrf.mxu0 }
 0x105   :  { %v1342_v1 = vpop.f32.mrf.mxu1  ;;  %v1300_v16 = vadd.f32 %v1299_v7, %v266_v10  ;;  %v1341_v27 = vadd.f32 %v1340_v63, %v1298_v17 }
 0x106   :  { %v1301_v14 = vpop.f32.mrf.mxu0 }
 0x107   :  { %v1344_v4 = vpop.f32.mrf.mxu1  ;;  %v1302_v19 = vadd.f32 %v1301_v14, %v262_v11  ;;  %v1343_v24 = vadd.f32 %v1342_v1, %v1300_v16 }
 0x108   :  { %v1303_v18 = vpop.f32.mrf.mxu0 }
 0x109   :  { %v1346_v9 = vpop.f32.mrf.mxu1  ;;  %v1304_v25 = vadd.f32 %v1303_v18, %v266_v10  ;;  %v1345_v29 = vadd.f32 %v1344_v4, %v1302_v19 }
 0x10b   :  { %v1426_v15 = vpop.f32.mrf.mxu1  ;;  %v1347_v34 = vadd.f32 %v1346_v9, %v1304_v25 }
 0x10d   :  { %v1428_v20 = vpop.f32.mrf.mxu1 }
 0x10f   :  { %v1430_v31 = vpop.f32.mrf.mxu1 }
 0x111   :  { %v1432_v13 = vpop.f32.mrf.mxu1 }
 0x142   :  { %v1383_v22 = vpop.f32.mrf.mxu0 }
 0x143   :  { %v1384_v32 = vadd.f32 %v1383_v22, %v1341_v27 }
 0x144   :  { %v1385_v28 = vpop.f32.mrf.mxu0 }
 0x145   :  { %v1386_v30 = vadd.f32 %v1385_v28, %v1343_v24  ;;  %v1427_v54 = vadd.f32 %v1426_v15, %v1384_v32  ;;  %v5209_v28 = vld [vmem:[%s7310_s5 + $0x38] sm:$0xff]   ;;  %v5210_v32 = vld [vmem:[%s7310_s5 + $0x30] sm:$0xff]  }
 0x146   :  { %v1387_v33 = vpop.f32.mrf.mxu0 }
 0x147   :  { %v1388_v35 = vadd.f32 %v1387_v33, %v1345_v29  ;;  %v1429_v37 = vadd.f32 %v1428_v20, %v1386_v30  ;;  %v1607_v12 = vmax.f32 %v1427_v54, 0.0  ;;  %v5608_v30 = vmov 0.0   ;;  %v5219_v54 = vld [vmem:[%s7312_s7 + $0xe4] ss:$16 sps:$4 sm:$0xff]  }
 0x148   :  { %v1389_v36 = vpop.f32.mrf.mxu0  ;;  %4857 = vmatprep.subr.bf16.mxu0 %v5608_v30  ;;  %2296 = vmatprep.subr.bf16.mxu1 %v5219_v54 }
 0x149   :  { %v1431_v38 = vadd.f32 %v1430_v31, %v1388_v35  ;;  %v1390_v39 = vadd.f32 %v1389_v36, %v1347_v34  ;;  %v1608_v42 = vmax.f32 %v1429_v37, 0.0  ;;  %v5211_v34 = vld [vmem:[%s7310_s5 + $0x28] sm:$0xff]   ;;  %v5212_v35 = vld [vmem:[%s7310_s5 + $0x20] sm:$0xff]   ;;  %v5213_v36 = vld [vmem:[%s7310_s5 + $0x18] sm:$0xff]  }
 0x14a   :  { %v5214_v37 = vld [vmem:[%s7310_s5 + $0x10] sm:$0xff]  }
 0x14b   :  { %v1433_v40 = vadd.f32 %v1432_v13, %v1390_v39  ;;  %v1611_v41 = vmax.f32 %v1431_v38, 0.0  ;;  %v1469_v46 = vpop.f32.mrf.mxu1  ;;  %v5215_v38 = vld [vmem:[%s7310_s5 + $0x8] sm:$0xff]   ;;  %v5216_v39 = vld [vmem:[%s7310_s5] sm:$0xff]  }
 0x14c   :  { %v1470_v62 = vadd.f32 %v1469_v46, %v270_v56  ;;  %v5217_v13 = vld [vmem:[%s7312_s7 + $0xe0] ss:$16 sps:$4 sm:$0xff]   ;;  %v5243_v46 = vld [vmem:[%s7312_s7 + $0x64] ss:$16 sps:$4 sm:$0xff]  }
 0x14d   :  { %v1612_v26 = vmax.f32 %v1433_v40, 0.0  ;;  %v1615_v45 = vpack.c.bf16 %v1611_v41, %v1607_v12  ;;  %v1471_v23 = vpop.f32.mrf.mxu1  ;;  %v5222_v40 = vld [vmem:[%s7312_s7 + $0xec] ss:$16 sps:$4 sm:$0xff]   ;;  %v5225_v41 = vld [vmem:[%s7312_s7 + $0xc4] ss:$16 sps:$4 sm:$0xff]  }
 0x14e   :  { %v1472_v60 = vadd.f32 %v1471_v23, %v274_v55  ;;  %v5229_v12 = vld [vmem:[%s7312_s7 + $0xa0] ss:$16 sps:$4 sm:$0xff]  }
 0x14f   :  { %v1616_v43 = vpack.c.bf16 %v1612_v26, %v1608_v42  ;;  %v1473_v44 = vpop.f32.mrf.mxu1  ;;  %v5223_v42 = vld [vmem:[%s7312_s7 + $0xc0] ss:$16 sps:$4 sm:$0xff]   ;;  %v5231_v26 = vld [vmem:[%s7312_s7 + $0xa4] ss:$16 sps:$4 sm:$0xff]  }
 0x150   :  { %v1474_v61 = vadd.f32 %v1473_v44, %v270_v56  ;;  %v5241_v23 = vld [vmem:[%s7312_s7 + $0x60] ss:$16 sps:$4 sm:$0xff]   ;;  %v5249_v44 = vld [vmem:[%s7312_s7 + $0x44] ss:$16 sps:$4 sm:$0xff]  }
 0x151   :  { %1914 = vmatprep.mubr.bf16.mxu0 %v1616_v43  ;;  %v1475_v48 = vpop.f32.mrf.mxu1  ;;  %v5237_v43 = vld [vmem:[%s7312_s7 + $0x84] ss:$16 sps:$4 sm:$0xff]  }
 0x152   :  { %1915 = vmatmul.mubr.bf16.vlgmr.msra.gmra.mxu0 %v1615_v45  ;;  %v1476_v1 = vadd.f32 %v1475_v48, %v274_v55  ;;  %v5235_v45 = vld [vmem:[%s7312_s7 + $0x80] ss:$16 sps:$4 sm:$0xff]  }
 0x153   :  { %4858 = vmatpush3.bf16.msra.mxu0 %v5209_v28  ;;  %4873 = vmatprep.mubr.msk.bf16.mxu0 %vm5609_vm1, %v5608_v30  ;;  %v5256_v28 = vld [vmem:[%s7312_s7 + $0x28] ss:$16 sps:$4 sm:$0xff]  }
 0x154   :  { %4859 = vmatprep.subr.bf16.mxu0 %v5608_v30 }
 0x157   :  { %4860 = vmatpush3.bf16.msra.mxu0 %v5210_v32  ;;  %v5262_v32 = vld [vmem:[%s7312_s7 + $0x8] ss:$16 sps:$4 sm:$0xff]  }
 0x158   :  { %4861 = vmatprep.subr.bf16.mxu0 %v5608_v30 }
 0x15b   :  { %4862 = vmatpush3.bf16.msra.mxu0 %v5211_v34  ;;  %v5270_v34 = vld [vmem:[%s7314_s9 + $0x50c] ss:$28 sps:$4 sm:$0xff]  }
 0x15c   :  { %4863 = vmatprep.subr.bf16.mxu0 %v5608_v30 }
 0x15f   :  { %4864 = vmatpush3.bf16.msra.mxu0 %v5212_v35  ;;  %v4479_v35 = vld [vmem:[%s7311_s6] ss:$0 sm:$0xff] }
 0x160   :  { %4865 = vmatprep.subr.bf16.mxu0 %v5608_v30 }
 0x163   :  { %4866 = vmatpush3.bf16.msra.mxu0 %v5213_v36 }
 0x164   :  { %4867 = vmatprep.subr.bf16.mxu0 %v5608_v30 }
 0x167   :  { %4868 = vmatpush3.bf16.msra.mxu0 %v5214_v37 }
 0x168   :  { %4869 = vmatprep.subr.bf16.mxu0 %v5608_v30 }
 0x16b   :  { %4870 = vmatpush3.bf16.msra.mxu0 %v5215_v38 }
 0x16c   :  { %4871 = vmatprep.subr.bf16.mxu0 %v5608_v30  ;;  %v5264_v30 = vld [vmem:[%s7312_s7 + $0xc] ss:$16 sps:$4 sm:$0xff]  }
 0x16f   :  { %4872 = vmatpush3.bf16.msra.mxu0 %v5216_v39 }
 0x170   :  { %2339 = vmatprep.subr.bf16.mxu0 %v5222_v40 }
 0x182   :  { %v1512_v47 = vpop.f32.mrf.mxu0 }
 0x183   :  { %v1513_v7 = vadd.f32 %v1512_v47, %v1470_v62  ;;  %v5247_v47 = vld [vmem:[%s7312_s7 + $0x40] ss:$16 sps:$4 sm:$0xff]  }
 0x184   :  { %v1514_v51 = vpop.f32.mrf.mxu0 }
 0x185   :  { %v1515_v3 = vadd.f32 %v1514_v51, %v1472_v60 }
 0x186   :  { %v1516_v57 = vpop.f32.mrf.mxu0 }
 0x187   :  { %v1517_v4 = vadd.f32 %v1516_v57, %v1474_v61  ;;  %v4446_v57 = vld [vmem:[%s7309_s4] ss:$0 sm:$0xff] }
 0x188   :  { %v1518_v63 = vpop.f32.mrf.mxu0 }
 0x189   :  { %v1519_v10 = vadd.f32 %v1518_v63, %v1476_v1 }
 0x18b   :  { %v1555_v52 = vpop.f32.mrf.mxu1 }
 0x18c   :  { %v1556_v15 = vadd.f32 %v1555_v52, %v1513_v7 }
 0x18d   :  { %v1557_v53 = vpop.f32.mrf.mxu1 }
 0x18e   :  { %v1558_v11 = vadd.f32 %v1557_v53, %v1515_v3 }
 0x18f   :  { %v1559_v58 = vpop.f32.mrf.mxu1 }
 0x190   :  { %v1560_v14 = vadd.f32 %v1559_v58, %v1517_v4 }
 0x191   :  { %v1561_v59 = vpop.f32.mrf.mxu1 }
 0x192   :  { %v1562_v17 = vadd.f32 %v1561_v59, %v1519_v10  ;;  %v5220_v10 = vld [vmem:[%s7312_s7 + $0xe8] ss:$16 sps:$4 sm:$0xff]  }
 0x193   :  { %v1598_v0 = vpop.f32.mrf.mxu1 }
 0x194   :  { %v1599_v19 = vadd.f32 %v1598_v0, %v1556_v15  ;;  %v5226_v15 = vld [vmem:[%s7312_s7 + $0xc8] ss:$16 sps:$4 sm:$0xff]  }
 0x195   :  { %v1600_v9 = vpop.f32.mrf.mxu1 }
 0x196   :  { %v1601_v8 = vadd.f32 %v1600_v9, %v1558_v11  ;;  %v1609_v29 = vmax.f32 %v1599_v19, 0.0  ;;  %v5244_v19 = vld [vmem:[%s7312_s7 + $0x68] ss:$16 sps:$4 sm:$0xff]  }
 0x197   :  { %v1602_v16 = vpop.f32.mrf.mxu1 }
 0x198   :  { %v1603_v18 = vadd.f32 %v1602_v16, %v1560_v14  ;;  %v1610_v25 = vmax.f32 %v1601_v8, 0.0  ;;  %v5228_v14 = vld [vmem:[%s7312_s7 + $0xcc] ss:$16 sps:$4 sm:$0xff]  }
 0x199   :  { %v1604_v20 = vpop.f32.mrf.mxu1  ;;  %v5234_v16 = vld [vmem:[%s7312_s7 + $0xac] ss:$16 sps:$4 sm:$0xff]  }
 0x19a   :  { %v1605_v22 = vadd.f32 %v1604_v20, %v1562_v17  ;;  %v1613_v24 = vmax.f32 %v1603_v18, 0.0  ;;  %v5232_v17 = vld [vmem:[%s7312_s7 + $0xa8] ss:$16 sps:$4 sm:$0xff]   ;;  %v5240_v8 = vld [vmem:[%s7312_s7 + $0x8c] ss:$16 sps:$4 sm:$0xff]  }
 0x19b   :  { %v5246_v18 = vld [vmem:[%s7312_s7 + $0x6c] ss:$16 sps:$4 sm:$0xff]  }
 0x19c   :  { %v1614_v27 = vmax.f32 %v1605_v22, 0.0  ;;  %v1617_v33 = vpack.c.bf16 %v1613_v24, %v1609_v29  ;;  %v5252_v20 = vld [vmem:[%s7312_s7 + $0x4c] ss:$16 sps:$4 sm:$0xff]   ;;  %v5250_v22 = vld [vmem:[%s7312_s7 + $0x48] ss:$16 sps:$4 sm:$0xff]  }
 0x19d   :  { %v5255_v24 = vld [vmem:[%s7312_s7 + $0x24] ss:$16 sps:$4 sm:$0xff]  }
 0x19e   :  { %v1618_v31 = vpack.c.bf16 %v1614_v27, %v1610_v25  ;;  %v5258_v25 = vld [vmem:[%s7312_s7 + $0x2c] ss:$16 sps:$4 sm:$0xff]   ;;  %v5253_v27 = vld [vmem:[%s7312_s7 + $0x20] ss:$16 sps:$4 sm:$0xff]   ;;  %v5261_v29 = vld [vmem:[%s7312_s7 + $0x4] ss:$16 sps:$4 sm:$0xff]  }
 0x1a0   :  { %1955 = vmatprep.mubr.bf16.mxu1 %v1618_v31  ;;  %v5259_v31 = vld [vmem:[%s7312_s7] ss:$16 sps:$4 sm:$0xff]  }
 0x1a1   :  { %1956 = vmatmul.mubr.bf16.vlgmr.msra.gmra.mxu1 %v1617_v33  ;;  %v5267_v33 = vld [vmem:[%s7314_s9 + $0x18c] ss:$28 sps:$4 sm:$0xff]  }
 0x1a2   :  { %2328 = vmatprep.mubr.bf16.mxu1 %v5607_v21  ;;  %2297 = vmatpush1.bf16.msra.mxu1 %v5217_v13 }
 0x1a3   :  { %2298 = vmatprep.subr.bf16.mxu1 %v5225_v41 }
 0x1a6   :  { %2299 = vmatpush1.bf16.msra.mxu1 %v5223_v42  ;;  %v5265_v42 = vld [vmem:[%s7314_s9 + $0x188] ss:$28 sps:$4 sm:$0xff]  }
 0x1a7   :  { %2300 = vmatprep.subr.bf16.mxu1 %v5231_v26  ;;  %v5268_v26 = vld [vmem:[%s7314_s9 + $0x508] ss:$28 sps:$4 sm:$0xff]  }
 0x1aa   :  { %2301 = vmatpush1.bf16.msra.mxu1 %v5229_v12 }
 0x1ab   :  { %2302 = vmatprep.subr.bf16.mxu1 %v5237_v43  ;;  %v5273_v43 = vld [vmem:[%s7314_s9 + $0x154] ss:$28 sps:$4 sm:$0xff]  }
 0x1ae   :  { %2303 = vmatpush1.bf16.msra.mxu1 %v5235_v45  ;;  %v5276_v45 = vld [vmem:[%s7314_s9 + $0x4d4] ss:$28 sps:$4 sm:$0xff]  }
 0x1af   :  { %2304 = vmatprep.subr.bf16.mxu1 %v5243_v46  ;;  %v5271_v46 = vld [vmem:[%s7314_s9 + $0x150] ss:$28 sps:$4 sm:$0xff]  }
 0x1b2   :  { %2305 = vmatpush1.bf16.msra.mxu1 %v5241_v23  ;;  %v5274_v23 = vld [vmem:[%s7314_s9 + $0x4d0] ss:$28 sps:$4 sm:$0xff]  }
 0x1b3   :  { %2306 = vmatprep.subr.bf16.mxu1 %v5249_v44  ;;  %v5279_v44 = vld [vmem:[%s7314_s9 + $0x11c] ss:$28 sps:$4 sm:$0xff]  }
 0x1b6   :  { %2307 = vmatpush1.bf16.msra.mxu1 %v5247_v47  ;;  %v5282_v47 = vld [vmem:[%s7314_s9 + $0x49c] ss:$28 sps:$4 sm:$0xff]  }
 0x1b7   :  { %2308 = vmatprep.subr.bf16.mxu1 %v5255_v24  ;;  %v5330_v24 = vld [vmem:[%s7314_s9 + $0x65c] ss:$28 sps:$4 sm:$0xff]  }
 0x1ba   :  { %2309 = vmatpush1.bf16.msra.mxu1 %v5253_v27  ;;  %v5328_v27 = vld [vmem:[%s7314_s9 + $0x658] ss:$28 sps:$4 sm:$0xff]  }
 0x1bb   :  { %2310 = vmatprep.subr.bf16.mxu1 %v5261_v29  ;;  %v5336_v29 = vld [vmem:[%s7314_s9 + $0x624] ss:$28 sps:$4 sm:$0xff]  }
 0x1be   :  { %2311 = vmatpush1.bf16.msra.mxu1 %v5259_v31  ;;  %v5334_v31 = vld [vmem:[%s7314_s9 + $0x620] ss:$28 sps:$4 sm:$0xff]  }
 0x1bf   :  { %3839 = vmatprep.subr.bf16.mxu1 %v5267_v33  ;;  %v5342_v33 = vld [vmem:[%s7314_s9 + $0x5ec] ss:$28 sps:$4 sm:$0xff]  }
 0x212   :  { %v4776_v48 = vpop.f32.mrf.mxu0 }
 0x214   :  { %v4777_v51 = vpop.f32.mrf.mxu0 }
 0x215   :  { %v4778_v56 = vadd.f32 %v4777_v51, %v4776_v48  ;;  %v5277_v48 = vld [vmem:[%s7314_s9 + $0x118] ss:$28 sps:$4 sm:$0xff]  }
 0x216   :  { %v4779_v52 = vpop.f32.mrf.mxu0  ;;  %v5280_v51 = vld [vmem:[%s7314_s9 + $0x498] ss:$28 sps:$4 sm:$0xff]  }
 0x217   :  { %v1917_v62 = vadd.f32 %v4778_v56, %v4446_v57  ;;  %v5286_v56 = vld [vmem:[%s7314_s9 + $0x460] ss:$28 sps:$4 sm:$0xff]  }
 0x218   :  { %v4780_v53 = vpop.f32.mrf.mxu0 }
 0x219   :  { %v4781_v59 = vadd.f32 %v4780_v53, %v4779_v52  ;;  %v5285_v52 = vld [vmem:[%s7314_s9 + $0xe4] ss:$28 sps:$4 sm:$0xff]  }
 0x21a   :  { %v5288_v53 = vld [vmem:[%s7314_s9 + $0x464] ss:$28 sps:$4 sm:$0xff]  }
 0x21b   :  { %v1920_v0 = vadd.f32 %v4781_v59, %v4446_v57  ;;  %v5291_v57 = vld [vmem:[%s7314_s9 + $0xac] ss:$28 sps:$4 sm:$0xff]  }
 0x21c   :  { %v5289_v59 = vld [vmem:[%s7314_s9 + $0xa8] ss:$28 sps:$4 sm:$0xff]  }
 0x261   :  { %v4798_v55 = vpop.f32.mrf.mxu1 }
 0x263   :  { %v4799_v58 = vpop.f32.mrf.mxu1 }
 0x264   :  { %v4800_v60 = vadd.f32 %v4799_v58, %v4798_v55  ;;  %v5283_v55 = vld [vmem:[%s7314_s9 + $0xe0] ss:$28 sps:$4 sm:$0xff]   ;;  %v5294_v58 = vld [vmem:[%s7314_s9 + $0x42c] ss:$28 sps:$4 sm:$0xff]  }
 0x265   :  { %v4801_v61 = vpop.f32.mrf.mxu1 }
 0x266   :  { %v1958_v1 = vadd.f32 %v4800_v60, %v1917_v62  ;;  %v5292_v60 = vld [vmem:[%s7314_s9 + $0x428] ss:$28 sps:$4 sm:$0xff]   ;;  %v5300_v62 = vld [vmem:[%s7314_s9 + $0x3f4] ss:$28 sps:$4 sm:$0xff]  }
 0x267   :  { %v4802_v63 = vpop.f32.mrf.mxu1 }
 0x268   :  { %v4803_v3 = vadd.f32 %v4802_v63, %v4801_v61  ;;  %v1964_v7 = vmax.f32 %v1958_v1, 0.0  ;;  %v5297_v61 = vld [vmem:[%s7314_s9 + $0x74] ss:$28 sps:$4 sm:$0xff]   ;;  %v5303_v1 = vld [vmem:[%s7314_s9 + $0x3c] ss:$28 sps:$4 sm:$0xff]  }
 0x269   :  { %v5295_v63 = vld [vmem:[%s7314_s9 + $0x70] ss:$28 sps:$4 sm:$0xff]  }
 0x26a   :  { %v1961_v4 = vadd.f32 %v4803_v3, %v1920_v0  ;;  %v5298_v0 = vld [vmem:[%s7314_s9 + $0x3f0] ss:$28 sps:$4 sm:$0xff]   ;;  %v5306_v3 = vld [vmem:[%s7314_s9 + $0x3bc] ss:$28 sps:$4 sm:$0xff]  }
 0x26c   :  { %v1965_v9 = vmax.f32 %v1961_v4, 0.0  ;;  %v5301_v4 = vld [vmem:[%s7314_s9 + $0x38] ss:$28 sps:$4 sm:$0xff]  }
 0x26e   :  { %v1966_v11 = vpack.c.bf16 %v1965_v9, %v1964_v7  ;;  %v5304_v7 = vld [vmem:[%s7314_s9 + $0x3b8] ss:$28 sps:$4 sm:$0xff]   ;;  %v5309_v9 = vld [vmem:[%s7314_s9 + $0x4] ss:$28 sps:$4 sm:$0xff]  }
 0x270   :  { %4874 = vmatmul.mubr.bf16.vlgmr.msra.gmra.mxu0 %v1966_v11  ;;  %v5307_v11 = vld [vmem:[%s7314_s9] ss:$28 sps:$4 sm:$0xff]  }
 0x271   :  { %2340 = vmatpush1.bf16.msra.mxu0 %v5220_v10  ;;  %2371 = vmatprep.mubr.bf16.mxu0 %v5607_v21  ;;  %v5238_v21 = vld [vmem:[%s7312_s7 + $0x88] ss:$16 sps:$4 sm:$0xff]   ;;  %v5312_v10 = vld [vmem:[%s7314_s9 + $0x384] ss:$28 sps:$4 sm:$0xff]  }
 0x272   :  { %2341 = vmatprep.subr.bf16.mxu0 %v5228_v14  ;;  %v5310_v14 = vld [vmem:[%s7314_s9 + $0x380] ss:$28 sps:$4 sm:$0xff]  }
 0x275   :  { %2342 = vmatpush1.bf16.msra.mxu0 %v5226_v15  ;;  %v5315_v15 = vld [vmem:[%s7314_s9 + $0x34c] ss:$28 sps:$4 sm:$0xff]  }
 0x276   :  { %2343 = vmatprep.subr.bf16.mxu0 %v5234_v16  ;;  %v5318_v16 = vld [vmem:[%s7314_s9 + $0x6cc] ss:$28 sps:$4 sm:$0xff]  }
 0x279   :  { %2344 = vmatpush1.bf16.msra.mxu0 %v5232_v17  ;;  %v5313_v17 = vld [vmem:[%s7314_s9 + $0x348] ss:$28 sps:$4 sm:$0xff]  }
 0x27a   :  { %2345 = vmatprep.subr.bf16.mxu0 %v5240_v8  ;;  %v5316_v8 = vld [vmem:[%s7314_s9 + $0x6c8] ss:$28 sps:$4 sm:$0xff]  }
 0x27d   :  { %2346 = vmatpush1.bf16.msra.mxu0 %v5238_v21  ;;  %v5321_v21 = vld [vmem:[%s7314_s9 + $0x314] ss:$28 sps:$4 sm:$0xff]  }
 0x27e   :  { %2347 = vmatprep.subr.bf16.mxu0 %v5246_v18  ;;  %v5324_v18 = vld [vmem:[%s7314_s9 + $0x694] ss:$28 sps:$4 sm:$0xff]  }
 0x281   :  { %2348 = vmatpush1.bf16.msra.mxu0 %v5244_v19  ;;  %v5319_v19 = vld [vmem:[%s7314_s9 + $0x310] ss:$28 sps:$4 sm:$0xff]  }
 0x282   :  { %2349 = vmatprep.subr.bf16.mxu0 %v5252_v20  ;;  %v5322_v20 = vld [vmem:[%s7314_s9 + $0x690] ss:$28 sps:$4 sm:$0xff]  }
 0x285   :  { %2350 = vmatpush1.bf16.msra.mxu0 %v5250_v22  ;;  %v5327_v22 = vld [vmem:[%s7314_s9 + $0x2dc] ss:$28 sps:$4 sm:$0xff]  }
 0x286   :  { %2351 = vmatprep.subr.bf16.mxu0 %v5258_v25  ;;  %v5325_v25 = vld [vmem:[%s7314_s9 + $0x2d8] ss:$28 sps:$4 sm:$0xff]  }
 0x289   :  { %2352 = vmatpush1.bf16.msra.mxu0 %v5256_v28  ;;  %v5333_v28 = vld [vmem:[%s7314_s9 + $0x2a4] ss:$28 sps:$4 sm:$0xff]  }
 0x28a   :  { %2353 = vmatprep.subr.bf16.mxu0 %v5264_v30  ;;  %v5331_v30 = vld [vmem:[%s7314_s9 + $0x2a0] ss:$28 sps:$4 sm:$0xff]  }
 0x28d   :  { %2354 = vmatpush1.bf16.msra.mxu0 %v5262_v32  ;;  %v5339_v32 = vld [vmem:[%s7314_s9 + $0x26c] ss:$28 sps:$4 sm:$0xff]  }
 0x28e   :  { %3882 = vmatprep.subr.bf16.mxu0 %v5270_v34  ;;  %v5337_v34 = vld [vmem:[%s7314_s9 + $0x268] ss:$28 sps:$4 sm:$0xff]  }
 0x330   :  { %v2072_v36 = vpop.f32.mrf.mxu0 }
 0x331   :  { %v2073_v38 = vadd.f32 %v4479_v35, %v2072_v36  ;;  %v5345_v36 = vld [vmem:[%s7314_s9 + $0x234] ss:$28 sps:$4 sm:$0xff]  }
 0x332   :  { %v4875_v37 = vpop.f32.mrf.mxu0 }
 0x333   :  { %v2079_v40 = vmax.f32 %v2073_v38, 0.0  ;;  %v5348_v37 = vld [vmem:[%s7314_s9 + $0x5b4] ss:$28 sps:$4 sm:$0xff]  }
 0x334   :  { %v2075_v39 = vpop.f32.mrf.mxu0  ;;  %v5343_v38 = vld [vmem:[%s7314_s9 + $0x230] ss:$28 sps:$4 sm:$0xff]  }
 0x335   :  { %v2076_v13 = vadd.f32 %v4479_v35, %v2075_v39  ;;  %v5340_v35 = vld [vmem:[%s7314_s9 + $0x5e8] ss:$28 sps:$4 sm:$0xff]   ;;  %v5346_v39 = vld [vmem:[%s7314_s9 + $0x5b0] ss:$28 sps:$4 sm:$0xff]  }
 0x336   :  { %v4876_v54 = vpop.f32.mrf.mxu0 }
 0x337   :  { %v2080_v41 = vmax.f32 %v2076_v13, 0.0  ;;  %v5351_v13 = vld [vmem:[%s7314_s9 + $0x1fc] ss:$28 sps:$4 sm:$0xff]  }
 0x338   :  { %v5354_v54 = vld [vmem:[%s7314_s9 + $0x57c] ss:$28 sps:$4 sm:$0xff]  }
 0x339   :  { %v2081_v12 = vpack.c.bf16 %v2080_v41, %v2079_v40  ;;  %v5349_v40 = vld [vmem:[%s7314_s9 + $0x1f8] ss:$28 sps:$4 sm:$0xff]  }
 0x33a   :  { %v5352_v41 = vld [vmem:[%s7314_s9 + $0x578] ss:$28 sps:$4 sm:$0xff]  }
 0x33b   :  { %2329 = vmatmul.mubr.bf16.vlgmr.msra.gmra.mxu1 %v2081_v12  ;;  %2372 = vmatmul.mubr.bf16.vlgmr.msra.gmra.mxu0 %v2081_v12  ;;  %v5355_v12 = vld [vmem:[%s7314_s9 + $0x1c0] ss:$28 sps:$4 sm:$0xff]  }
 0x33c   :  { %3840 = vmatpush1.bf16.msra.mxu1 %v5265_v42  ;;  %3883 = vmatpush1.bf16.msra.mxu0 %v5268_v26  ;;  %v5357_v42 = vld [vmem:[%s7314_s9 + $0x1c4] ss:$28 sps:$4 sm:$0xff]  }
 0x33d   :  { %3841 = vmatprep.subr.bf16.mxu1 %v5273_v43  ;;  %3884 = vmatprep.subr.bf16.mxu0 %v5276_v45  ;;  %v5360_v26 = vld [vmem:[%s7314_s9 + $0x544] ss:$28 sps:$4 sm:$0xff]   ;;  %v5363_v45 = vld [vmem:[%s7314_s9 + $0x194] ss:$28 sps:$4 sm:$0xff]  }
 0x33e   :  { %v5358_v43 = vld [vmem:[%s7314_s9 + $0x540] ss:$28 sps:$4 sm:$0xff]  }
 0x340   :  { %3842 = vmatpush1.bf16.msra.mxu1 %v5271_v46  ;;  %3885 = vmatpush1.bf16.msra.mxu0 %v5274_v23  ;;  %v5366_v46 = vld [vmem:[%s7314_s9 + $0x514] ss:$28 sps:$4 sm:$0xff]   ;;  %v2114_v23 = vld [vmem:[%s7313_s8] sm:$0xf] }
 0x341   :  { %3843 = vmatprep.subr.bf16.mxu1 %v5279_v44  ;;  %3886 = vmatprep.subr.bf16.mxu0 %v5282_v47 }
 0x344   :  { %3844 = vmatpush1.bf16.msra.mxu1 %v5277_v48  ;;  %3887 = vmatpush1.bf16.msra.mxu0 %v5280_v51  ;;  %v2123_v48 = vrot.slane %v2114_v23, %v6434_v5  ;;  %v2131_v51 = vrot.slane %v2114_v23, %v6445_v49 }
 0x345   :  { %3845 = vmatprep.subr.bf16.mxu1 %v5285_v52  ;;  %3888 = vmatprep.subr.bf16.mxu0 %v5288_v53  ;;  %v2119_v52 = vrot.slane %v2114_v23, %v6437_v6  ;;  %v2127_v53 = vrot.slane %v2114_v23, %v6448_v50  ;;  %v5405_v23 = vld [vmem:[%s7314_s9 + $0xc] ss:$28 sps:$4 sm:$0xff]  }
 0x348   :  { %3846 = vmatpush1.bf16.msra.mxu1 %v5283_v55  ;;  %3889 = vmatpush1.bf16.msra.mxu0 %v5286_v56 }
 0x349   :  { %3847 = vmatprep.subr.bf16.mxu1 %v5291_v57  ;;  %3890 = vmatprep.subr.bf16.mxu0 %v5294_v58 }
 0x34c   :  { %3848 = vmatpush1.bf16.msra.mxu1 %v5289_v59  ;;  %3891 = vmatpush1.bf16.msra.mxu0 %v5292_v60 }
 0x34d   :  { %3849 = vmatprep.subr.bf16.mxu1 %v5297_v61  ;;  %3892 = vmatprep.subr.bf16.mxu0 %v5300_v62 }
 0x350   :  { %3850 = vmatpush1.bf16.msra.mxu1 %v5295_v63  ;;  %3893 = vmatpush1.bf16.msra.mxu0 %v5298_v0 }
 0x351   :  { %3851 = vmatprep.subr.bf16.mxu1 %v5303_v1  ;;  %3894 = vmatprep.subr.bf16.mxu0 %v5306_v3 }
 0x354   :  { %3852 = vmatpush1.bf16.msra.mxu1 %v5301_v4  ;;  %3895 = vmatpush1.bf16.msra.mxu0 %v5304_v7 }
 0x355   :  { %3853 = vmatprep.subr.bf16.mxu1 %v5309_v9  ;;  %3896 = vmatprep.subr.bf16.mxu0 %v5312_v10 }
 0x358   :  { %3854 = vmatpush1.bf16.msra.mxu1 %v5307_v11  ;;  %3897 = vmatpush1.bf16.msra.mxu0 %v5310_v14 }
 0x359   :  { %3855 = vmatprep.subr.bf16.mxu1 %v5315_v15  ;;  %3898 = vmatprep.subr.bf16.mxu0 %v5318_v16 }
 0x35c   :  { %3856 = vmatpush2.bf16.msra.mxu1 %v5313_v17  ;;  %3899 = vmatpush2.bf16.msra.mxu0 %v5316_v8 }
 0x35d   :  { %3857 = vmatprep.subr.bf16.mxu1 %v5321_v21  ;;  %3900 = vmatprep.subr.bf16.mxu0 %v5324_v18 }
 0x360   :  { %3858 = vmatpush2.bf16.msra.mxu1 %v5319_v19  ;;  %3901 = vmatpush2.bf16.msra.mxu0 %v5322_v20  ;;  %v5361_v19 = vld [vmem:[%s7314_s9 + $0x190] ss:$28 sps:$4 sm:$0xff]  }
 0x361   :  { %3859 = vmatprep.subr.bf16.mxu1 %v5327_v22  ;;  %3902 = vmatprep.subr.bf16.mxu0 %v5330_v24  ;;  %v5364_v20 = vld [vmem:[%s7314_s9 + $0x510] ss:$28 sps:$4 sm:$0xff]  }
 0x364   :  { %3860 = vmatpush2.bf16.msra.mxu1 %v5325_v25  ;;  %3903 = vmatpush2.bf16.msra.mxu0 %v5328_v27  ;;  %v5369_v25 = vld [vmem:[%s7314_s9 + $0x15c] ss:$28 sps:$4 sm:$0xff]  }
 0x365   :  { %3861 = vmatprep.subr.bf16.mxu1 %v5333_v28  ;;  %3904 = vmatprep.subr.bf16.mxu0 %v5336_v29  ;;  %v5372_v27 = vld [vmem:[%s7314_s9 + $0x4dc] ss:$28 sps:$4 sm:$0xff]  }
 0x366   :  { %v5367_v28 = vld [vmem:[%s7314_s9 + $0x158] ss:$28 sps:$4 sm:$0xff]  }
 0x367   :  { %v5370_v29 = vld [vmem:[%s7314_s9 + $0x4d8] ss:$28 sps:$4 sm:$0xff]  }
 0x368   :  { %3862 = vmatpush2.bf16.msra.mxu1 %v5331_v30  ;;  %3905 = vmatpush2.bf16.msra.mxu0 %v5334_v31  ;;  %v5375_v30 = vld [vmem:[%s7314_s9 + $0x124] ss:$28 sps:$4 sm:$0xff]  }
 0x369   :  { %3863 = vmatprep.subr.bf16.mxu1 %v5339_v32  ;;  %3906 = vmatprep.subr.bf16.mxu0 %v5342_v33  ;;  %v5378_v31 = vld [vmem:[%s7314_s9 + $0x4a4] ss:$28 sps:$4 sm:$0xff]  }
 0x36a   :  { %v5373_v32 = vld [vmem:[%s7314_s9 + $0x120] ss:$28 sps:$4 sm:$0xff]  }
 0x36b   :  { %v5376_v33 = vld [vmem:[%s7314_s9 + $0x4a0] ss:$28 sps:$4 sm:$0xff]  }
 0x36c   :  { %3864 = vmatpush2.bf16.msra.mxu1 %v5337_v34  ;;  %3907 = vmatpush2.bf16.msra.mxu0 %v5340_v35  ;;  %v5381_v34 = vld [vmem:[%s7314_s9 + $0xec] ss:$28 sps:$4 sm:$0xff]  }
 0x36d   :  { %3865 = vmatprep.subr.bf16.mxu1 %v5345_v36  ;;  %3908 = vmatprep.subr.bf16.mxu0 %v5348_v37  ;;  %v5384_v35 = vld [vmem:[%s7314_s9 + $0x46c] ss:$28 sps:$4 sm:$0xff]  }
 0x36e   :  { %v5379_v36 = vld [vmem:[%s7314_s9 + $0xe8] ss:$28 sps:$4 sm:$0xff]  }
 0x36f   :  { %v5382_v37 = vld [vmem:[%s7314_s9 + $0x468] ss:$28 sps:$4 sm:$0xff]  }
 0x370   :  { %3866 = vmatpush2.bf16.msra.mxu1 %v5343_v38  ;;  %3909 = vmatpush2.bf16.msra.mxu0 %v5346_v39  ;;  %v5387_v38 = vld [vmem:[%s7314_s9 + $0xb4] ss:$28 sps:$4 sm:$0xff]  }
 0x371   :  { %3867 = vmatprep.subr.bf16.mxu1 %v5351_v13  ;;  %3910 = vmatprep.subr.bf16.mxu0 %v5354_v54  ;;  %v5390_v39 = vld [vmem:[%s7314_s9 + $0x434] ss:$28 sps:$4 sm:$0xff]  }
 0x372   :  { %v5385_v13 = vld [vmem:[%s7314_s9 + $0xb0] ss:$28 sps:$4 sm:$0xff]  }
 0x373   :  { %v5388_v54 = vld [vmem:[%s7314_s9 + $0x430] ss:$28 sps:$4 sm:$0xff]  }
 0x374   :  { %3868 = vmatpush2.bf16.msra.mxu1 %v5349_v40  ;;  %3911 = vmatpush2.bf16.msra.mxu0 %v5352_v41  ;;  %v5393_v40 = vld [vmem:[%s7314_s9 + $0x7c] ss:$28 sps:$4 sm:$0xff]  }
 0x375   :  { %3869 = vmatprep.subr.bf16.mxu1 %v5357_v42  ;;  %3912 = vmatprep.subr.bf16.mxu0 %v5360_v26  ;;  %v5396_v41 = vld [vmem:[%s7314_s9 + $0x3fc] ss:$28 sps:$4 sm:$0xff]  }
 0x376   :  { %v5391_v42 = vld [vmem:[%s7314_s9 + $0x78] ss:$28 sps:$4 sm:$0xff]  }
 0x377   :  { %v5394_v26 = vld [vmem:[%s7314_s9 + $0x3f8] ss:$28 sps:$4 sm:$0xff]  }
 0x378   :  { %3870 = vmatpush2.bf16.msra.mxu1 %v5355_v12  ;;  %3913 = vmatpush2.bf16.msra.mxu0 %v5358_v43  ;;  %v5399_v12 = vld [vmem:[%s7314_s9 + $0x44] ss:$28 sps:$4 sm:$0xff]  }
 0x379   :  { %3925 = vmatprep.subr.bf16.mxu1 %v5363_v45  ;;  %3968 = vmatprep.subr.bf16.mxu0 %v5366_v46  ;;  %v5402_v43 = vld [vmem:[%s7314_s9 + $0x3c4] ss:$28 sps:$4 sm:$0xff]  }
 0x37a   :  { %v5397_v45 = vld [vmem:[%s7314_s9 + $0x40] ss:$28 sps:$4 sm:$0xff]  }
 0x37b   :  { %v5400_v46 = vld [vmem:[%s7314_s9 + $0x3c0] ss:$28 sps:$4 sm:$0xff]  }
 0x3fb   :  { %v2330_v44 = vpop.f32.mrf.mxu1  ;;  %v2373_v47 = vpop.f32.mrf.mxu0 }
 0x3fc   :  { %v2331_v63 = vadd.f32 %v2330_v44, %v2119_v52  ;;  %v2374_v0 = vadd.f32 %v2373_v47, %v2127_v53  ;;  %v5408_v44 = vld [vmem:[%s7314_s9 + $0x38c] ss:$28 sps:$4 sm:$0xff]  }
 0x3fd   :  { %v2332_v55 = vpop.f32.mrf.mxu1  ;;  %v2375_v56 = vpop.f32.mrf.mxu0  ;;  %v5403_v47 = vld [vmem:[%s7314_s9 + $0x8] ss:$28 sps:$4 sm:$0xff]  }
 0x3fe   :  { %v2333_v59 = vadd.f32 %v2332_v55, %v2123_v48  ;;  %v2376_v60 = vadd.f32 %v2375_v56, %v2131_v51  ;;  %v2382_v17 = vmax.f32 %v2331_v63, 0.0  ;;  %v2384_v8 = vmax.f32 %v2374_v0, 0.0  ;;  %v5412_v55 = vld [vmem:[%s7314_s9 + $0x6d0] ss:$28 sps:$4 sm:$0xff]   ;;  %v5417_v56 = vld [vmem:[%s7314_s9 + $0x31c] ss:$28 sps:$4 sm:$0xff]  }
 0x3ff   :  { %v2334_v57 = vpop.f32.mrf.mxu1  ;;  %v2377_v58 = vpop.f32.mrf.mxu0  ;;  %v5424_v63 = vld [vmem:[%s7314_s9 + $0x660] ss:$28 sps:$4 sm:$0xff]   ;;  %v5429_v0 = vld [vmem:[%s7314_s9 + $0x2ac] ss:$28 sps:$4 sm:$0xff]  }
 0x400   :  { %v2335_v61 = vadd.f32 %v2334_v57, %v2119_v52  ;;  %v2378_v62 = vadd.f32 %v2377_v58, %v2127_v53  ;;  %v2383_v11 = vmax.f32 %v2333_v59, 0.0  ;;  %v2385_v14 = vmax.f32 %v2376_v60, 0.0  ;;  %v5414_v52 = vld [vmem:[%s7314_s9 + $0x6d4] ss:$28 sps:$4 sm:$0xff]   ;;  %v5420_v57 = vld [vmem:[%s7314_s9 + $0x69c] ss:$28 sps:$4 sm:$0xff]  }
 0x401   :  { %v2336_v1 = vpop.f32.mrf.mxu1  ;;  %v2379_v3 = vpop.f32.mrf.mxu0  ;;  %v5409_v53 = vld [vmem:[%s7314_s9 + $0x350] ss:$28 sps:$4 sm:$0xff]   ;;  %v5415_v58 = vld [vmem:[%s7314_s9 + $0x318] ss:$28 sps:$4 sm:$0xff]   ;;  %v5423_v60 = vld [vmem:[%s7314_s9 + $0x2e4] ss:$28 sps:$4 sm:$0xff]  }
 0x402   :  { %v2337_v4 = vadd.f32 %v2336_v1, %v2123_v48  ;;  %v2380_v7 = vadd.f32 %v2379_v3, %v2131_v51  ;;  %v2386_v9 = vmax.f32 %v2335_v61, 0.0  ;;  %v2388_v10 = vmax.f32 %v2378_v62, 0.0  ;;  %v5406_v48 = vld [vmem:[%s7314_s9 + $0x388] ss:$28 sps:$4 sm:$0xff]   ;;  %v5411_v51 = vld [vmem:[%s7314_s9 + $0x354] ss:$28 sps:$4 sm:$0xff]  }
 0x403   :  { %v5418_v59 = vld [vmem:[%s7314_s9 + $0x698] ss:$28 sps:$4 sm:$0xff]   ;;  %v5426_v61 = vld [vmem:[%s7314_s9 + $0x664] ss:$28 sps:$4 sm:$0xff]   ;;  %v5432_v1 = vld [vmem:[%s7314_s9 + $0x62c] ss:$28 sps:$4 sm:$0xff]  }
 0x404   :  { %v2387_v15 = vmax.f32 %v2337_v4, 0.0  ;;  %v2389_v16 = vmax.f32 %v2380_v7, 0.0  ;;  %v6795_v22 = vpack.c.bf16 %v2386_v9, %v2382_v17  ;;  %v6797_v24 = vpack.c.bf16 %v2388_v10, %v2384_v8  ;;  %v5421_v62 = vld [vmem:[%s7314_s9 + $0x2e0] ss:$28 sps:$4 sm:$0xff]   ;;  %v5427_v3 = vld [vmem:[%s7314_s9 + $0x2a8] ss:$28 sps:$4 sm:$0xff]  }
 0x405   :  { %v5430_v4 = vld [vmem:[%s7314_s9 + $0x628] ss:$28 sps:$4 sm:$0xff]   ;;  %v5435_v7 = vld [vmem:[%s7314_s9 + $0x274] ss:$28 sps:$4 sm:$0xff]  }
 0x406   :  { %v6785_v21 = vpack.c.bf16 %v2387_v15, %v2383_v11  ;;  %v6787_v18 = vpack.c.bf16 %v2389_v16, %v2385_v14  ;;  %v5438_v9 = vld [vmem:[%s7314_s9 + $0x5f4] ss:$28 sps:$4 sm:$0xff]   ;;  %v5441_v14 = vld [vmem:[%s7314_s9 + $0x23c] ss:$28 sps:$4 sm:$0xff]   ;;  %v5447_v8 = vld [vmem:[%s7314_s9 + $0x204] ss:$28 sps:$4 sm:$0xff]  }
 0x407   :  { %v5433_v10 = vld [vmem:[%s7314_s9 + $0x270] ss:$28 sps:$4 sm:$0xff]   ;;  %v5444_v15 = vld [vmem:[%s7314_s9 + $0x5bc] ss:$28 sps:$4 sm:$0xff]  }
 0x408   :  { %3871 = vmatprep.mubr.bf16.mxu1 %v6785_v21  ;;  %3914 = vmatprep.mubr.bf16.mxu0 %v6787_v18  ;;  %v5436_v11 = vld [vmem:[%s7314_s9 + $0x5f0] ss:$28 sps:$4 sm:$0xff]   ;;  %v5439_v16 = vld [vmem:[%s7314_s9 + $0x238] ss:$28 sps:$4 sm:$0xff]  }
 0x409   :  { %3872 = vmatmul.mubr.bf16.vlgmr.msra.gmra.mxu1 %v6795_v22  ;;  %3915 = vmatmul.mubr.bf16.vlgmr.msra.gmra.mxu0 %v6797_v24  ;;  %v5442_v17 = vld [vmem:[%s7314_s9 + $0x5b8] ss:$28 sps:$4 sm:$0xff]  }
 0x40a   :  { %3926 = vmatpush1.bf16.msra.mxu1 %v5361_v19  ;;  %3969 = vmatpush1.bf16.msra.mxu0 %v5364_v20  ;;  %v5450_v19 = vld [vmem:[%s7314_s9 + $0x584] ss:$28 sps:$4 sm:$0xff]  }
 0x40b   :  { %3957 = vmatprep.mubr.bf16.mxu1 %v6785_v21  ;;  %4000 = vmatprep.mubr.bf16.mxu0 %v6787_v18  ;;  %v5445_v20 = vld [vmem:[%s7314_s9 + $0x200] ss:$28 sps:$4 sm:$0xff]  }
 0x40c   :  { %3927 = vmatprep.subr.bf16.mxu1 %v5369_v25  ;;  %3970 = vmatprep.subr.bf16.mxu0 %v5372_v27  ;;  %v5448_v25 = vld [vmem:[%s7314_s9 + $0x580] ss:$28 sps:$4 sm:$0xff]   ;;  %v5453_v27 = vld [vmem:[%s7314_s9 + $0x1cc] ss:$28 sps:$4 sm:$0xff]  }
 0x40e   :  { %3928 = vmatpush1.bf16.msra.mxu1 %v5367_v28  ;;  %3971 = vmatpush1.bf16.msra.mxu0 %v5370_v29  ;;  %v5456_v28 = vld [vmem:[%s7314_s9 + $0x54c] ss:$28 sps:$4 sm:$0xff]  }
 0x40f   :  { %3929 = vmatprep.subr.bf16.mxu1 %v5375_v30  ;;  %3972 = vmatprep.subr.bf16.mxu0 %v5378_v31  ;;  %v5451_v29 = vld [vmem:[%s7314_s9 + $0x1c8] ss:$28 sps:$4 sm:$0xff]   ;;  %v5459_v31 = vld [vmem:[%s7314_s9 + $0x19c] ss:$28 sps:$4 sm:$0xff]  }
 0x410   :  { %v5454_v30 = vld [vmem:[%s7314_s9 + $0x548] ss:$28 sps:$4 sm:$0xff]  }
 0x412   :  { %3930 = vmatpush1.bf16.msra.mxu1 %v5373_v32  ;;  %3973 = vmatpush1.bf16.msra.mxu0 %v5376_v33  ;;  %v5462_v32 = vld [vmem:[%s7314_s9 + $0x51c] ss:$28 sps:$4 sm:$0xff]  }
 0x413   :  { %3931 = vmatprep.subr.bf16.mxu1 %v5381_v34  ;;  %3974 = vmatprep.subr.bf16.mxu0 %v5384_v35  ;;  %v5457_v33 = vld [vmem:[%s7314_s9 + $0x198] ss:$28 sps:$4 sm:$0xff]   ;;  %v5465_v35 = vld [vmem:[%s7314_s9 + $0x164] ss:$28 sps:$4 sm:$0xff]  }
 0x414   :  { %v5460_v34 = vld [vmem:[%s7314_s9 + $0x518] ss:$28 sps:$4 sm:$0xff]  }
 0x416   :  { %3932 = vmatpush1.bf16.msra.mxu1 %v5379_v36  ;;  %3975 = vmatpush1.bf16.msra.mxu0 %v5382_v37  ;;  %v5468_v36 = vld [vmem:[%s7314_s9 + $0x4e4] ss:$28 sps:$4 sm:$0xff]  }
 0x417   :  { %3933 = vmatprep.subr.bf16.mxu1 %v5387_v38  ;;  %3976 = vmatprep.subr.bf16.mxu0 %v5390_v39  ;;  %v5463_v37 = vld [vmem:[%s7314_s9 + $0x160] ss:$28 sps:$4 sm:$0xff]   ;;  %v5471_v39 = vld [vmem:[%s7314_s9 + $0x12c] ss:$28 sps:$4 sm:$0xff]  }
 0x418   :  { %v5466_v38 = vld [vmem:[%s7314_s9 + $0x4e0] ss:$28 sps:$4 sm:$0xff]  }
 0x41a   :  { %3934 = vmatpush1.bf16.msra.mxu1 %v5385_v13  ;;  %3977 = vmatpush1.bf16.msra.mxu0 %v5388_v54  ;;  %v5474_v13 = vld [vmem:[%s7314_s9 + $0x4ac] ss:$28 sps:$4 sm:$0xff]  }
 0x41b   :  { %3935 = vmatprep.subr.bf16.mxu1 %v5393_v40  ;;  %3978 = vmatprep.subr.bf16.mxu0 %v5396_v41  ;;  %v5469_v54 = vld [vmem:[%s7314_s9 + $0x128] ss:$28 sps:$4 sm:$0xff]   ;;  %v5477_v41 = vld [vmem:[%s7314_s9 + $0xf4] ss:$28 sps:$4 sm:$0xff]  }
 0x41c   :  { %v5472_v40 = vld [vmem:[%s7314_s9 + $0x4a8] ss:$28 sps:$4 sm:$0xff]  }
 0x41e   :  { %3936 = vmatpush1.bf16.msra.mxu1 %v5391_v42  ;;  %3979 = vmatpush1.bf16.msra.mxu0 %v5394_v26  ;;  %v5480_v42 = vld [vmem:[%s7314_s9 + $0x474] ss:$28 sps:$4 sm:$0xff]  }
 0x41f   :  { %3937 = vmatprep.subr.bf16.mxu1 %v5399_v12  ;;  %3980 = vmatprep.subr.bf16.mxu0 %v5402_v43  ;;  %v5475_v26 = vld [vmem:[%s7314_s9 + $0xf0] ss:$28 sps:$4 sm:$0xff]   ;;  %v5483_v43 = vld [vmem:[%s7314_s9 + $0xbc] ss:$28 sps:$4 sm:$0xff]  }
 0x420   :  { %v5478_v12 = vld [vmem:[%s7314_s9 + $0x470] ss:$28 sps:$4 sm:$0xff]  }
 0x422   :  { %3938 = vmatpush1.bf16.msra.mxu1 %v5397_v45  ;;  %3981 = vmatpush1.bf16.msra.mxu0 %v5400_v46  ;;  %v5486_v45 = vld [vmem:[%s7314_s9 + $0x43c] ss:$28 sps:$4 sm:$0xff]  }
 0x423   :  { %3939 = vmatprep.subr.bf16.mxu1 %v5405_v23  ;;  %3982 = vmatprep.subr.bf16.mxu0 %v5408_v44  ;;  %v5481_v46 = vld [vmem:[%s7314_s9 + $0xb8] ss:$28 sps:$4 sm:$0xff]   ;;  %v5489_v44 = vld [vmem:[%s7314_s9 + $0x84] ss:$28 sps:$4 sm:$0xff]  }
 0x424   :  { %v5484_v23 = vld [vmem:[%s7314_s9 + $0x438] ss:$28 sps:$4 sm:$0xff]  }
 0x426   :  { %3940 = vmatpush1.bf16.msra.mxu1 %v5403_v47  ;;  %3983 = vmatpush1.bf16.msra.mxu0 %v5406_v48  ;;  %v5492_v47 = vld [vmem:[%s7314_s9 + $0x404] ss:$28 sps:$4 sm:$0xff]  }
 0x427   :  { %3941 = vmatprep.subr.bf16.mxu1 %v5411_v51  ;;  %3984 = vmatprep.subr.bf16.mxu0 %v5414_v52  ;;  %v5487_v48 = vld [vmem:[%s7314_s9 + $0x80] ss:$28 sps:$4 sm:$0xff]   ;;  %v5495_v52 = vld [vmem:[%s7314_s9 + $0x4c] ss:$28 sps:$4 sm:$0xff]  }
 0x428   :  { %v5490_v51 = vld [vmem:[%s7314_s9 + $0x400] ss:$28 sps:$4 sm:$0xff]  }
 0x42a   :  { %3942 = vmatpush2.bf16.msra.mxu1 %v5409_v53  ;;  %3985 = vmatpush2.bf16.msra.mxu0 %v5412_v55  ;;  %v5498_v53 = vld [vmem:[%s7314_s9 + $0x3cc] ss:$28 sps:$4 sm:$0xff]  }
 0x42b   :  { %3943 = vmatprep.subr.bf16.mxu1 %v5417_v56  ;;  %3986 = vmatprep.subr.bf16.mxu0 %v5420_v57  ;;  %v5493_v55 = vld [vmem:[%s7314_s9 + $0x48] ss:$28 sps:$4 sm:$0xff]   ;;  %v5501_v57 = vld [vmem:[%s7314_s9 + $0x14] ss:$28 sps:$4 sm:$0xff]  }
 0x42c   :  { %v5496_v56 = vld [vmem:[%s7314_s9 + $0x3c8] ss:$28 sps:$4 sm:$0xff]  }
 0x42e   :  { %3944 = vmatpush2.bf16.msra.mxu1 %v5415_v58  ;;  %3987 = vmatpush2.bf16.msra.mxu0 %v5418_v59  ;;  %v5504_v58 = vld [vmem:[%s7314_s9 + $0x394] ss:$28 sps:$4 sm:$0xff]  }
 0x42f   :  { %3945 = vmatprep.subr.bf16.mxu1 %v5423_v60  ;;  %3988 = vmatprep.subr.bf16.mxu0 %v5426_v61  ;;  %v5499_v59 = vld [vmem:[%s7314_s9 + $0x10] ss:$28 sps:$4 sm:$0xff]   ;;  %v5507_v61 = vld [vmem:[%s7314_s9 + $0x35c] ss:$28 sps:$4 sm:$0xff]  }
 0x430   :  { %v5502_v60 = vld [vmem:[%s7314_s9 + $0x390] ss:$28 sps:$4 sm:$0xff]  }
 0x432   :  { %3946 = vmatpush2.bf16.msra.mxu1 %v5421_v62  ;;  %3989 = vmatpush2.bf16.msra.mxu0 %v5424_v63  ;;  %v5510_v62 = vld [vmem:[%s7314_s9 + $0x6dc] ss:$28 sps:$4 sm:$0xff]  }
 0x433   :  { %3947 = vmatprep.subr.bf16.mxu1 %v5429_v0  ;;  %3990 = vmatprep.subr.bf16.mxu0 %v5432_v1  ;;  %v5505_v63 = vld [vmem:[%s7314_s9 + $0x358] ss:$28 sps:$4 sm:$0xff]   ;;  %v5513_v1 = vld [vmem:[%s7314_s9 + $0x324] ss:$28 sps:$4 sm:$0xff]  }
 0x434   :  { %v5508_v0 = vld [vmem:[%s7314_s9 + $0x6d8] ss:$28 sps:$4 sm:$0xff]  }
 0x436   :  { %3948 = vmatpush2.bf16.msra.mxu1 %v5427_v3  ;;  %3991 = vmatpush2.bf16.msra.mxu0 %v5430_v4  ;;  %v5516_v3 = vld [vmem:[%s7314_s9 + $0x6a4] ss:$28 sps:$4 sm:$0xff]  }
 0x437   :  { %3949 = vmatprep.subr.bf16.mxu1 %v5435_v7  ;;  %3992 = vmatprep.subr.bf16.mxu0 %v5438_v9  ;;  %v5511_v4 = vld [vmem:[%s7314_s9 + $0x320] ss:$28 sps:$4 sm:$0xff]   ;;  %v5519_v9 = vld [vmem:[%s7314_s9 + $0x2ec] ss:$28 sps:$4 sm:$0xff]  }
 0x438   :  { %v5514_v7 = vld [vmem:[%s7314_s9 + $0x6a0] ss:$28 sps:$4 sm:$0xff]  }
 0x43a   :  { %3950 = vmatpush2.bf16.msra.mxu1 %v5433_v10  ;;  %3993 = vmatpush2.bf16.msra.mxu0 %v5436_v11  ;;  %v5522_v10 = vld [vmem:[%s7314_s9 + $0x66c] ss:$28 sps:$4 sm:$0xff]  }
 0x43b   :  { %3951 = vmatprep.subr.bf16.mxu1 %v5441_v14  ;;  %3994 = vmatprep.subr.bf16.mxu0 %v5444_v15  ;;  %v5517_v11 = vld [vmem:[%s7314_s9 + $0x2e8] ss:$28 sps:$4 sm:$0xff]   ;;  %v5525_v15 = vld [vmem:[%s7314_s9 + $0x2b4] ss:$28 sps:$4 sm:$0xff]  }
 0x43c   :  { %v5520_v14 = vld [vmem:[%s7314_s9 + $0x668] ss:$28 sps:$4 sm:$0xff]  }
 0x43e   :  { %3952 = vmatpush2.bf16.msra.mxu1 %v5439_v16  ;;  %3995 = vmatpush2.bf16.msra.mxu0 %v5442_v17  ;;  %v5528_v16 = vld [vmem:[%s7314_s9 + $0x634] ss:$28 sps:$4 sm:$0xff]  }
 0x43f   :  { %3953 = vmatprep.subr.bf16.mxu1 %v5447_v8  ;;  %3996 = vmatprep.subr.bf16.mxu0 %v5450_v19  ;;  %v5523_v17 = vld [vmem:[%s7314_s9 + $0x2b0] ss:$28 sps:$4 sm:$0xff]   ;;  %v5531_v19 = vld [vmem:[%s7314_s9 + $0x27c] ss:$28 sps:$4 sm:$0xff]  }
 0x440   :  { %v5526_v8 = vld [vmem:[%s7314_s9 + $0x630] ss:$28 sps:$4 sm:$0xff]  }
 0x442   :  { %3954 = vmatpush2.bf16.msra.mxu1 %v5445_v20  ;;  %3997 = vmatpush2.bf16.msra.mxu0 %v5448_v25  ;;  %v5534_v20 = vld [vmem:[%s7314_s9 + $0x5fc] ss:$28 sps:$4 sm:$0xff]  }
 0x443   :  { %3955 = vmatprep.subr.bf16.mxu1 %v5453_v27  ;;  %3998 = vmatprep.subr.bf16.mxu0 %v5456_v28  ;;  %v5529_v25 = vld [vmem:[%s7314_s9 + $0x278] ss:$28 sps:$4 sm:$0xff]   ;;  %v5537_v28 = vld [vmem:[%s7314_s9 + $0x244] ss:$28 sps:$4 sm:$0xff]  }
 0x444   :  { %v5532_v27 = vld [vmem:[%s7314_s9 + $0x5f8] ss:$28 sps:$4 sm:$0xff]  }
 0x446   :  { %3956 = vmatpush2.bf16.msra.mxu1 %v5451_v29  ;;  %3999 = vmatpush2.bf16.msra.mxu0 %v5454_v30  ;;  %v5540_v29 = vld [vmem:[%s7314_s9 + $0x5c4] ss:$28 sps:$4 sm:$0xff]  }
 0x447   :  { %4011 = vmatprep.subr.bf16.mxu1 %v5459_v31  ;;  %4054 = vmatprep.subr.bf16.mxu0 %v5462_v32  ;;  %v5535_v30 = vld [vmem:[%s7314_s9 + $0x240] ss:$28 sps:$4 sm:$0xff]   ;;  %v5543_v32 = vld [vmem:[%s7314_s9 + $0x20c] ss:$28 sps:$4 sm:$0xff]  }
 0x448   :  { %v5538_v31 = vld [vmem:[%s7314_s9 + $0x5c0] ss:$28 sps:$4 sm:$0xff]  }
 0x449   :  { %3958 = vmatmul.mubr.bf16.vlgmr.msra.gmra.mxu1 %v6795_v22  ;;  %4001 = vmatmul.mubr.bf16.vlgmr.msra.gmra.mxu0 %v6797_v24 }
 0x44a   :  { %4012 = vmatpush1.bf16.msra.mxu1 %v5457_v33  ;;  %4043 = vmatprep.mubr.bf16.mxu1 %v6785_v21  ;;  %v5546_v33 = vld [vmem:[%s7314_s9 + $0x58c] ss:$28 sps:$4 sm:$0xff]  }
 0x44b   :  { %4055 = vmatpush1.bf16.msra.mxu0 %v5460_v34  ;;  %4086 = vmatprep.mubr.bf16.mxu0 %v6787_v18  ;;  %v5541_v34 = vld [vmem:[%s7314_s9 + $0x208] ss:$28 sps:$4 sm:$0xff]  }
 0x44c   :  { %4013 = vmatprep.subr.bf16.mxu1 %v5465_v35  ;;  %4056 = vmatprep.subr.bf16.mxu0 %v5468_v36  ;;  %v5544_v35 = vld [vmem:[%s7314_s9 + $0x588] ss:$28 sps:$4 sm:$0xff]   ;;  %v5549_v36 = vld [vmem:[%s7314_s9 + $0x1d4] ss:$28 sps:$4 sm:$0xff]  }
 0x44e   :  { %4014 = vmatpush1.bf16.msra.mxu1 %v5463_v37  ;;  %v5552_v37 = vld [vmem:[%s7314_s9 + $0x554] ss:$28 sps:$4 sm:$0xff]  }
 0x44f   :  { %4057 = vmatpush1.bf16.msra.mxu0 %v5466_v38  ;;  %4015 = vmatprep.subr.bf16.mxu1 %v5471_v39  ;;  %v5547_v38 = vld [vmem:[%s7314_s9 + $0x1d0] ss:$28 sps:$4 sm:$0xff]  }
 0x450   :  { %4058 = vmatprep.subr.bf16.mxu0 %v5474_v13  ;;  %v5550_v39 = vld [vmem:[%s7314_s9 + $0x550] ss:$28 sps:$4 sm:$0xff]   ;;  %v5553_v13 = vld [vmem:[%s7314_s9 + $0x360] ss:$28 sps:$4 sm:$0xff]  }
 0x452   :  { %4016 = vmatpush1.bf16.msra.mxu1 %v5469_v54  ;;  %v5554_v54 = vld [vmem:[%s7314_s9 + $0x6e0] ss:$28 sps:$4 sm:$0xff]  }
 0x453   :  { %4059 = vmatpush1.bf16.msra.mxu0 %v5472_v40  ;;  %4017 = vmatprep.subr.bf16.mxu1 %v5477_v41  ;;  %v5555_v40 = vld [vmem:[%s7314_s9 + $0x1a0] ss:$28 sps:$4 sm:$0xff]  }
 0x454   :  { %4060 = vmatprep.subr.bf16.mxu0 %v5480_v42  ;;  %v5556_v41 = vld [vmem:[%s7314_s9 + $0x520] ss:$28 sps:$4 sm:$0xff]   ;;  %v5557_v42 = vld [vmem:[%s7314_s9 + $0x328] ss:$28 sps:$4 sm:$0xff]  }
 0x456   :  { %4018 = vmatpush1.bf16.msra.mxu1 %v5475_v26  ;;  %v5558_v26 = vld [vmem:[%s7314_s9 + $0x6a8] ss:$28 sps:$4 sm:$0xff]  }
 0x457   :  { %4061 = vmatpush1.bf16.msra.mxu0 %v5478_v12  ;;  %4019 = vmatprep.subr.bf16.mxu1 %v5483_v43  ;;  %v5559_v12 = vld [vmem:[%s7314_s9 + $0x168] ss:$28 sps:$4 sm:$0xff]  }
 0x458   :  { %4062 = vmatprep.subr.bf16.mxu0 %v5486_v45  ;;  %v5560_v43 = vld [vmem:[%s7314_s9 + $0x4e8] ss:$28 sps:$4 sm:$0xff]   ;;  %v5561_v45 = vld [vmem:[%s7314_s9 + $0x2f0] ss:$28 sps:$4 sm:$0xff]  }
 0x45a   :  { %4020 = vmatpush1.bf16.msra.mxu1 %v5481_v46  ;;  %v5562_v46 = vld [vmem:[%s7314_s9 + $0x670] ss:$28 sps:$4 sm:$0xff]  }
 0x45b   :  { %4063 = vmatpush1.bf16.msra.mxu0 %v5484_v23  ;;  %4021 = vmatprep.subr.bf16.mxu1 %v5489_v44  ;;  %v5564_v23 = vld [vmem:[%s7314_s9 + $0x4b0] ss:$28 sps:$4 sm:$0xff]   ;;  %v5566_v44 = vld [vmem:[%s7314_s9 + $0x638] ss:$28 sps:$4 sm:$0xff]  }
 0x45c   :  { %4064 = vmatprep.subr.bf16.mxu0 %v5492_v47  ;;  %v5567_v47 = vld [vmem:[%s7314_s9 + $0xf8] ss:$28 sps:$4 sm:$0xff]  }
 0x45e   :  { %4022 = vmatpush1.bf16.msra.mxu1 %v5487_v48  ;;  %v5568_v48 = vld [vmem:[%s7314_s9 + $0x478] ss:$28 sps:$4 sm:$0xff]  }
 0x45f   :  { %4065 = vmatpush1.bf16.msra.mxu0 %v5490_v51  ;;  %4023 = vmatprep.subr.bf16.mxu1 %v5495_v52  ;;  %v5569_v51 = vld [vmem:[%s7314_s9 + $0x280] ss:$28 sps:$4 sm:$0xff]  }
 0x460   :  { %4066 = vmatprep.subr.bf16.mxu0 %v5498_v53  ;;  %v5570_v52 = vld [vmem:[%s7314_s9 + $0x600] ss:$28 sps:$4 sm:$0xff]  }
 0x461   :  { %v5571_v53 = vld [vmem:[%s7314_s9 + $0xc0] ss:$28 sps:$4 sm:$0xff]  }
 0x462   :  { %4024 = vmatpush1.bf16.msra.mxu1 %v5493_v55  ;;  %v5572_v55 = vld [vmem:[%s7314_s9 + $0x440] ss:$28 sps:$4 sm:$0xff]  }
 0x463   :  { %4067 = vmatpush1.bf16.msra.mxu0 %v5496_v56  ;;  %4025 = vmatprep.subr.bf16.mxu1 %v5501_v57  ;;  %v5573_v56 = vld [vmem:[%s7314_s9 + $0x248] ss:$28 sps:$4 sm:$0xff]  }
 0x464   :  { %4068 = vmatprep.subr.bf16.mxu0 %v5504_v58  ;;  %v5574_v57 = vld [vmem:[%s7314_s9 + $0x5c8] ss:$28 sps:$4 sm:$0xff]  }
 0x465   :  { %v5575_v58 = vld [vmem:[%s7314_s9 + $0x88] ss:$28 sps:$4 sm:$0xff]  }
 0x466   :  { %4026 = vmatpush1.bf16.msra.mxu1 %v5499_v59  ;;  %v5576_v59 = vld [vmem:[%s7314_s9 + $0x408] ss:$28 sps:$4 sm:$0xff]  }
 0x467   :  { %4069 = vmatpush1.bf16.msra.mxu0 %v5502_v60  ;;  %4027 = vmatprep.subr.bf16.mxu1 %v5507_v61  ;;  %v5577_v60 = vld [vmem:[%s7314_s9 + $0x210] ss:$28 sps:$4 sm:$0xff]  }
 0x468   :  { %4070 = vmatprep.subr.bf16.mxu0 %v5510_v62  ;;  %v5578_v61 = vld [vmem:[%s7314_s9 + $0x590] ss:$28 sps:$4 sm:$0xff]  }
 0x469   :  { %v5579_v62 = vld [vmem:[%s7314_s9 + $0x50] ss:$28 sps:$4 sm:$0xff]  }
 0x46a   :  { %4028 = vmatpush2.bf16.msra.mxu1 %v5505_v63  ;;  %v5580_v63 = vld [vmem:[%s7314_s9 + $0x3d0] ss:$28 sps:$4 sm:$0xff]  }
 0x46b   :  { %4071 = vmatpush2.bf16.msra.mxu0 %v5508_v0  ;;  %4029 = vmatprep.subr.bf16.mxu1 %v5513_v1  ;;  %v5581_v0 = vld [vmem:[%s7314_s9 + $0x1d8] ss:$28 sps:$4 sm:$0xff]  }
 0x46c   :  { %4072 = vmatprep.subr.bf16.mxu0 %v5516_v3  ;;  %v5582_v1 = vld [vmem:[%s7314_s9 + $0x558] ss:$28 sps:$4 sm:$0xff]  }
 0x46d   :  { %v5583_v3 = vld [vmem:[%s7314_s9 + $0x18] ss:$28 sps:$4 sm:$0xff]  }
 0x46e   :  { %4030 = vmatpush2.bf16.msra.mxu1 %v5511_v4  ;;  %v5584_v4 = vld [vmem:[%s7314_s9 + $0x398] ss:$28 sps:$4 sm:$0xff]  }
 0x46f   :  { %4073 = vmatpush2.bf16.msra.mxu0 %v5514_v7  ;;  %4031 = vmatprep.subr.bf16.mxu1 %v5519_v9  ;;  %v7286_v7 = vld [vmem:[%s7315_s10] sm:$0x7f] }
 0x470   :  { %4074 = vmatprep.subr.bf16.mxu0 %v5522_v10  ;;  %v2655_v9 = vrot.slane %v7286_v7, %v6437_v6  ;;  %v2659_v10 = vrot.slane %v7286_v7, %v6434_v5  ;;  %v2663_v5 = vrot.slane %v7286_v7, %v6448_v50 }
 0x472   :  { %4032 = vmatpush2.bf16.msra.mxu1 %v5517_v11 }
 0x473   :  { %4075 = vmatpush2.bf16.msra.mxu0 %v5520_v14  ;;  %4033 = vmatprep.subr.bf16.mxu1 %v5525_v15 }
 0x474   :  { %4076 = vmatprep.subr.bf16.mxu0 %v5528_v16 }
 0x476   :  { %4034 = vmatpush2.bf16.msra.mxu1 %v5523_v17 }
 0x477   :  { %4077 = vmatpush2.bf16.msra.mxu0 %v5526_v8  ;;  %4035 = vmatprep.subr.bf16.mxu1 %v5531_v19 }
 0x478   :  { %4078 = vmatprep.subr.bf16.mxu0 %v5534_v20 }
 0x47a   :  { %4036 = vmatpush2.bf16.msra.mxu1 %v5529_v25 }
 0x47b   :  { %4079 = vmatpush2.bf16.msra.mxu0 %v5532_v27  ;;  %4037 = vmatprep.subr.bf16.mxu1 %v5537_v28 }
 0x47c   :  { %4080 = vmatprep.subr.bf16.mxu0 %v5540_v29 }
 0x47e   :  { %4038 = vmatpush2.bf16.msra.mxu1 %v5535_v30 }
 0x47f   :  { %4081 = vmatpush2.bf16.msra.mxu0 %v5538_v31  ;;  %4039 = vmatprep.subr.bf16.mxu1 %v5543_v32 }
 0x480   :  { %4082 = vmatprep.subr.bf16.mxu0 %v5546_v33  ;;  %v2667_v33 = vrot.slane %v7286_v7, %v6445_v49  ;;  %v2670_v49 = vsub.s32 4, %v6431_v2 }
 0x482   :  { %4040 = vmatpush2.bf16.msra.mxu1 %v5541_v34 }
 0x483   :  { %4083 = vmatpush2.bf16.msra.mxu0 %v5544_v35  ;;  %4041 = vmatprep.subr.bf16.mxu1 %v5549_v36 }
 0x484   :  { %4084 = vmatprep.subr.bf16.mxu0 %v5552_v37 }
 0x486   :  { %4042 = vmatpush2.bf16.msra.mxu1 %v5547_v38 }
 0x487   :  { %4085 = vmatpush2.bf16.msra.mxu0 %v5550_v39  ;;  %4813 = vmatprep.subr.bf16.mxu1 %v5553_v13 }
 0x488   :  { %4835 = vmatprep.subr.bf16.mxu0 %v5554_v54 }
 0x489   :  { %4044 = vmatmul.mubr.bf16.vlgmr.msra.gmra.mxu1 %v6795_v22 }
 0x48a   :  { %4087 = vmatmul.mubr.bf16.vlgmr.msra.gmra.mxu0 %v6797_v24  ;;  %4814 = vmatpush3.bf16.msra.mxu1 %v5555_v40 }
 0x48b   :  { %4129 = vmatprep.mubr.bf16.mxu1 %v6785_v21  ;;  %4836 = vmatpush3.bf16.msra.mxu0 %v5556_v41  ;;  %v5563_v21 = vld [vmem:[%s7314_s9 + $0x130] ss:$28 sps:$4 sm:$0xff]  }
 0x48c   :  { %4170 = vmatprep.mubr.bf16.mxu0 %v6787_v18  ;;  %4815 = vmatprep.subr.bf16.mxu1 %v5557_v42  ;;  %v5565_v18 = vld [vmem:[%s7314_s9 + $0x2b8] ss:$28 sps:$4 sm:$0xff]   ;;  %s5610_s9 = smov [#allocation2]  }
 0x48d   :  { %4837 = vmatprep.subr.bf16.mxu0 %v5558_v26  ;;  %s4237_s10 = sshll.u32 %s5610_s9, 4  ;;  %s4238_s10 = int_to_ptr.vmem [resolvable:$true] %s4237_s10 }
 0x48e   :  { %4816 = vmatpush3.bf16.msra.mxu1 %v5559_v12  ;;  %s5585_s28 = scalar_lea.vmem %s4238_s10, 896  ;;  %p5590_p1 = scmp.lt.s32.totalorder %s4238_s10, %s4238_s10 }
 0x48f   :  { %4838 = vmatpush3.bf16.msra.mxu0 %v5560_v43  ;;  %4817 = vmatprep.subr.bf16.mxu1 %v5561_v45  ;;  %p5586_p0 = scmp.ne.s32.totalorder %s4238_s10, %s5585_s28  ;;  %p5591_p2 = scmp.lt.s32.totalorder %s5585_s28, %s5585_s28 }
 0x490   :  { %4839 = vmatprep.subr.bf16.mxu0 %v5562_v46 }
 0x491   :  { %p5592_p3 = por %p5591_p2, %p5590_p1 }
 0x492   :  { %4818 = vmatpush3.bf16.msra.mxu1 %v5563_v21 }
 0x493   :  { %4840 = vmatpush3.bf16.msra.mxu0 %v5564_v23  ;;  %4819 = vmatprep.subr.bf16.mxu1 %v5565_v18  ;;  %v2674_v23 = vsub.s32 5, %v6431_v2  ;;  %v2671_v18 = vrot.slane %v7286_v7, %v2670_v49  ;;  %p5593_p4 = pnand %p5592_p3, %p5586_p0 }
 0x494   :  { %4841 = vmatprep.subr.bf16.mxu0 %v5566_v44 }
 0x495   :  { %v2675_v44 = vrot.slane %v7286_v7, %v2674_v23 }
 0x496   :  { %4820 = vmatpush3.bf16.msra.mxu1 %v5567_v47 }
 0x497   :  { %4842 = vmatpush3.bf16.msra.mxu0 %v5568_v48  ;;  %4821 = vmatprep.subr.bf16.mxu1 %v5569_v51 }
 0x498   :  { %4843 = vmatprep.subr.bf16.mxu0 %v5570_v52 }
 0x49a   :  { %4822 = vmatpush3.bf16.msra.mxu1 %v5571_v53 }
 0x49b   :  { %4844 = vmatpush3.bf16.msra.mxu0 %v5572_v55  ;;  %4823 = vmatprep.subr.bf16.mxu1 %v5573_v56 }
 0x49c   :  { %4845 = vmatprep.subr.bf16.mxu0 %v5574_v57 }
 0x49e   :  { %4824 = vmatpush3.bf16.msra.mxu1 %v5575_v58 }
 0x49f   :  { %4846 = vmatpush3.bf16.msra.mxu0 %v5576_v59  ;;  %4825 = vmatprep.subr.bf16.mxu1 %v5577_v60 }
 0x4a0   :  { %4847 = vmatprep.subr.bf16.mxu0 %v5578_v61 }
 0x4a2   :  { %4826 = vmatpush3.bf16.msra.mxu1 %v5579_v62 }
 0x4a3   :  { %4848 = vmatpush3.bf16.msra.mxu0 %v5580_v63  ;;  %4827 = vmatprep.subr.bf16.mxu1 %v5581_v0 }
 0x4a4   :  { %4849 = vmatprep.subr.bf16.mxu0 %v5582_v1 }
 0x4a6   :  { %4828 = vmatpush3.bf16.msra.mxu1 %v5583_v3 }
 0x4a7   :  { %4850 = vmatpush3.bf16.msra.mxu0 %v5584_v4 }
 0x4a9   :  { %4130 = vmatmul.mubr.bf16.vlgmr.msra.gmra.mxu1 %v6795_v22 }
 0x4aa   :  { %4171 = vmatmul.mubr.bf16.vlgmr.msra.gmra.mxu0 %v6797_v24 }
 0x4c9   :  { %v3873_v11 = vpop.f32.mrf.mxu1  ;;  %v3916_v14 = vpop.f32.mrf.mxu0 }
 0x4ca   :  { %v3874_v15 = vadd.f32 %v3873_v11, %v2655_v9 }
 0x4cb   :  { %v3875_v16 = vpop.f32.mrf.mxu1  ;;  %v3918_v17 = vpop.f32.mrf.mxu0 }
 0x4cc   :  { %v3876_v8 = vadd.f32 %v3875_v16, %v2659_v10  ;;  %v3917_v24 = vadd.f32 %v3916_v14, %v3874_v15 }
 0x4cd   :  { %v3877_v22 = vpop.f32.mrf.mxu1  ;;  %v3920_v19 = vpop.f32.mrf.mxu0 }
 0x4ce   :  { %v3919_v20 = vadd.f32 %v3918_v17, %v3876_v8  ;;  %v3878_v25 = vadd.f32 %v3877_v22, %v2655_v9  ;;  %v2678_v9 = vsub.s32 6, %v6431_v2 }
 0x4cf   :  { %v3879_v27 = vpop.f32.mrf.mxu1  ;;  %v3922_v30 = vpop.f32.mrf.mxu0 }
 0x4d0   :  { %v4752_v28 = vpack.c.bf16 %v3919_v20, %v3917_v24  ;;  %v3880_v29 = vadd.f32 %v3879_v27, %v2659_v10  ;;  %v3921_v6 = vadd.f32 %v3920_v19, %v3878_v25  ;;  %v2679_v14 = vrot.slane %v7286_v7, %v2678_v9 }
 0x4d2   :  { %4223 = vst [vmem:[#allocation2] sm:$0xff] %v4752_v28  ;;  %v3923_v31 = vadd.f32 %v3922_v30, %v3880_v29 }
 0x4d4   :  { %v4756_v32 = vpack.c.bf16 %v3923_v31, %v3921_v6 }
 0x4d6   :  { %4228 = vst [vmem:[#allocation2 + $0x1c] sm:$0xff] %v4756_v32 }
 0x509   :  { %v3959_v34 = vpop.f32.mrf.mxu1  ;;  %v4002_v35 = vpop.f32.mrf.mxu0 }
 0x50a   :  { %v3960_v36 = vadd.f32 %v3959_v34, %v2663_v5 }
 0x50b   :  { %v3961_v37 = vpop.f32.mrf.mxu1  ;;  %v4004_v38 = vpop.f32.mrf.mxu0 }
 0x50c   :  { %v3962_v39 = vadd.f32 %v3961_v37, %v2667_v33  ;;  %v4003_v40 = vadd.f32 %v4002_v35, %v3960_v36 }
 0x50d   :  { %v3963_v13 = vpop.f32.mrf.mxu1  ;;  %v4006_v54 = vpop.f32.mrf.mxu0 }
 0x50e   :  { %v4005_v41 = vadd.f32 %v4004_v38, %v3962_v39  ;;  %v3964_v42 = vadd.f32 %v3963_v13, %v2663_v5 }
 0x50f   :  { %v3965_v26 = vpop.f32.mrf.mxu1  ;;  %v4008_v45 = vpop.f32.mrf.mxu0 }
 0x510   :  { %v4753_v12 = vpack.c.bf16 %v4005_v41, %v4003_v40  ;;  %v3966_v43 = vadd.f32 %v3965_v26, %v2667_v33  ;;  %v4007_v50 = vadd.f32 %v4006_v54, %v3964_v42 }
 0x512   :  { %4224 = vst [vmem:[#allocation2 + $0x8] sm:$0xff] %v4753_v12  ;;  %v4009_v46 = vadd.f32 %v4008_v45, %v3966_v43 }
 0x514   :  { %v4757_v21 = vpack.c.bf16 %v4009_v46, %v4007_v50 }
 0x516   :  { %4229 = vst [vmem:[#allocation2 + $0x24] sm:$0xff] %v4757_v21 }
 0x549   :  { %v4045_v47 = vpop.f32.mrf.mxu1 }
 0x54a   :  { %v4046_v48 = vadd.f32 %v4045_v47, %v2671_v18  ;;  %v4088_v51 = vpop.f32.mrf.mxu0 }
 0x54b   :  { %v4047_v52 = vpop.f32.mrf.mxu1 }
 0x54c   :  { %v4048_v53 = vadd.f32 %v4047_v52, %v2675_v44  ;;  %v4090_v55 = vpop.f32.mrf.mxu0  ;;  %v4089_v57 = vadd.f32 %v4088_v51, %v4046_v48 }
 0x54d   :  { %v4049_v56 = vpop.f32.mrf.mxu1 }
 0x54e   :  { %v4091_v58 = vadd.f32 %v4090_v55, %v4048_v53  ;;  %v4050_v59 = vadd.f32 %v4049_v56, %v2671_v18  ;;  %v4092_v60 = vpop.f32.mrf.mxu0 }
 0x54f   :  { %v4051_v61 = vpop.f32.mrf.mxu1 }
 0x550   :  { %v4754_v62 = vpack.c.bf16 %v4091_v58, %v4089_v57  ;;  %v4052_v63 = vadd.f32 %v4051_v61, %v2675_v44  ;;  %v4094_v0 = vpop.f32.mrf.mxu0  ;;  %v4093_v1 = vadd.f32 %v4092_v60, %v4050_v59 }
 0x552   :  { %4225 = vst [vmem:[#allocation2 + $0x10] sm:$0xff] %v4754_v62  ;;  %v4095_v3 = vadd.f32 %v4094_v0, %v4052_v63 }
 0x554   :  { %v4758_v4 = vpack.c.bf16 %v4095_v3, %v4093_v1 }
 0x556   :  { %4230 = vst [vmem:[#allocation2 + $0x2c] sm:$0xff] %v4758_v4 }
 0x569   :  { %v4829_v10 = vpop.f32.mrf.mxu1 }
 0x56a   :  { %v4851_v11 = vpop.f32.mrf.mxu0 }
 0x56b   :  { %v4830_v15 = vpop.f32.mrf.mxu1 }
 0x56c   :  { %v4831_v16 = vadd.f32 %v4830_v15, %v4829_v10  ;;  %v4852_v17 = vpop.f32.mrf.mxu0 }
 0x56d   :  { %v4832_v8 = vpop.f32.mrf.mxu1  ;;  %v4853_v19 = vadd.f32 %v4852_v17, %v4851_v11 }
 0x56e   :  { %v4132_v22 = vadd.f32 %v4831_v16, %v2679_v14  ;;  %v4854_v24 = vpop.f32.mrf.mxu0 }
 0x56f   :  { %v4833_v20 = vpop.f32.mrf.mxu1 }
 0x570   :  { %v4173_v25 = vadd.f32 %v4853_v19, %v4132_v22  ;;  %v4834_v27 = vadd.f32 %v4833_v20, %v4832_v8  ;;  %v4855_v28 = vpop.f32.mrf.mxu0 }
 0x571   :  { %v4856_v6 = vadd.f32 %v4855_v28, %v4854_v24 }
 0x572   :  { %v4755_v29 = vpack.c.bf16 %v4173_v25, %v4173_v25  ;;  %v4135_v30 = vadd.f32 %v4834_v27, %v2679_v14 }
 0x574   :  { %4227 = vst.msk [vmem:[#allocation2 + $0x18] sm:$0xf] %vm4226_vm2, %v4755_v29  ;;  %v4176_v2 = vadd.f32 %v4856_v6, %v4135_v30 }
 0x576   :  { %v4759_v7 = vpack.c.bf16 %v4176_v2, %v4176_v2 }
 0x578   :  { %4231 = vst.msk [vmem:[#allocation2 + $0x34] sm:$0xf] %vm4226_vm2, %v4759_v7 }
 0x579   :  { %5596 = shalt.err (!%p5593_p4)
}
 0x57a   :  { %s5611_s29 = smov 448   ;;  %s5612_s6 = smov 28  }
 0x57b   :  { %4243 = dma.vmem_to_hbm [thread:$0]  %s4238_s10, 896, %s7316_s11, [#allocation3], %s5611_s29, %s5611_s29, %s5612_s6  }
 0x57c   :  { %5605 = dma.done.wait [#allocation3], 896  }
 0x57d   :  { %5606 = vsyncadd [#allocation3], 4294966400 }
 0x57e   :  { %4247 = vsyncpa [#allocation3], 1 }

// kernel: tpu_custom_call.1
= control target key start
LH: loop header
LB: loop body
LE: loop exit
PB: predicated region body
PF: predicated region fallthrough
CT: control target
= control target key end

     0   :  { %vm1259_vm0 = vcmask 130048   ;;  %s7305_s0 = inlined_call_operand.vmem [shape: f32[16,784], index: 0, kind: input, shape index: {}]   ;;  %s7306_s1 = inlined_call_operand.vmem [shape: bf16[784,512], index: 1, kind: input, shape index: {}]   ;;  %s7307_s2 = inlined_call_operand.vmem [shape: f32[1,512], index: 2, kind: input, shape index: {}]   ;;  %s7308_s3 = inlined_call_operand.vmem [shape: bf16[512,128], index: 3, kind: input, shape index: {}]   ;;  %s7309_s4 = inlined_call_operand.vmem [shape: f32[1,128], index: 4, kind: input, shape index: {}]   ;;  %s7310_s5 = inlined_call_operand.vmem [shape: bf16[128,128], index: 5, kind: input, shape index: {}]   ;;  %s7311_s6 = inlined_call_operand.vmem [shape: f32[1,128], index: 6, kind: input, shape index: {}]   ;;  %s7312_s7 = inlined_call_operand.vmem [shape: bf16[128,512], index: 7, kind: input, shape index: {}]   ;;  %s7313_s8 = inlined_call_operand.vmem [shape: f32[1,512], index: 8, kind: input, shape index: {}]   ;;  %s7314_s9 = inlined_call_operand.vmem [shape: bf16[512,784], index: 9, kind: input, shape index: {}]   ;;  %s7315_s10 = inlined_call_operand.vmem [shape: f32[1,784], index: 10, kind: input, shape index: {}]   ;;  %s7316_s11 = inlined_call_operand.hbm [shape: bf16[16,784], index: 11, kind: output, shape index: {}]  }
   0x1   :  { %v4883_v0 = vld [vmem:[%s7306_s1 + $0xe4] ss:$16 sps:$4 sm:$0xff]   ;;  %v4887_v2 = vld [vmem:[%s7306_s1 + $0xe0] ss:$16 sps:$4 sm:$0xff]   ;;  %v41_v46 = vld [vmem:[%s7305_s0 + $0x8] sm:$0xff] }
   0x2   :  { %v4885_v1 = vld [vmem:[%s7306_s1 + $0x2e4] ss:$16 sps:$4 sm:$0xff]   ;;  %1263 = vmatprep.subr.bf16.mxu0 %v4883_v0  ;;  %v4888_v3 = vld [vmem:[%s7306_s1 + $0x2e0] ss:$16 sps:$4 sm:$0xff]   ;;  %v43_v48 = vld [vmem:[%s7305_s0 + $0x18] sm:$0xff] }
   0x3   :  { %1306 = vmatprep.subr.bf16.mxu1 %v4885_v1  ;;  %v4889_v4 = vld [vmem:[%s7306_s1 + $0xc4] ss:$16 sps:$4 sm:$0xff]   ;;  %1264 = vmatpush1.bf16.msra.mxu0 %v4887_v2  ;;  %v4893_v6 = vld [vmem:[%s7306_s1 + $0xc0] ss:$16 sps:$4 sm:$0xff]  }
   0x4   :  { %1307 = vmatpush1.bf16.msra.mxu1 %v4888_v3  ;;  %v4891_v5 = vld [vmem:[%s7306_s1 + $0x2c4] ss:$16 sps:$4 sm:$0xff]   ;;  %1265 = vmatprep.subr.bf16.mxu0 %v4889_v4  ;;  %v4894_v7 = vld [vmem:[%s7306_s1 + $0x2c0] ss:$16 sps:$4 sm:$0xff]  }
   0x5   :  { %1308 = vmatprep.subr.bf16.mxu1 %v4891_v5  ;;  %v4895_v8 = vld [vmem:[%s7306_s1 + $0xa4] ss:$16 sps:$4 sm:$0xff]   ;;  %v4899_v10 = vld [vmem:[%s7306_s1 + $0xa0] ss:$16 sps:$4 sm:$0xff]  }
   0x6   :  { %v4897_v9 = vld [vmem:[%s7306_s1 + $0x2a4] ss:$16 sps:$4 sm:$0xff]   ;;  %v4900_v11 = vld [vmem:[%s7306_s1 + $0x2a0] ss:$16 sps:$4 sm:$0xff]  }
   0x7   :  { %1266 = vmatpush1.bf16.msra.mxu0 %v4893_v6  ;;  %v4901_v12 = vld [vmem:[%s7306_s1 + $0x84] ss:$16 sps:$4 sm:$0xff]   ;;  %v4905_v14 = vld [vmem:[%s7306_s1 + $0x80] ss:$16 sps:$4 sm:$0xff]  }
   0x8   :  { %1309 = vmatpush1.bf16.msra.mxu1 %v4894_v7  ;;  %1267 = vmatprep.subr.bf16.mxu0 %v4895_v8  ;;  %v4903_v13 = vld [vmem:[%s7306_s1 + $0x284] ss:$16 sps:$4 sm:$0xff]   ;;  %v4906_v15 = vld [vmem:[%s7306_s1 + $0x280] ss:$16 sps:$4 sm:$0xff]   ;;  %v47_v7 = vld [vmem:[%s7305_s0 + $0x38] sm:$0xff] }
   0x9   :  { %1310 = vmatprep.subr.bf16.mxu1 %v4897_v9  ;;  %v4907_v16 = vld [vmem:[%s7306_s1 + $0x64] ss:$16 sps:$4 sm:$0xff]   ;;  %v4911_v18 = vld [vmem:[%s7306_s1 + $0x60] ss:$16 sps:$4 sm:$0xff]   ;;  %v49_v9 = vld [vmem:[%s7305_s0 + $0x48] sm:$0xff] }
   0xa   :  { %v4909_v17 = vld [vmem:[%s7306_s1 + $0x264] ss:$16 sps:$4 sm:$0xff]   ;;  %v4912_v19 = vld [vmem:[%s7306_s1 + $0x260] ss:$16 sps:$4 sm:$0xff]  }
   0xb   :  { %1268 = vmatpush1.bf16.msra.mxu0 %v4899_v10  ;;  %v4913_v20 = vld [vmem:[%s7306_s1 + $0x44] ss:$16 sps:$4 sm:$0xff]   ;;  %v4917_v22 = vld [vmem:[%s7306_s1 + $0x40] ss:$16 sps:$4 sm:$0xff]  }
   0xc   :  { %1311 = vmatpush1.bf16.msra.mxu1 %v4900_v11  ;;  %1269 = vmatprep.subr.bf16.mxu0 %v4901_v12  ;;  %v4915_v21 = vld [vmem:[%s7306_s1 + $0x244] ss:$16 sps:$4 sm:$0xff]   ;;  %v4918_v23 = vld [vmem:[%s7306_s1 + $0x240] ss:$16 sps:$4 sm:$0xff]  }
   0xd   :  { %1312 = vmatprep.subr.bf16.mxu1 %v4903_v13  ;;  %v4919_v24 = vld [vmem:[%s7306_s1 + $0x24] ss:$16 sps:$4 sm:$0xff]   ;;  %v4923_v26 = vld [vmem:[%s7306_s1 + $0x20] ss:$16 sps:$4 sm:$0xff]  }
   0xe   :  { %v4921_v25 = vld [vmem:[%s7306_s1 + $0x224] ss:$16 sps:$4 sm:$0xff]   ;;  %v4924_v27 = vld [vmem:[%s7306_s1 + $0x220] ss:$16 sps:$4 sm:$0xff]  }
   0xf   :  { %1270 = vmatpush1.bf16.msra.mxu0 %v4905_v14  ;;  %v4925_v28 = vld [vmem:[%s7306_s1 + $0x4] ss:$16 sps:$4 sm:$0xff]   ;;  %v4929_v30 = vld [vmem:[%s7306_s1] ss:$16 sps:$4 sm:$0xff]  }
  0x10   :  { %1313 = vmatpush1.bf16.msra.mxu1 %v4906_v15  ;;  %1271 = vmatprep.subr.bf16.mxu0 %v4907_v16  ;;  %v4927_v29 = vld [vmem:[%s7306_s1 + $0x204] ss:$16 sps:$4 sm:$0xff]   ;;  %v4930_v31 = vld [vmem:[%s7306_s1 + $0x200] ss:$16 sps:$4 sm:$0xff]  }
  0x11   :  { %1314 = vmatprep.subr.bf16.mxu1 %v4909_v17  ;;  %v4931_v32 = vld [vmem:[%s7306_s1 + $0x1e4] ss:$16 sps:$4 sm:$0xff]   ;;  %v4935_v34 = vld [vmem:[%s7306_s1 + $0x1e0] ss:$16 sps:$4 sm:$0xff]   ;;  %v4990_v17 = vld [vmem:[%s7306_s1 + $0xec] ss:$16 sps:$4 sm:$0xff]  }
  0x12   :  { %v4933_v33 = vld [vmem:[%s7306_s1 + $0x3e4] ss:$16 sps:$4 sm:$0xff]   ;;  %v4936_v35 = vld [vmem:[%s7306_s1 + $0x3e0] ss:$16 sps:$4 sm:$0xff]  }
  0x13   :  { %1272 = vmatpush1.bf16.msra.mxu0 %v4911_v18  ;;  %v4937_v36 = vld [vmem:[%s7306_s1 + $0x1c4] ss:$16 sps:$4 sm:$0xff]   ;;  %v4941_v38 = vld [vmem:[%s7306_s1 + $0x1c0] ss:$16 sps:$4 sm:$0xff]  }
  0x14   :  { %1315 = vmatpush1.bf16.msra.mxu1 %v4912_v19  ;;  %1273 = vmatprep.subr.bf16.mxu0 %v4913_v20  ;;  %v4939_v37 = vld [vmem:[%s7306_s1 + $0x3c4] ss:$16 sps:$4 sm:$0xff]   ;;  %v4942_v39 = vld [vmem:[%s7306_s1 + $0x3c0] ss:$16 sps:$4 sm:$0xff]   ;;  %v53_v20 = vld [vmem:[%s7305_s0 + $0x68] sm:$0xff] }
  0x15   :  { %1316 = vmatprep.subr.bf16.mxu1 %v4915_v21  ;;  %v4943_v40 = vld [vmem:[%s7306_s1 + $0x1a4] ss:$16 sps:$4 sm:$0xff]   ;;  %v4947_v42 = vld [vmem:[%s7306_s1 + $0x1a0] ss:$16 sps:$4 sm:$0xff]   ;;  %v5607_v21 = vmov 0  }
  0x16   :  { %v4945_v41 = vld [vmem:[%s7306_s1 + $0x3a4] ss:$16 sps:$4 sm:$0xff]   ;;  %v4948_v43 = vld [vmem:[%s7306_s1 + $0x3a0] ss:$16 sps:$4 sm:$0xff]  }
  0x17   :  { %1274 = vmatpush1.bf16.msra.mxu0 %v4917_v22  ;;  %v4949_v44 = vld [vmem:[%s7306_s1 + $0x184] ss:$16 sps:$4 sm:$0xff]   ;;  %v4953_v50 = vld [vmem:[%s7306_s1 + $0x180] ss:$16 sps:$4 sm:$0xff]  }
  0x18   :  { %1317 = vmatpush1.bf16.msra.mxu1 %v4918_v23  ;;  %1275 = vmatprep.subr.bf16.mxu0 %v4919_v24  ;;  %v4951_v45 = vld [vmem:[%s7306_s1 + $0x384] ss:$16 sps:$4 sm:$0xff]   ;;  %v4954_v51 = vld [vmem:[%s7306_s1 + $0x380] ss:$16 sps:$4 sm:$0xff]   ;;  %v4988_v24 = vld [vmem:[%s7306_s1 + $0xe8] ss:$16 sps:$4 sm:$0xff]  }
  0x19   :  { %1318 = vmatprep.subr.bf16.mxu1 %v4921_v25  ;;  %v48_v47 = vld [vmem:[%s7305_s0 + $0x40] sm:$0xff]  ;;  %v50_v49 = vld [vmem:[%s7305_s0 + $0x50] sm:$0xff] }
  0x1a   :  { %v4955_v52 = vld [vmem:[%s7306_s1 + $0x164] ss:$16 sps:$4 sm:$0xff]   ;;  %v5832_v53 = vpack.c.bf16 %v48_v47, %v41_v46  ;;  %v5834_v54 = vpack.c.bf16 %v50_v49, %v43_v48  ;;  %v4959_v56 = vld [vmem:[%s7306_s1 + $0x160] ss:$16 sps:$4 sm:$0xff]   ;;  %v5018_v47 = vld [vmem:[%s7306_s1 + $0x48] ss:$16 sps:$4 sm:$0xff]  }
  0x1b   :  { %1276 = vmatpush1.bf16.msra.mxu0 %v4923_v26  ;;  %v4957_v55 = vld [vmem:[%s7306_s1 + $0x364] ss:$16 sps:$4 sm:$0xff]   ;;  %v4960_v57 = vld [vmem:[%s7306_s1 + $0x360] ss:$16 sps:$4 sm:$0xff]   ;;  %v4996_v26 = vld [vmem:[%s7306_s1 + $0xcc] ss:$16 sps:$4 sm:$0xff]  }
  0x1c   :  { %1319 = vmatpush1.bf16.msra.mxu1 %v4924_v27  ;;  %1277 = vmatprep.subr.bf16.mxu0 %v4925_v28  ;;  %v4961_v58 = vld [vmem:[%s7306_s1 + $0x144] ss:$16 sps:$4 sm:$0xff]   ;;  %v4965_v60 = vld [vmem:[%s7306_s1 + $0x140] ss:$16 sps:$4 sm:$0xff]   ;;  %v4994_v28 = vld [vmem:[%s7306_s1 + $0xc8] ss:$16 sps:$4 sm:$0xff]  }
  0x1d   :  { %1320 = vmatprep.subr.bf16.mxu1 %v4927_v29  ;;  %1295 = vmatprep.mubr.bf16.mxu0 %v5832_v53  ;;  %v4963_v59 = vld [vmem:[%s7306_s1 + $0x344] ss:$16 sps:$4 sm:$0xff]   ;;  %v4966_v61 = vld [vmem:[%s7306_s1 + $0x340] ss:$16 sps:$4 sm:$0xff]   ;;  %v5026_v49 = vld [vmem:[%s7306_s1 + $0x2c] ss:$16 sps:$4 sm:$0xff]  }
  0x1e   :  { %1338 = vmatprep.mubr.bf16.mxu1 %v5834_v54  ;;  %v4967_v62 = vld [vmem:[%s7306_s1 + $0x124] ss:$16 sps:$4 sm:$0xff]   ;;  %v4971_v0 = vld [vmem:[%s7306_s1 + $0x120] ss:$16 sps:$4 sm:$0xff]  }
  0x1f   :  { %1278 = vmatpush1.bf16.msra.mxu0 %v4929_v30  ;;  %v4969_v63 = vld [vmem:[%s7306_s1 + $0x324] ss:$16 sps:$4 sm:$0xff]   ;;  %v4972_v1 = vld [vmem:[%s7306_s1 + $0x320] ss:$16 sps:$4 sm:$0xff]   ;;  %v5002_v30 = vld [vmem:[%s7306_s1 + $0xac] ss:$16 sps:$4 sm:$0xff]  }
  0x20   :  { %1321 = vmatpush1.bf16.msra.mxu1 %v4930_v31  ;;  %1279 = vmatprep.subr.bf16.mxu0 %v4931_v32  ;;  %v4973_v2 = vld [vmem:[%s7306_s1 + $0x104] ss:$16 sps:$4 sm:$0xff]   ;;  %v4977_v4 = vld [vmem:[%s7306_s1 + $0x100] ss:$16 sps:$4 sm:$0xff]   ;;  %v5000_v32 = vld [vmem:[%s7306_s1 + $0xa8] ss:$16 sps:$4 sm:$0xff]  }
  0x21   :  { %1322 = vmatprep.subr.bf16.mxu1 %v4933_v33  ;;  %v4975_v3 = vld [vmem:[%s7306_s1 + $0x304] ss:$16 sps:$4 sm:$0xff]   ;;  %v4978_v5 = vld [vmem:[%s7306_s1 + $0x300] ss:$16 sps:$4 sm:$0xff]  }
  0x22   :  { %v40_v6 = vld [vmem:[%s7305_s0] sm:$0xff]  ;;  %v42_v8 = vld [vmem:[%s7305_s0 + $0x10] sm:$0xff] }
  0x23   :  { %1280 = vmatpush2.bf16.msra.mxu0 %v4935_v34  ;;  %v4981_v10 = vld [vmem:[%s7306_s1 + $0x4e4] ss:$16 sps:$4 sm:$0xff]   ;;  %v5901_v12 = vpack.c.bf16 %v47_v7, %v40_v6  ;;  %v5903_v13 = vpack.c.bf16 %v49_v9, %v42_v8  ;;  %v4979_v14 = vld [vmem:[%s7306_s1 + $0x4e0] ss:$16 sps:$4 sm:$0xff]   ;;  %v5008_v34 = vld [vmem:[%s7306_s1 + $0x8c] ss:$16 sps:$4 sm:$0xff]  }
  0x24   :  { %1323 = vmatpush2.bf16.msra.mxu1 %v4936_v35  ;;  %1281 = vmatprep.subr.bf16.mxu0 %v4937_v36  ;;  %v4984_v11 = vld [vmem:[%s7306_s1 + $0x604] ss:$16 sps:$4 sm:$0xff]   ;;  %v4982_v15 = vld [vmem:[%s7306_s1 + $0x600] ss:$16 sps:$4 sm:$0xff]   ;;  %v5006_v36 = vld [vmem:[%s7306_s1 + $0x88] ss:$16 sps:$4 sm:$0xff]  }
  0x25   :  { %1324 = vmatprep.subr.bf16.mxu1 %v4939_v37  ;;  %v4987_v16 = vld [vmem:[%s7306_s1 + $0x4c4] ss:$16 sps:$4 sm:$0xff]   ;;  %v4985_v18 = vld [vmem:[%s7306_s1 + $0x4c0] ss:$16 sps:$4 sm:$0xff]   ;;  %v5056_v6 = vld [vmem:[%s7306_s1 + $0x18c] ss:$16 sps:$4 sm:$0xff]  }
  0x26   :  { %v46_v19 = vld [vmem:[%s7305_s0 + $0x30] sm:$0xff]  ;;  %v5054_v8 = vld [vmem:[%s7306_s1 + $0x188] ss:$16 sps:$4 sm:$0xff]  }
  0x27   :  { %1282 = vmatpush2.bf16.msra.mxu0 %v4941_v38  ;;  %v4993_v22 = vld [vmem:[%s7306_s1 + $0x4a4] ss:$16 sps:$4 sm:$0xff]   ;;  %v5932_v23 = vpack.c.bf16 %v53_v20, %v46_v19  ;;  %v4991_v25 = vld [vmem:[%s7306_s1 + $0x4a0] ss:$16 sps:$4 sm:$0xff]   ;;  %v5014_v38 = vld [vmem:[%s7306_s1 + $0x6c] ss:$16 sps:$4 sm:$0xff]  }
  0x28   :  { %1325 = vmatpush2.bf16.msra.mxu1 %v4942_v39  ;;  %1283 = vmatprep.subr.bf16.mxu0 %v4943_v40  ;;  %v4999_v27 = vld [vmem:[%s7306_s1 + $0x484] ss:$16 sps:$4 sm:$0xff]   ;;  %v4997_v29 = vld [vmem:[%s7306_s1 + $0x480] ss:$16 sps:$4 sm:$0xff]   ;;  %v5012_v40 = vld [vmem:[%s7306_s1 + $0x68] ss:$16 sps:$4 sm:$0xff]  }
  0x29   :  { %1326 = vmatprep.subr.bf16.mxu1 %v4945_v41  ;;  %v5005_v31 = vld [vmem:[%s7306_s1 + $0x464] ss:$16 sps:$4 sm:$0xff]   ;;  %v5003_v33 = vld [vmem:[%s7306_s1 + $0x460] ss:$16 sps:$4 sm:$0xff]   ;;  %v45_v41 = vld [vmem:[%s7305_s0 + $0x28] sm:$0xff] }
  0x2a   :  { %v5011_v35 = vld [vmem:[%s7306_s1 + $0x444] ss:$16 sps:$4 sm:$0xff]   ;;  %v5009_v37 = vld [vmem:[%s7306_s1 + $0x440] ss:$16 sps:$4 sm:$0xff]  }
  0x2b   :  { %1284 = vmatpush2.bf16.msra.mxu0 %v4947_v42  ;;  %v5017_v39 = vld [vmem:[%s7306_s1 + $0x424] ss:$16 sps:$4 sm:$0xff]   ;;  %v5021_v48 = vld [vmem:[%s7306_s1 + $0x400] ss:$16 sps:$4 sm:$0xff]  }
  0x2c   :  { %1327 = vmatpush2.bf16.msra.mxu1 %v4948_v43  ;;  %1285 = vmatprep.subr.bf16.mxu0 %v4949_v44  ;;  %v52_v42 = vld [vmem:[%s7305_s0 + $0x60] sm:$0xff] }
  0x2d   :  { %1328 = vmatprep.subr.bf16.mxu1 %v4951_v45  ;;  %v5015_v43 = vld [vmem:[%s7306_s1 + $0x420] ss:$16 sps:$4 sm:$0xff]   ;;  %v5997_v44 = vpack.c.bf16 %v52_v42, %v45_v41  ;;  %v5020_v45 = vld [vmem:[%s7306_s1 + $0x4c] ss:$16 sps:$4 sm:$0xff]   ;;  %v5023_v46 = vld [vmem:[%s7306_s1 + $0x404] ss:$16 sps:$4 sm:$0xff]  }
  0x2e   :  { %v5059_v7 = vld [vmem:[%s7306_s1 + $0x544] ss:$16 sps:$4 sm:$0xff]   ;;  %v5057_v9 = vld [vmem:[%s7306_s1 + $0x540] ss:$16 sps:$4 sm:$0xff]   ;;  %v5101_v41 = vld [vmem:[%s7306_s1 + $0x26c] ss:$16 sps:$4 sm:$0xff]  }
  0x2f   :  { %1286 = vmatpush2.bf16.msra.mxu0 %v4953_v50  ;;  %v5029_v50 = vld [vmem:[%s7306_s1 + $0x5e4] ss:$16 sps:$4 sm:$0xff]   ;;  %v5069_v19 = vld [vmem:[%s7306_s1 + $0x500] ss:$16 sps:$4 sm:$0xff]   ;;  %v5096_v42 = vld [vmem:[%s7306_s1 + $0x4a8] ss:$16 sps:$4 sm:$0xff]  }
  0x30   :  { %1329 = vmatpush2.bf16.msra.mxu1 %v4954_v51  ;;  %1287 = vmatprep.subr.bf16.mxu0 %v4955_v52  ;;  %v5024_v51 = vld [vmem:[%s7306_s1 + $0x28] ss:$16 sps:$4 sm:$0xff]   ;;  %v5027_v52 = vld [vmem:[%s7306_s1 + $0x5e0] ss:$16 sps:$4 sm:$0xff]  }
  0x31   :  { %1330 = vmatprep.subr.bf16.mxu1 %v4957_v55  ;;  %v5035_v55 = vld [vmem:[%s7306_s1 + $0x5c4] ss:$16 sps:$4 sm:$0xff]  }
  0x32   :  { %v44_v20 = vld [vmem:[%s7305_s0 + $0x20] sm:$0xff] }
  0x33   :  { %1288 = vmatpush2.bf16.msra.mxu0 %v4959_v56  ;;  %v5030_v56 = vld [vmem:[%s7306_s1 + $0x8] ss:$16 sps:$4 sm:$0xff]  }
  0x34   :  { %1331 = vmatpush2.bf16.msra.mxu1 %v4960_v57  ;;  %1289 = vmatprep.subr.bf16.mxu0 %v4961_v58  ;;  %v5033_v57 = vld [vmem:[%s7306_s1 + $0x5c0] ss:$16 sps:$4 sm:$0xff]   ;;  %v5038_v58 = vld [vmem:[%s7306_s1 + $0x1ec] ss:$16 sps:$4 sm:$0xff]  }
  0x35   :  { %1332 = vmatprep.subr.bf16.mxu1 %v4963_v59  ;;  %v5041_v59 = vld [vmem:[%s7306_s1 + $0x5a4] ss:$16 sps:$4 sm:$0xff]  }
  0x37   :  { %1290 = vmatpush2.bf16.msra.mxu0 %v4965_v60  ;;  %v5036_v60 = vld [vmem:[%s7306_s1 + $0x1e8] ss:$16 sps:$4 sm:$0xff]  }
  0x38   :  { %1333 = vmatpush2.bf16.msra.mxu1 %v4966_v61  ;;  %1291 = vmatprep.subr.bf16.mxu0 %v4967_v62  ;;  %v5039_v61 = vld [vmem:[%s7306_s1 + $0x5a0] ss:$16 sps:$4 sm:$0xff]   ;;  %v5044_v62 = vld [vmem:[%s7306_s1 + $0x1cc] ss:$16 sps:$4 sm:$0xff]  }
  0x39   :  { %1334 = vmatprep.subr.bf16.mxu1 %v4969_v63  ;;  %v5047_v63 = vld [vmem:[%s7306_s1 + $0x584] ss:$16 sps:$4 sm:$0xff]  }
  0x3b   :  { %1292 = vmatpush2.bf16.msra.mxu0 %v4971_v0  ;;  %v5042_v0 = vld [vmem:[%s7306_s1 + $0x1c8] ss:$16 sps:$4 sm:$0xff]  }
  0x3c   :  { %1335 = vmatpush2.bf16.msra.mxu1 %v4972_v1  ;;  %1293 = vmatprep.subr.bf16.mxu0 %v4973_v2  ;;  %v5045_v1 = vld [vmem:[%s7306_s1 + $0x580] ss:$16 sps:$4 sm:$0xff]   ;;  %v5050_v2 = vld [vmem:[%s7306_s1 + $0x1ac] ss:$16 sps:$4 sm:$0xff]  }
  0x3d   :  { %1336 = vmatprep.subr.bf16.mxu1 %v4975_v3  ;;  %v5053_v3 = vld [vmem:[%s7306_s1 + $0x564] ss:$16 sps:$4 sm:$0xff]  }
  0x3f   :  { %1294 = vmatpush2.bf16.msra.mxu0 %v4977_v4  ;;  %v5048_v4 = vld [vmem:[%s7306_s1 + $0x1a8] ss:$16 sps:$4 sm:$0xff]  }
  0x40   :  { %1337 = vmatpush2.bf16.msra.mxu1 %v4978_v5  ;;  %1349 = vmatprep.subr.bf16.mxu0 %v4981_v10  ;;  %v5051_v5 = vld [vmem:[%s7306_s1 + $0x560] ss:$16 sps:$4 sm:$0xff]   ;;  %v5062_v10 = vld [vmem:[%s7306_s1 + $0x16c] ss:$16 sps:$4 sm:$0xff]  }
  0x41   :  { %1406 = vmatprep.subr.bf16.mxu1 %v4984_v11  ;;  %v5065_v11 = vld [vmem:[%s7306_s1 + $0x524] ss:$16 sps:$4 sm:$0xff]  }
  0x42   :  { %1296 = vmatmul.mubr.bf16.vlgmr.msra.gmra.mxu0 %v5901_v12 }
  0x43   :  { %1339 = vmatmul.mubr.bf16.vlgmr.msra.gmra.mxu1 %v5903_v13  ;;  %1350 = vmatpush1.bf16.msra.mxu0 %v4979_v14  ;;  %v5060_v14 = vld [vmem:[%s7306_s1 + $0x168] ss:$16 sps:$4 sm:$0xff]  }
  0x44   :  { %1407 = vmatpush1.bf16.msra.mxu1 %v4982_v15  ;;  %1351 = vmatprep.subr.bf16.mxu0 %v4987_v16  ;;  %v5063_v15 = vld [vmem:[%s7306_s1 + $0x520] ss:$16 sps:$4 sm:$0xff]   ;;  %v5068_v16 = vld [vmem:[%s7306_s1 + $0x14c] ss:$16 sps:$4 sm:$0xff]  }
  0x45   :  { %1424 = vmatprep.mubr.bf16.mxu1 %v5607_v21  ;;  %1435 = vmatprep.subr.bf16.mxu1 %v4990_v17  ;;  %v5071_v17 = vld [vmem:[%s7306_s1 + $0x504] ss:$16 sps:$4 sm:$0xff]  }
  0x46   :  { %1381 = vmatprep.mubr.bf16.mxu0 %v5997_v44 }
  0x47   :  { %1352 = vmatpush1.bf16.msra.mxu0 %v4985_v18  ;;  %v5066_v18 = vld [vmem:[%s7306_s1 + $0x148] ss:$16 sps:$4 sm:$0xff]  }
  0x48   :  { %1353 = vmatprep.subr.bf16.mxu0 %v4993_v22  ;;  %v51_v22 = vld [vmem:[%s7305_s0 + $0x58] sm:$0xff] }
  0x4b   :  { %4444 = vmatmul.mubr.msk.bf16.vlgmr.msra.gmra.mxu1 %vm1259_vm0, %v5932_v23  ;;  %1354 = vmatpush1.bf16.msra.mxu0 %v4991_v25  ;;  %v5077_v25 = vld [vmem:[%s7306_s1 + $0x2ec] ss:$16 sps:$4 sm:$0xff]  }
  0x4c   :  { %1436 = vmatpush1.bf16.msra.mxu1 %v4988_v24  ;;  %1355 = vmatprep.subr.bf16.mxu0 %v4999_v27  ;;  %v5074_v24 = vld [vmem:[%s7306_s1 + $0x12c] ss:$16 sps:$4 sm:$0xff]   ;;  %v5072_v27 = vld [vmem:[%s7306_s1 + $0x128] ss:$16 sps:$4 sm:$0xff]  }
  0x4d   :  { %1437 = vmatprep.subr.bf16.mxu1 %v4996_v26  ;;  %1467 = vmatprep.mubr.bf16.mxu1 %v5832_v53  ;;  %v5032_v53 = vld [vmem:[%s7306_s1 + $0xc] ss:$16 sps:$4 sm:$0xff]   ;;  %v6120_v26 = vpack.c.bf16 %v51_v22, %v44_v20  ;;  %v5156_v20 = vld [vmem:[%s7306_s1 + $0x568] ss:$16 sps:$4 sm:$0xff]  }
  0x4e   :  { %v5159_v22 = vld [vmem:[%s7306_s1 + $0x328] ss:$16 sps:$4 sm:$0xff]  }
  0x4f   :  { %1356 = vmatpush1.bf16.msra.mxu0 %v4997_v29  ;;  %v5080_v29 = vld [vmem:[%s7306_s1 + $0x10c] ss:$16 sps:$4 sm:$0xff]  }
  0x50   :  { %1438 = vmatpush1.bf16.msra.mxu1 %v4994_v28  ;;  %1357 = vmatprep.subr.bf16.mxu0 %v5005_v31  ;;  %v5075_v28 = vld [vmem:[%s7306_s1 + $0x2e8] ss:$16 sps:$4 sm:$0xff]  }
  0x51   :  { %1439 = vmatprep.subr.bf16.mxu1 %v5002_v30  ;;  %v5083_v30 = vld [vmem:[%s7306_s1 + $0x2cc] ss:$16 sps:$4 sm:$0xff]   ;;  %v5078_v31 = vld [vmem:[%s7306_s1 + $0x108] ss:$16 sps:$4 sm:$0xff]  }
  0x53   :  { %1358 = vmatpush1.bf16.msra.mxu0 %v5003_v33  ;;  %v5086_v33 = vld [vmem:[%s7306_s1 + $0x4ec] ss:$16 sps:$4 sm:$0xff]  }
  0x54   :  { %1440 = vmatpush1.bf16.msra.mxu1 %v5000_v32  ;;  %1359 = vmatprep.subr.bf16.mxu0 %v5011_v35  ;;  %v5081_v32 = vld [vmem:[%s7306_s1 + $0x2c8] ss:$16 sps:$4 sm:$0xff]  }
  0x55   :  { %1441 = vmatprep.subr.bf16.mxu1 %v5008_v34  ;;  %v5089_v34 = vld [vmem:[%s7306_s1 + $0x2ac] ss:$16 sps:$4 sm:$0xff]   ;;  %v5084_v35 = vld [vmem:[%s7306_s1 + $0x4e8] ss:$16 sps:$4 sm:$0xff]  }
  0x57   :  { %1360 = vmatpush1.bf16.msra.mxu0 %v5009_v37  ;;  %v5092_v37 = vld [vmem:[%s7306_s1 + $0x4cc] ss:$16 sps:$4 sm:$0xff]  }
  0x58   :  { %1442 = vmatpush1.bf16.msra.mxu1 %v5006_v36  ;;  %1361 = vmatprep.subr.bf16.mxu0 %v5017_v39  ;;  %v5087_v36 = vld [vmem:[%s7306_s1 + $0x2a8] ss:$16 sps:$4 sm:$0xff]  }
  0x59   :  { %1443 = vmatprep.subr.bf16.mxu1 %v5014_v38  ;;  %v5095_v38 = vld [vmem:[%s7306_s1 + $0x28c] ss:$16 sps:$4 sm:$0xff]   ;;  %v5090_v39 = vld [vmem:[%s7306_s1 + $0x4c8] ss:$16 sps:$4 sm:$0xff]  }
  0x5b   :  { %1362 = vmatpush1.bf16.msra.mxu0 %v5015_v43  ;;  %v5104_v43 = vld [vmem:[%s7306_s1 + $0x48c] ss:$16 sps:$4 sm:$0xff]  }
  0x5c   :  { %1444 = vmatpush1.bf16.msra.mxu1 %v5012_v40  ;;  %1363 = vmatprep.subr.bf16.mxu0 %v5023_v46  ;;  %v5098_v40 = vld [vmem:[%s7306_s1 + $0x4ac] ss:$16 sps:$4 sm:$0xff]   ;;  %v5102_v46 = vld [vmem:[%s7306_s1 + $0x488] ss:$16 sps:$4 sm:$0xff]  }
  0x5d   :  { %1445 = vmatprep.subr.bf16.mxu1 %v5020_v45  ;;  %v5107_v45 = vld [vmem:[%s7306_s1 + $0x24c] ss:$16 sps:$4 sm:$0xff]  }
  0x5f   :  { %1364 = vmatpush1.bf16.msra.mxu0 %v5021_v48  ;;  %v5113_v48 = vld [vmem:[%s7306_s1 + $0x22c] ss:$16 sps:$4 sm:$0xff]  }
  0x60   :  { %1446 = vmatpush1.bf16.msra.mxu1 %v5018_v47  ;;  %1365 = vmatprep.subr.bf16.mxu0 %v5029_v50  ;;  %v5110_v47 = vld [vmem:[%s7306_s1 + $0x46c] ss:$16 sps:$4 sm:$0xff]   ;;  %v5111_v50 = vld [vmem:[%s7306_s1 + $0x228] ss:$16 sps:$4 sm:$0xff]  }
  0x61   :  { %1447 = vmatprep.subr.bf16.mxu1 %v5026_v49  ;;  %v5108_v49 = vld [vmem:[%s7306_s1 + $0x468] ss:$16 sps:$4 sm:$0xff]  }
  0x63   :  { %1366 = vmatpush2.bf16.msra.mxu0 %v5027_v52  ;;  %v5119_v52 = vld [vmem:[%s7306_s1 + $0x20c] ss:$16 sps:$4 sm:$0xff]  }
  0x64   :  { %1448 = vmatpush1.bf16.msra.mxu1 %v5024_v51  ;;  %1367 = vmatprep.subr.bf16.mxu0 %v5035_v55  ;;  %v5116_v51 = vld [vmem:[%s7306_s1 + $0x44c] ss:$16 sps:$4 sm:$0xff]   ;;  %v5117_v55 = vld [vmem:[%s7306_s1 + $0x208] ss:$16 sps:$4 sm:$0xff]  }
  0x65   :  { %1449 = vmatprep.subr.bf16.mxu1 %v5032_v53  ;;  %v5114_v53 = vld [vmem:[%s7306_s1 + $0x448] ss:$16 sps:$4 sm:$0xff]  }
  0x67   :  { %1368 = vmatpush2.bf16.msra.mxu0 %v5033_v57  ;;  %v5125_v57 = vld [vmem:[%s7306_s1 + $0x3ec] ss:$16 sps:$4 sm:$0xff]  }
  0x68   :  { %1450 = vmatpush1.bf16.msra.mxu1 %v5030_v56  ;;  %1369 = vmatprep.subr.bf16.mxu0 %v5041_v59  ;;  %v5122_v56 = vld [vmem:[%s7306_s1 + $0x42c] ss:$16 sps:$4 sm:$0xff]   ;;  %v5123_v59 = vld [vmem:[%s7306_s1 + $0x3e8] ss:$16 sps:$4 sm:$0xff]  }
  0x69   :  { %1451 = vmatprep.subr.bf16.mxu1 %v5038_v58  ;;  %v5120_v58 = vld [vmem:[%s7306_s1 + $0x428] ss:$16 sps:$4 sm:$0xff]  }
  0x6b   :  { %1370 = vmatpush2.bf16.msra.mxu0 %v5039_v61  ;;  %v5131_v61 = vld [vmem:[%s7306_s1 + $0x3cc] ss:$16 sps:$4 sm:$0xff]  }
  0x6c   :  { %1452 = vmatpush2.bf16.msra.mxu1 %v5036_v60  ;;  %1371 = vmatprep.subr.bf16.mxu0 %v5047_v63  ;;  %v5128_v60 = vld [vmem:[%s7306_s1 + $0x40c] ss:$16 sps:$4 sm:$0xff]   ;;  %v5129_v63 = vld [vmem:[%s7306_s1 + $0x3c8] ss:$16 sps:$4 sm:$0xff]  }
  0x6d   :  { %1453 = vmatprep.subr.bf16.mxu1 %v5044_v62  ;;  %v5126_v62 = vld [vmem:[%s7306_s1 + $0x408] ss:$16 sps:$4 sm:$0xff]  }
  0x6f   :  { %1372 = vmatpush2.bf16.msra.mxu0 %v5045_v1  ;;  %v5137_v1 = vld [vmem:[%s7306_s1 + $0x3ac] ss:$16 sps:$4 sm:$0xff]  }
  0x70   :  { %1454 = vmatpush2.bf16.msra.mxu1 %v5042_v0  ;;  %1373 = vmatprep.subr.bf16.mxu0 %v5053_v3  ;;  %v5134_v0 = vld [vmem:[%s7306_s1 + $0x5ec] ss:$16 sps:$4 sm:$0xff]   ;;  %v5135_v3 = vld [vmem:[%s7306_s1 + $0x3a8] ss:$16 sps:$4 sm:$0xff]  }
  0x71   :  { %1455 = vmatprep.subr.bf16.mxu1 %v5050_v2  ;;  %v5132_v2 = vld [vmem:[%s7306_s1 + $0x5e8] ss:$16 sps:$4 sm:$0xff]  }
  0x73   :  { %1374 = vmatpush2.bf16.msra.mxu0 %v5051_v5  ;;  %v5143_v5 = vld [vmem:[%s7306_s1 + $0x38c] ss:$16 sps:$4 sm:$0xff]  }
  0x74   :  { %1456 = vmatpush2.bf16.msra.mxu1 %v5048_v4  ;;  %1375 = vmatprep.subr.bf16.mxu0 %v5059_v7  ;;  %v5140_v4 = vld [vmem:[%s7306_s1 + $0x5cc] ss:$16 sps:$4 sm:$0xff]   ;;  %v5141_v7 = vld [vmem:[%s7306_s1 + $0x388] ss:$16 sps:$4 sm:$0xff]  }
  0x75   :  { %1457 = vmatprep.subr.bf16.mxu1 %v5056_v6  ;;  %v5138_v6 = vld [vmem:[%s7306_s1 + $0x5c8] ss:$16 sps:$4 sm:$0xff]  }
  0x77   :  { %1376 = vmatpush2.bf16.msra.mxu0 %v5057_v9  ;;  %v5149_v9 = vld [vmem:[%s7306_s1 + $0x36c] ss:$16 sps:$4 sm:$0xff]  }
  0x78   :  { %1458 = vmatpush2.bf16.msra.mxu1 %v5054_v8  ;;  %1377 = vmatprep.subr.bf16.mxu0 %v5065_v11  ;;  %v5146_v8 = vld [vmem:[%s7306_s1 + $0x5ac] ss:$16 sps:$4 sm:$0xff]   ;;  %v5147_v11 = vld [vmem:[%s7306_s1 + $0x368] ss:$16 sps:$4 sm:$0xff]  }
  0x79   :  { %1459 = vmatprep.subr.bf16.mxu1 %v5062_v10  ;;  %v5144_v10 = vld [vmem:[%s7306_s1 + $0x5a8] ss:$16 sps:$4 sm:$0xff]  }
  0x7b   :  { %1378 = vmatpush2.bf16.msra.mxu0 %v5063_v15  ;;  %v5155_v15 = vld [vmem:[%s7306_s1 + $0x34c] ss:$16 sps:$4 sm:$0xff]  }
  0x7c   :  { %1460 = vmatpush2.bf16.msra.mxu1 %v5060_v14  ;;  %1379 = vmatprep.subr.bf16.mxu0 %v5071_v17  ;;  %v5152_v14 = vld [vmem:[%s7306_s1 + $0x58c] ss:$16 sps:$4 sm:$0xff]   ;;  %v5153_v17 = vld [vmem:[%s7306_s1 + $0x348] ss:$16 sps:$4 sm:$0xff]  }
  0x7d   :  { %1461 = vmatprep.subr.bf16.mxu1 %v5068_v16  ;;  %v5150_v16 = vld [vmem:[%s7306_s1 + $0x588] ss:$16 sps:$4 sm:$0xff]  }
  0x7f   :  { %1380 = vmatpush2.bf16.msra.mxu0 %v5069_v19  ;;  %v5161_v19 = vld [vmem:[%s7306_s1 + $0x32c] ss:$16 sps:$4 sm:$0xff]  }
  0x80   :  { %1462 = vmatpush2.bf16.msra.mxu1 %v5066_v18  ;;  %1478 = vmatprep.subr.bf16.mxu0 %v5077_v25  ;;  %v5158_v18 = vld [vmem:[%s7306_s1 + $0x56c] ss:$16 sps:$4 sm:$0xff]  }
  0x81   :  { %1463 = vmatprep.subr.bf16.mxu1 %v5074_v24  ;;  %v5164_v24 = vld [vmem:[%s7306_s1 + $0x54c] ss:$16 sps:$4 sm:$0xff]  }
  0x82   :  { %1382 = vmatmul.mubr.bf16.vlgmr.msra.gmra.mxu0 %v6120_v26  ;;  %v5167_v25 = vld [vmem:[%s7306_s1 + $0x30c] ss:$16 sps:$4 sm:$0xff]  }
  0x83   :  { %1479 = vmatpush1.bf16.msra.mxu0 %v5075_v28  ;;  %1510 = vmatprep.mubr.bf16.mxu0 %v5834_v54  ;;  %v5093_v54 = vld [vmem:[%s7306_s1 + $0x288] ss:$16 sps:$4 sm:$0xff]  }
  0x84   :  { %1464 = vmatpush2.bf16.msra.mxu1 %v5072_v27  ;;  %1480 = vmatprep.subr.bf16.mxu0 %v5083_v30  ;;  %v5162_v27 = vld [vmem:[%s7306_s1 + $0x548] ss:$16 sps:$4 sm:$0xff]  }
  0x85   :  { %1465 = vmatprep.subr.bf16.mxu1 %v5080_v29  ;;  %v5165_v28 = vld [vmem:[%s7306_s1 + $0x308] ss:$16 sps:$4 sm:$0xff]   ;;  %v5170_v29 = vld [vmem:[%s7306_s1 + $0x52c] ss:$16 sps:$4 sm:$0xff]  }
  0x86   :  { %v5177_v30 = vld [vmem:[%s7308_s3 + $0x78] sm:$0xff]  }
  0x87   :  { %1481 = vmatpush1.bf16.msra.mxu0 %v5081_v32  ;;  %v5178_v32 = vld [vmem:[%s7308_s3 + $0x38] sm:$0xff]  }
  0x88   :  { %1466 = vmatpush2.bf16.msra.mxu1 %v5078_v31  ;;  %1482 = vmatprep.subr.bf16.mxu0 %v5089_v34  ;;  %v5168_v31 = vld [vmem:[%s7306_s1 + $0x528] ss:$16 sps:$4 sm:$0xff]   ;;  %v5179_v34 = vld [vmem:[%s7308_s3 + $0x70] sm:$0xff]  }
  0x89   :  { %1521 = vmatprep.subr.bf16.mxu1 %v5086_v33  ;;  %v5173_v33 = vld [vmem:[%s7306_s1 + $0x50c] ss:$16 sps:$4 sm:$0xff]  }
  0x8b   :  { %1468 = vmatmul.mubr.bf16.vlgmr.msra.gmra.mxu1 %v5901_v12  ;;  %1483 = vmatpush1.bf16.msra.mxu0 %v5087_v36  ;;  %v5099_v12 = vld [vmem:[%s7306_s1 + $0x268] ss:$16 sps:$4 sm:$0xff]   ;;  %v5180_v36 = vld [vmem:[%s7308_s3 + $0x30] sm:$0xff]  }
  0x8c   :  { %1522 = vmatpush1.bf16.msra.mxu1 %v5084_v35  ;;  %1484 = vmatprep.subr.bf16.mxu0 %v5095_v38  ;;  %v5171_v35 = vld [vmem:[%s7306_s1 + $0x508] ss:$16 sps:$4 sm:$0xff]  }
  0x8d   :  { %1523 = vmatprep.subr.bf16.mxu1 %v5092_v37  ;;  %1553 = vmatprep.mubr.bf16.mxu1 %v5997_v44  ;;  %v5105_v44 = vld [vmem:[%s7306_s1 + $0x248] ss:$16 sps:$4 sm:$0xff]   ;;  %v5176_v37 = vld [vmem:[%s7306_s1 + $0x60c] ss:$16 sps:$4 sm:$0xff]  }
  0x8e   :  { %v5181_v38 = vld [vmem:[%s7308_s3 + $0x68] sm:$0xff]  }
  0x8f   :  { %1485 = vmatpush1.bf16.msra.mxu0 %v5093_v54  ;;  %v5183_v54 = vld [vmem:[%s7308_s3 + $0x60] sm:$0xff]  }
  0x90   :  { %1524 = vmatpush1.bf16.msra.mxu1 %v5090_v39  ;;  %1486 = vmatprep.subr.bf16.mxu0 %v5101_v41  ;;  %v5174_v39 = vld [vmem:[%s7306_s1 + $0x608] ss:$16 sps:$4 sm:$0xff]  }
  0x91   :  { %1525 = vmatprep.subr.bf16.mxu1 %v5098_v40  ;;  %v5184_v40 = vld [vmem:[%s7308_s3 + $0x20] sm:$0xff]   ;;  %v5185_v41 = vld [vmem:[%s7308_s3 + $0x58] sm:$0xff]  }
  0x93   :  { %1487 = vmatpush1.bf16.msra.mxu0 %v5099_v12  ;;  %v5188_v12 = vld [vmem:[%s7308_s3 + $0x10] sm:$0xff]  }
  0x94   :  { %1526 = vmatpush1.bf16.msra.mxu1 %v5096_v42  ;;  %1488 = vmatprep.subr.bf16.mxu0 %v5107_v45  ;;  %v5186_v42 = vld [vmem:[%s7308_s3 + $0x18] sm:$0xff]  }
  0x95   :  { %1527 = vmatprep.subr.bf16.mxu1 %v5104_v43  ;;  %v5193_v43 = vld [vmem:[%s7308_s3 + $0xf8] sm:$0xff]  }
  0x96   :  { %v5194_v45 = vld [vmem:[%s7308_s3 + $0xb8] sm:$0xff]  }
  0x97   :  { %1489 = vmatpush1.bf16.msra.mxu0 %v5105_v44  ;;  %v5191_v44 = vld [vmem:[%s7308_s3 + $0x40] sm:$0xff]  }
  0x98   :  { %1528 = vmatpush1.bf16.msra.mxu1 %v5102_v46  ;;  %1490 = vmatprep.subr.bf16.mxu0 %v5113_v48  ;;  %v5189_v46 = vld [vmem:[%s7308_s3 + $0x48] sm:$0xff]   ;;  %v5195_v48 = vld [vmem:[%s7308_s3 + $0xf0] sm:$0xff]  }
  0x99   :  { %1529 = vmatprep.subr.bf16.mxu1 %v5110_v47  ;;  %v5192_v47 = vld [vmem:[%s7308_s3] sm:$0xff]  }
  0x9b   :  { %1491 = vmatpush1.bf16.msra.mxu0 %v5111_v50  ;;  %v5197_v50 = vld [vmem:[%s7308_s3 + $0xe8] sm:$0xff]  }
  0x9c   :  { %1530 = vmatpush1.bf16.msra.mxu1 %v5108_v49  ;;  %1492 = vmatprep.subr.bf16.mxu0 %v5119_v52  ;;  %v5196_v49 = vld [vmem:[%s7308_s3 + $0xb0] sm:$0xff]  }
  0x9d   :  { %1531 = vmatprep.subr.bf16.mxu1 %v5116_v51  ;;  %v5198_v51 = vld [vmem:[%s7308_s3 + $0xa8] sm:$0xff]  }
  0x9f   :  { %1493 = vmatpush1.bf16.msra.mxu0 %v5117_v55 }
  0xa0   :  { %1532 = vmatpush1.bf16.msra.mxu1 %v5114_v53  ;;  %1494 = vmatprep.subr.bf16.mxu0 %v5125_v57 }
  0xa1   :  { %1533 = vmatprep.subr.bf16.mxu1 %v5122_v56 }
  0xa3   :  { %1495 = vmatpush2.bf16.msra.mxu0 %v5123_v59 }
  0xa4   :  { %1534 = vmatpush1.bf16.msra.mxu1 %v5120_v58  ;;  %1496 = vmatprep.subr.bf16.mxu0 %v5131_v61 }
  0xa5   :  { %1535 = vmatprep.subr.bf16.mxu1 %v5128_v60 }
  0xa7   :  { %1497 = vmatpush2.bf16.msra.mxu0 %v5129_v63 }
  0xa8   :  { %1536 = vmatpush1.bf16.msra.mxu1 %v5126_v62  ;;  %1498 = vmatprep.subr.bf16.mxu0 %v5137_v1 }
  0xa9   :  { %1537 = vmatprep.subr.bf16.mxu1 %v5134_v0 }
  0xab   :  { %1499 = vmatpush2.bf16.msra.mxu0 %v5135_v3 }
  0xac   :  { %1538 = vmatpush2.bf16.msra.mxu1 %v5132_v2  ;;  %1500 = vmatprep.subr.bf16.mxu0 %v5143_v5 }
  0xad   :  { %1539 = vmatprep.subr.bf16.mxu1 %v5140_v4 }
  0xaf   :  { %1501 = vmatpush2.bf16.msra.mxu0 %v5141_v7 }
  0xb0   :  { %1540 = vmatpush2.bf16.msra.mxu1 %v5138_v6  ;;  %1502 = vmatprep.subr.bf16.mxu0 %v5149_v9 }
  0xb1   :  { %1541 = vmatprep.subr.bf16.mxu1 %v5146_v8 }
  0xb3   :  { %1503 = vmatpush2.bf16.msra.mxu0 %v5147_v11 }
  0xb4   :  { %1542 = vmatpush2.bf16.msra.mxu1 %v5144_v10  ;;  %1504 = vmatprep.subr.bf16.mxu0 %v5155_v15 }
  0xb5   :  { %1543 = vmatprep.subr.bf16.mxu1 %v5152_v14 }
  0xb7   :  { %1505 = vmatpush2.bf16.msra.mxu0 %v5153_v17 }
  0xb8   :  { %1544 = vmatpush2.bf16.msra.mxu1 %v5150_v16  ;;  %1506 = vmatprep.subr.bf16.mxu0 %v5161_v19 }
  0xb9   :  { %1545 = vmatprep.subr.bf16.mxu1 %v5158_v18 }
  0xbb   :  { %1507 = vmatpush2.bf16.msra.mxu0 %v5159_v22 }
  0xbc   :  { %1546 = vmatpush2.bf16.msra.mxu1 %v5156_v20  ;;  %1508 = vmatprep.subr.bf16.mxu0 %v5167_v25 }
  0xbd   :  { %1547 = vmatprep.subr.bf16.mxu1 %v5164_v24 }
  0xbf   :  { %1509 = vmatpush2.bf16.msra.mxu0 %v5165_v28 }
  0xc0   :  { %1548 = vmatpush2.bf16.msra.mxu1 %v5162_v27  ;;  %4760 = vmatprep.subr.bf16.mxu0 %v5177_v30 }
  0xc1   :  { %1549 = vmatprep.subr.bf16.mxu1 %v5170_v29 }
  0xc2   :  { %1511 = vmatmul.mubr.bf16.vlgmr.msra.gmra.mxu0 %v5903_v13  ;;  %v5182_v13 = vld [vmem:[%s7308_s3 + $0x28] sm:$0xff]  }
  0xc3   :  { %4761 = vmatpush3.bf16.msra.mxu0 %v5178_v32 }
  0xc4   :  { %1550 = vmatpush2.bf16.msra.mxu1 %v5168_v31  ;;  %4762 = vmatprep.subr.bf16.mxu0 %v5179_v34 }
  0xc5   :  { %1551 = vmatprep.subr.bf16.mxu1 %v5173_v33 }
  0xc7   :  { %4763 = vmatpush3.bf16.msra.mxu0 %v5180_v36 }
  0xc8   :  { %1552 = vmatpush2.bf16.msra.mxu1 %v5171_v35  ;;  %4764 = vmatprep.subr.bf16.mxu0 %v5181_v38 }
  0xc9   :  { %1578 = vmatprep.subr.bf16.mxu1 %v5176_v37 }
  0xcb   :  { %1554 = vmatmul.mubr.bf16.vlgmr.msra.gmra.mxu1 %v6120_v26  ;;  %4765 = vmatpush3.bf16.msra.mxu0 %v5182_v13  ;;  %v5187_v26 = vld [vmem:[%s7308_s3 + $0x50] sm:$0xff]  }
  0xcc   :  { %1579 = vmatpush1.bf16.msra.mxu1 %v5174_v39  ;;  %1596 = vmatprep.mubr.bf16.mxu1 %v5607_v21 }
  0xcd   :  { %4766 = vmatprep.subr.bf16.mxu0 %v5183_v54  ;;  %4782 = vmatprep.subr.bf16.mxu1 %v5193_v43 }
  0xcf   :  { %4767 = vmatpush3.bf16.msra.mxu0 %v5184_v40 }
  0xd0   :  { %4768 = vmatprep.subr.bf16.mxu0 %v5185_v41 }
  0xd3   :  { %4445 = vmatmul.mubr.msk.bf16.vlgmr.msra.gmra.mxu1 %vm1259_vm0, %v5932_v23  ;;  %4769 = vmatpush3.bf16.msra.mxu0 %v5186_v42  ;;  %v5190_v23 = vld [vmem:[%s7308_s3 + $0x8] sm:$0xff]  }
  0xd4   :  { %4770 = vmatprep.subr.bf16.mxu0 %v5187_v26  ;;  %4783 = vmatpush3.bf16.msra.mxu1 %v5194_v45 }
  0xd5   :  { %4784 = vmatprep.subr.bf16.mxu1 %v5195_v48 }
  0xd7   :  { %4771 = vmatpush3.bf16.msra.mxu0 %v5188_v12 }
  0xd8   :  { %4772 = vmatprep.subr.bf16.mxu0 %v5189_v46  ;;  %4785 = vmatpush3.bf16.msra.mxu1 %v5196_v49 }
  0xd9   :  { %4786 = vmatprep.subr.bf16.mxu1 %v5197_v50 }
  0xdb   :  { %4773 = vmatpush3.bf16.msra.mxu0 %v5190_v23 }
  0xdc   :  { %4774 = vmatprep.subr.bf16.mxu0 %v5191_v44 }
  0xdf   :  { %4775 = vmatpush3.bf16.msra.mxu0 %v5192_v47 }
  0xe0   :  { %16 = vsyncpa [#allocation3], 0  ;;  %4787 = vmatpush3.bf16.msra.mxu1 %v5198_v51  ;;  %v5199_v52 = vld [vmem:[%s7308_s3 + $0xe0] sm:$0xff]   ;;  %v5201_v55 = vld [vmem:[%s7308_s3 + $0xd8] sm:$0xff]   ;;  %v259_v0 = vlaneseq  ;;  %vm5609_vm1 = vmmov 0   ;;  %vm4226_vm2 = vcmask 125952  }
  0xe1   :  { %v5200_v53 = vld [vmem:[%s7308_s3 + $0xa0] sm:$0xff]   ;;  %4788 = vmatprep.subr.bf16.mxu1 %v5199_v52  ;;  %v5202_v56 = vld [vmem:[%s7308_s3 + $0x98] sm:$0xff]   ;;  %v5203_v57 = vld [vmem:[%s7308_s3 + $0xd0] sm:$0xff]  }
  0xe2   :  { %v5204_v58 = vld [vmem:[%s7308_s3 + $0x90] sm:$0xff]   ;;  %v5205_v59 = vld [vmem:[%s7308_s3 + $0xc8] sm:$0xff]   ;;  %v5207_v61 = vld [vmem:[%s7308_s3 + $0xc0] sm:$0xff]   ;;  %v6431_v2 = vshrl.u32 %v259_v0, 7 }
  0xe3   :  { %v5206_v60 = vld [vmem:[%s7308_s3 + $0x88] sm:$0xff]   ;;  %v5208_v62 = vld [vmem:[%s7308_s3 + $0x80] sm:$0xff]  }
  0xe4   :  { %4789 = vmatpush3.bf16.msra.mxu1 %v5200_v53  ;;  %v6434_v5 = vsub.s32 1, %v6431_v2  ;;  %v6437_v6 = vsub.s32 0, %v6431_v2  ;;  %v257_v8 = vld [vmem:[%s7307_s2] sm:$0xf]  ;;  %v6445_v49 = vsub.s32 3, %v6431_v2  ;;  %v6448_v50 = vsub.s32 2, %v6431_v2 }
  0xe5   :  { %4790 = vmatprep.subr.bf16.mxu1 %v5201_v55 }
  0xe6   :  { %v266_v10 = vrot.slane %v257_v8, %v6434_v5  ;;  %v262_v11 = vrot.slane %v257_v8, %v6437_v6  ;;  %v274_v55 = vrot.slane %v257_v8, %v6445_v49 }
  0xe8   :  { %4791 = vmatpush3.bf16.msra.mxu1 %v5202_v56  ;;  %v270_v56 = vrot.slane %v257_v8, %v6448_v50 }
  0xe9   :  { %4792 = vmatprep.subr.bf16.mxu1 %v5203_v57 }
  0xec   :  { %4793 = vmatpush3.bf16.msra.mxu1 %v5204_v58 }
  0xed   :  { %4794 = vmatprep.subr.bf16.mxu1 %v5205_v59 }
  0xf0   :  { %4795 = vmatpush3.bf16.msra.mxu1 %v5206_v60 }
  0xf1   :  { %4796 = vmatprep.subr.bf16.mxu1 %v5207_v61 }
  0xf4   :  { %4797 = vmatpush3.bf16.msra.mxu1 %v5208_v62 }
 0x102   :  { %v1297_v3 = vpop.f32.mrf.mxu0 }
 0x103   :  { %v1340_v63 = vpop.f32.mrf.mxu1  ;;  %v1298_v17 = vadd.f32 %v1297_v3, %v262_v11 }
 0x104   :  { %v1299_v7 = vpop.f32.mrf.mxu0 }
 0x105   :  { %v1342_v1 = vpop.f32.mrf.mxu1  ;;  %v1300_v16 = vadd.f32 %v1299_v7, %v266_v10  ;;  %v1341_v27 = vadd.f32 %v1340_v63, %v1298_v17 }
 0x106   :  { %v1301_v14 = vpop.f32.mrf.mxu0 }
 0x107   :  { %v1344_v4 = vpop.f32.mrf.mxu1  ;;  %v1302_v19 = vadd.f32 %v1301_v14, %v262_v11  ;;  %v1343_v24 = vadd.f32 %v1342_v1, %v1300_v16 }
 0x108   :  { %v1303_v18 = vpop.f32.mrf.mxu0 }
 0x109   :  { %v1346_v9 = vpop.f32.mrf.mxu1  ;;  %v1304_v25 = vadd.f32 %v1303_v18, %v266_v10  ;;  %v1345_v29 = vadd.f32 %v1344_v4, %v1302_v19 }
 0x10b   :  { %v1426_v15 = vpop.f32.mrf.mxu1  ;;  %v1347_v34 = vadd.f32 %v1346_v9, %v1304_v25 }
 0x10d   :  { %v1428_v20 = vpop.f32.mrf.mxu1 }
 0x10f   :  { %v1430_v31 = vpop.f32.mrf.mxu1 }
 0x111   :  { %v1432_v13 = vpop.f32.mrf.mxu1 }
 0x142   :  { %v1383_v22 = vpop.f32.mrf.mxu0 }
 0x143   :  { %v1384_v32 = vadd.f32 %v1383_v22, %v1341_v27 }
 0x144   :  { %v1385_v28 = vpop.f32.mrf.mxu0 }
 0x145   :  { %v1386_v30 = vadd.f32 %v1385_v28, %v1343_v24  ;;  %v1427_v54 = vadd.f32 %v1426_v15, %v1384_v32  ;;  %v5209_v28 = vld [vmem:[%s7310_s5 + $0x38] sm:$0xff]   ;;  %v5210_v32 = vld [vmem:[%s7310_s5 + $0x30] sm:$0xff]  }
 0x146   :  { %v1387_v33 = vpop.f32.mrf.mxu0 }
 0x147   :  { %v1388_v35 = vadd.f32 %v1387_v33, %v1345_v29  ;;  %v1429_v37 = vadd.f32 %v1428_v20, %v1386_v30  ;;  %v1607_v12 = vmax.f32 %v1427_v54, 0.0  ;;  %v5608_v30 = vmov 0.0   ;;  %v5219_v54 = vld [vmem:[%s7312_s7 + $0xe4] ss:$16 sps:$4 sm:$0xff]  }
 0x148   :  { %v1389_v36 = vpop.f32.mrf.mxu0  ;;  %4857 = vmatprep.subr.bf16.mxu0 %v5608_v30  ;;  %2296 = vmatprep.subr.bf16.mxu1 %v5219_v54 }
 0x149   :  { %v1431_v38 = vadd.f32 %v1430_v31, %v1388_v35  ;;  %v1390_v39 = vadd.f32 %v1389_v36, %v1347_v34  ;;  %v1608_v42 = vmax.f32 %v1429_v37, 0.0  ;;  %v5211_v34 = vld [vmem:[%s7310_s5 + $0x28] sm:$0xff]   ;;  %v5212_v35 = vld [vmem:[%s7310_s5 + $0x20] sm:$0xff]   ;;  %v5213_v36 = vld [vmem:[%s7310_s5 + $0x18] sm:$0xff]  }
 0x14a   :  { %v5214_v37 = vld [vmem:[%s7310_s5 + $0x10] sm:$0xff]  }
 0x14b   :  { %v1433_v40 = vadd.f32 %v1432_v13, %v1390_v39  ;;  %v1611_v41 = vmax.f32 %v1431_v38, 0.0  ;;  %v1469_v46 = vpop.f32.mrf.mxu1  ;;  %v5215_v38 = vld [vmem:[%s7310_s5 + $0x8] sm:$0xff]   ;;  %v5216_v39 = vld [vmem:[%s7310_s5] sm:$0xff]  }
 0x14c   :  { %v1470_v62 = vadd.f32 %v1469_v46, %v270_v56  ;;  %v5217_v13 = vld [vmem:[%s7312_s7 + $0xe0] ss:$16 sps:$4 sm:$0xff]   ;;  %v5243_v46 = vld [vmem:[%s7312_s7 + $0x64] ss:$16 sps:$4 sm:$0xff]  }
 0x14d   :  { %v1612_v26 = vmax.f32 %v1433_v40, 0.0  ;;  %v1615_v45 = vpack.c.bf16 %v1611_v41, %v1607_v12  ;;  %v1471_v23 = vpop.f32.mrf.mxu1  ;;  %v5222_v40 = vld [vmem:[%s7312_s7 + $0xec] ss:$16 sps:$4 sm:$0xff]   ;;  %v5225_v41 = vld [vmem:[%s7312_s7 + $0xc4] ss:$16 sps:$4 sm:$0xff]  }
 0x14e   :  { %v1472_v60 = vadd.f32 %v1471_v23, %v274_v55  ;;  %v5229_v12 = vld [vmem:[%s7312_s7 + $0xa0] ss:$16 sps:$4 sm:$0xff]  }
 0x14f   :  { %v1616_v43 = vpack.c.bf16 %v1612_v26, %v1608_v42  ;;  %v1473_v44 = vpop.f32.mrf.mxu1  ;;  %v5223_v42 = vld [vmem:[%s7312_s7 + $0xc0] ss:$16 sps:$4 sm:$0xff]   ;;  %v5231_v26 = vld [vmem:[%s7312_s7 + $0xa4] ss:$16 sps:$4 sm:$0xff]  }
 0x150   :  { %v1474_v61 = vadd.f32 %v1473_v44, %v270_v56  ;;  %v5241_v23 = vld [vmem:[%s7312_s7 + $0x60] ss:$16 sps:$4 sm:$0xff]   ;;  %v5249_v44 = vld [vmem:[%s7312_s7 + $0x44] ss:$16 sps:$4 sm:$0xff]  }
 0x151   :  { %1914 = vmatprep.mubr.bf16.mxu0 %v1616_v43  ;;  %v1475_v48 = vpop.f32.mrf.mxu1  ;;  %v5237_v43 = vld [vmem:[%s7312_s7 + $0x84] ss:$16 sps:$4 sm:$0xff]  }
 0x152   :  { %1915 = vmatmul.mubr.bf16.vlgmr.msra.gmra.mxu0 %v1615_v45  ;;  %v1476_v1 = vadd.f32 %v1475_v48, %v274_v55  ;;  %v5235_v45 = vld [vmem:[%s7312_s7 + $0x80] ss:$16 sps:$4 sm:$0xff]  }
 0x153   :  { %4858 = vmatpush3.bf16.msra.mxu0 %v5209_v28  ;;  %4873 = vmatprep.mubr.msk.bf16.mxu0 %vm5609_vm1, %v5608_v30  ;;  %v5256_v28 = vld [vmem:[%s7312_s7 + $0x28] ss:$16 sps:$4 sm:$0xff]  }
 0x154   :  { %4859 = vmatprep.subr.bf16.mxu0 %v5608_v30 }
 0x157   :  { %4860 = vmatpush3.bf16.msra.mxu0 %v5210_v32  ;;  %v5262_v32 = vld [vmem:[%s7312_s7 + $0x8] ss:$16 sps:$4 sm:$0xff]  }
 0x158   :  { %4861 = vmatprep.subr.bf16.mxu0 %v5608_v30 }
 0x15b   :  { %4862 = vmatpush3.bf16.msra.mxu0 %v5211_v34  ;;  %v5270_v34 = vld [vmem:[%s7314_s9 + $0x50c] ss:$28 sps:$4 sm:$0xff]  }
 0x15c   :  { %4863 = vmatprep.subr.bf16.mxu0 %v5608_v30 }
 0x15f   :  { %4864 = vmatpush3.bf16.msra.mxu0 %v5212_v35  ;;  %v4479_v35 = vld [vmem:[%s7311_s6] ss:$0 sm:$0xff] }
 0x160   :  { %4865 = vmatprep.subr.bf16.mxu0 %v5608_v30 }
 0x163   :  { %4866 = vmatpush3.bf16.msra.mxu0 %v5213_v36 }
 0x164   :  { %4867 = vmatprep.subr.bf16.mxu0 %v5608_v30 }
 0x167   :  { %4868 = vmatpush3.bf16.msra.mxu0 %v5214_v37 }
 0x168   :  { %4869 = vmatprep.subr.bf16.mxu0 %v5608_v30 }
 0x16b   :  { %4870 = vmatpush3.bf16.msra.mxu0 %v5215_v38 }
 0x16c   :  { %4871 = vmatprep.subr.bf16.mxu0 %v5608_v30  ;;  %v5264_v30 = vld [vmem:[%s7312_s7 + $0xc] ss:$16 sps:$4 sm:$0xff]  }
 0x16f   :  { %4872 = vmatpush3.bf16.msra.mxu0 %v5216_v39 }
 0x170   :  { %2339 = vmatprep.subr.bf16.mxu0 %v5222_v40 }
 0x182   :  { %v1512_v47 = vpop.f32.mrf.mxu0 }
 0x183   :  { %v1513_v7 = vadd.f32 %v1512_v47, %v1470_v62  ;;  %v5247_v47 = vld [vmem:[%s7312_s7 + $0x40] ss:$16 sps:$4 sm:$0xff]  }
 0x184   :  { %v1514_v51 = vpop.f32.mrf.mxu0 }
 0x185   :  { %v1515_v3 = vadd.f32 %v1514_v51, %v1472_v60 }
 0x186   :  { %v1516_v57 = vpop.f32.mrf.mxu0 }
 0x187   :  { %v1517_v4 = vadd.f32 %v1516_v57, %v1474_v61  ;;  %v4446_v57 = vld [vmem:[%s7309_s4] ss:$0 sm:$0xff] }
 0x188   :  { %v1518_v63 = vpop.f32.mrf.mxu0 }
 0x189   :  { %v1519_v10 = vadd.f32 %v1518_v63, %v1476_v1 }
 0x18b   :  { %v1555_v52 = vpop.f32.mrf.mxu1 }
 0x18c   :  { %v1556_v15 = vadd.f32 %v1555_v52, %v1513_v7 }
 0x18d   :  { %v1557_v53 = vpop.f32.mrf.mxu1 }
 0x18e   :  { %v1558_v11 = vadd.f32 %v1557_v53, %v1515_v3 }
 0x18f   :  { %v1559_v58 = vpop.f32.mrf.mxu1 }
 0x190   :  { %v1560_v14 = vadd.f32 %v1559_v58, %v1517_v4 }
 0x191   :  { %v1561_v59 = vpop.f32.mrf.mxu1 }
 0x192   :  { %v1562_v17 = vadd.f32 %v1561_v59, %v1519_v10  ;;  %v5220_v10 = vld [vmem:[%s7312_s7 + $0xe8] ss:$16 sps:$4 sm:$0xff]  }
 0x193   :  { %v1598_v0 = vpop.f32.mrf.mxu1 }
 0x194   :  { %v1599_v19 = vadd.f32 %v1598_v0, %v1556_v15  ;;  %v5226_v15 = vld [vmem:[%s7312_s7 + $0xc8] ss:$16 sps:$4 sm:$0xff]  }
 0x195   :  { %v1600_v9 = vpop.f32.mrf.mxu1 }
 0x196   :  { %v1601_v8 = vadd.f32 %v1600_v9, %v1558_v11  ;;  %v1609_v29 = vmax.f32 %v1599_v19, 0.0  ;;  %v5244_v19 = vld [vmem:[%s7312_s7 + $0x68] ss:$16 sps:$4 sm:$0xff]  }
 0x197   :  { %v1602_v16 = vpop.f32.mrf.mxu1 }
 0x198   :  { %v1603_v18 = vadd.f32 %v1602_v16, %v1560_v14  ;;  %v1610_v25 = vmax.f32 %v1601_v8, 0.0  ;;  %v5228_v14 = vld [vmem:[%s7312_s7 + $0xcc] ss:$16 sps:$4 sm:$0xff]  }
 0x199   :  { %v1604_v20 = vpop.f32.mrf.mxu1  ;;  %v5234_v16 = vld [vmem:[%s7312_s7 + $0xac] ss:$16 sps:$4 sm:$0xff]  }
 0x19a   :  { %v1605_v22 = vadd.f32 %v1604_v20, %v1562_v17  ;;  %v1613_v24 = vmax.f32 %v1603_v18, 0.0  ;;  %v5232_v17 = vld [vmem:[%s7312_s7 + $0xa8] ss:$16 sps:$4 sm:$0xff]   ;;  %v5240_v8 = vld [vmem:[%s7312_s7 + $0x8c] ss:$16 sps:$4 sm:$0xff]  }
 0x19b   :  { %v5246_v18 = vld [vmem:[%s7312_s7 + $0x6c] ss:$16 sps:$4 sm:$0xff]  }
 0x19c   :  { %v1614_v27 = vmax.f32 %v1605_v22, 0.0  ;;  %v1617_v33 = vpack.c.bf16 %v1613_v24, %v1609_v29  ;;  %v5252_v20 = vld [vmem:[%s7312_s7 + $0x4c] ss:$16 sps:$4 sm:$0xff]   ;;  %v5250_v22 = vld [vmem:[%s7312_s7 + $0x48] ss:$16 sps:$4 sm:$0xff]  }
 0x19d   :  { %v5255_v24 = vld [vmem:[%s7312_s7 + $0x24] ss:$16 sps:$4 sm:$0xff]  }
 0x19e   :  { %v1618_v31 = vpack.c.bf16 %v1614_v27, %v1610_v25  ;;  %v5258_v25 = vld [vmem:[%s7312_s7 + $0x2c] ss:$16 sps:$4 sm:$0xff]   ;;  %v5253_v27 = vld [vmem:[%s7312_s7 + $0x20] ss:$16 sps:$4 sm:$0xff]   ;;  %v5261_v29 = vld [vmem:[%s7312_s7 + $0x4] ss:$16 sps:$4 sm:$0xff]  }
 0x1a0   :  { %1955 = vmatprep.mubr.bf16.mxu1 %v1618_v31  ;;  %v5259_v31 = vld [vmem:[%s7312_s7] ss:$16 sps:$4 sm:$0xff]  }
 0x1a1   :  { %1956 = vmatmul.mubr.bf16.vlgmr.msra.gmra.mxu1 %v1617_v33  ;;  %v5267_v33 = vld [vmem:[%s7314_s9 + $0x18c] ss:$28 sps:$4 sm:$0xff]  }
 0x1a2   :  { %2328 = vmatprep.mubr.bf16.mxu1 %v5607_v21  ;;  %2297 = vmatpush1.bf16.msra.mxu1 %v5217_v13 }
 0x1a3   :  { %2298 = vmatprep.subr.bf16.mxu1 %v5225_v41 }
 0x1a6   :  { %2299 = vmatpush1.bf16.msra.mxu1 %v5223_v42  ;;  %v5265_v42 = vld [vmem:[%s7314_s9 + $0x188] ss:$28 sps:$4 sm:$0xff]  }
 0x1a7   :  { %2300 = vmatprep.subr.bf16.mxu1 %v5231_v26  ;;  %v5268_v26 = vld [vmem:[%s7314_s9 + $0x508] ss:$28 sps:$4 sm:$0xff]  }
 0x1aa   :  { %2301 = vmatpush1.bf16.msra.mxu1 %v5229_v12 }
 0x1ab   :  { %2302 = vmatprep.subr.bf16.mxu1 %v5237_v43  ;;  %v5273_v43 = vld [vmem:[%s7314_s9 + $0x154] ss:$28 sps:$4 sm:$0xff]  }
 0x1ae   :  { %2303 = vmatpush1.bf16.msra.mxu1 %v5235_v45  ;;  %v5276_v45 = vld [vmem:[%s7314_s9 + $0x4d4] ss:$28 sps:$4 sm:$0xff]  }
 0x1af   :  { %2304 = vmatprep.subr.bf16.mxu1 %v5243_v46  ;;  %v5271_v46 = vld [vmem:[%s7314_s9 + $0x150] ss:$28 sps:$4 sm:$0xff]  }
 0x1b2   :  { %2305 = vmatpush1.bf16.msra.mxu1 %v5241_v23  ;;  %v5274_v23 = vld [vmem:[%s7314_s9 + $0x4d0] ss:$28 sps:$4 sm:$0xff]  }
 0x1b3   :  { %2306 = vmatprep.subr.bf16.mxu1 %v5249_v44  ;;  %v5279_v44 = vld [vmem:[%s7314_s9 + $0x11c] ss:$28 sps:$4 sm:$0xff]  }
 0x1b6   :  { %2307 = vmatpush1.bf16.msra.mxu1 %v5247_v47  ;;  %v5282_v47 = vld [vmem:[%s7314_s9 + $0x49c] ss:$28 sps:$4 sm:$0xff]  }
 0x1b7   :  { %2308 = vmatprep.subr.bf16.mxu1 %v5255_v24  ;;  %v5330_v24 = vld [vmem:[%s7314_s9 + $0x65c] ss:$28 sps:$4 sm:$0xff]  }
 0x1ba   :  { %2309 = vmatpush1.bf16.msra.mxu1 %v5253_v27  ;;  %v5328_v27 = vld [vmem:[%s7314_s9 + $0x658] ss:$28 sps:$4 sm:$0xff]  }
 0x1bb   :  { %2310 = vmatprep.subr.bf16.mxu1 %v5261_v29  ;;  %v5336_v29 = vld [vmem:[%s7314_s9 + $0x624] ss:$28 sps:$4 sm:$0xff]  }
 0x1be   :  { %2311 = vmatpush1.bf16.msra.mxu1 %v5259_v31  ;;  %v5334_v31 = vld [vmem:[%s7314_s9 + $0x620] ss:$28 sps:$4 sm:$0xff]  }
 0x1bf   :  { %3839 = vmatprep.subr.bf16.mxu1 %v5267_v33  ;;  %v5342_v33 = vld [vmem:[%s7314_s9 + $0x5ec] ss:$28 sps:$4 sm:$0xff]  }
 0x212   :  { %v4776_v48 = vpop.f32.mrf.mxu0 }
 0x214   :  { %v4777_v51 = vpop.f32.mrf.mxu0 }
 0x215   :  { %v4778_v56 = vadd.f32 %v4777_v51, %v4776_v48  ;;  %v5277_v48 = vld [vmem:[%s7314_s9 + $0x118] ss:$28 sps:$4 sm:$0xff]  }
 0x216   :  { %v4779_v52 = vpop.f32.mrf.mxu0  ;;  %v5280_v51 = vld [vmem:[%s7314_s9 + $0x498] ss:$28 sps:$4 sm:$0xff]  }
 0x217   :  { %v1917_v62 = vadd.f32 %v4778_v56, %v4446_v57  ;;  %v5286_v56 = vld [vmem:[%s7314_s9 + $0x460] ss:$28 sps:$4 sm:$0xff]  }
 0x218   :  { %v4780_v53 = vpop.f32.mrf.mxu0 }
 0x219   :  { %v4781_v59 = vadd.f32 %v4780_v53, %v4779_v52  ;;  %v5285_v52 = vld [vmem:[%s7314_s9 + $0xe4] ss:$28 sps:$4 sm:$0xff]  }
 0x21a   :  { %v5288_v53 = vld [vmem:[%s7314_s9 + $0x464] ss:$28 sps:$4 sm:$0xff]  }
 0x21b   :  { %v1920_v0 = vadd.f32 %v4781_v59, %v4446_v57  ;;  %v5291_v57 = vld [vmem:[%s7314_s9 + $0xac] ss:$28 sps:$4 sm:$0xff]  }
 0x21c   :  { %v5289_v59 = vld [vmem:[%s7314_s9 + $0xa8] ss:$28 sps:$4 sm:$0xff]  }
 0x261   :  { %v4798_v55 = vpop.f32.mrf.mxu1 }
 0x263   :  { %v4799_v58 = vpop.f32.mrf.mxu1 }
 0x264   :  { %v4800_v60 = vadd.f32 %v4799_v58, %v4798_v55  ;;  %v5283_v55 = vld [vmem:[%s7314_s9 + $0xe0] ss:$28 sps:$4 sm:$0xff]   ;;  %v5294_v58 = vld [vmem:[%s7314_s9 + $0x42c] ss:$28 sps:$4 sm:$0xff]  }
 0x265   :  { %v4801_v61 = vpop.f32.mrf.mxu1 }
 0x266   :  { %v1958_v1 = vadd.f32 %v4800_v60, %v1917_v62  ;;  %v5292_v60 = vld [vmem:[%s7314_s9 + $0x428] ss:$28 sps:$4 sm:$0xff]   ;;  %v5300_v62 = vld [vmem:[%s7314_s9 + $0x3f4] ss:$28 sps:$4 sm:$0xff]  }
 0x267   :  { %v4802_v63 = vpop.f32.mrf.mxu1 }
 0x268   :  { %v4803_v3 = vadd.f32 %v4802_v63, %v4801_v61  ;;  %v1964_v7 = vmax.f32 %v1958_v1, 0.0  ;;  %v5297_v61 = vld [vmem:[%s7314_s9 + $0x74] ss:$28 sps:$4 sm:$0xff]   ;;  %v5303_v1 = vld [vmem:[%s7314_s9 + $0x3c] ss:$28 sps:$4 sm:$0xff]  }
 0x269   :  { %v5295_v63 = vld [vmem:[%s7314_s9 + $0x70] ss:$28 sps:$4 sm:$0xff]  }
 0x26a   :  { %v1961_v4 = vadd.f32 %v4803_v3, %v1920_v0  ;;  %v5298_v0 = vld [vmem:[%s7314_s9 + $0x3f0] ss:$28 sps:$4 sm:$0xff]   ;;  %v5306_v3 = vld [vmem:[%s7314_s9 + $0x3bc] ss:$28 sps:$4 sm:$0xff]  }
 0x26c   :  { %v1965_v9 = vmax.f32 %v1961_v4, 0.0  ;;  %v5301_v4 = vld [vmem:[%s7314_s9 + $0x38] ss:$28 sps:$4 sm:$0xff]  }
 0x26e   :  { %v1966_v11 = vpack.c.bf16 %v1965_v9, %v1964_v7  ;;  %v5304_v7 = vld [vmem:[%s7314_s9 + $0x3b8] ss:$28 sps:$4 sm:$0xff]   ;;  %v5309_v9 = vld [vmem:[%s7314_s9 + $0x4] ss:$28 sps:$4 sm:$0xff]  }
 0x270   :  { %4874 = vmatmul.mubr.bf16.vlgmr.msra.gmra.mxu0 %v1966_v11  ;;  %v5307_v11 = vld [vmem:[%s7314_s9] ss:$28 sps:$4 sm:$0xff]  }
 0x271   :  { %2340 = vmatpush1.bf16.msra.mxu0 %v5220_v10  ;;  %2371 = vmatprep.mubr.bf16.mxu0 %v5607_v21  ;;  %v5238_v21 = vld [vmem:[%s7312_s7 + $0x88] ss:$16 sps:$4 sm:$0xff]   ;;  %v5312_v10 = vld [vmem:[%s7314_s9 + $0x384] ss:$28 sps:$4 sm:$0xff]  }
 0x272   :  { %2341 = vmatprep.subr.bf16.mxu0 %v5228_v14  ;;  %v5310_v14 = vld [vmem:[%s7314_s9 + $0x380] ss:$28 sps:$4 sm:$0xff]  }
 0x275   :  { %2342 = vmatpush1.bf16.msra.mxu0 %v5226_v15  ;;  %v5315_v15 = vld [vmem:[%s7314_s9 + $0x34c] ss:$28 sps:$4 sm:$0xff]  }
 0x276   :  { %2343 = vmatprep.subr.bf16.mxu0 %v5234_v16  ;;  %v5318_v16 = vld [vmem:[%s7314_s9 + $0x6cc] ss:$28 sps:$4 sm:$0xff]  }
 0x279   :  { %2344 = vmatpush1.bf16.msra.mxu0 %v5232_v17  ;;  %v5313_v17 = vld [vmem:[%s7314_s9 + $0x348] ss:$28 sps:$4 sm:$0xff]  }
 0x27a   :  { %2345 = vmatprep.subr.bf16.mxu0 %v5240_v8  ;;  %v5316_v8 = vld [vmem:[%s7314_s9 + $0x6c8] ss:$28 sps:$4 sm:$0xff]  }
 0x27d   :  { %2346 = vmatpush1.bf16.msra.mxu0 %v5238_v21  ;;  %v5321_v21 = vld [vmem:[%s7314_s9 + $0x314] ss:$28 sps:$4 sm:$0xff]  }
 0x27e   :  { %2347 = vmatprep.subr.bf16.mxu0 %v5246_v18  ;;  %v5324_v18 = vld [vmem:[%s7314_s9 + $0x694] ss:$28 sps:$4 sm:$0xff]  }
 0x281   :  { %2348 = vmatpush1.bf16.msra.mxu0 %v5244_v19  ;;  %v5319_v19 = vld [vmem:[%s7314_s9 + $0x310] ss:$28 sps:$4 sm:$0xff]  }
 0x282   :  { %2349 = vmatprep.subr.bf16.mxu0 %v5252_v20  ;;  %v5322_v20 = vld [vmem:[%s7314_s9 + $0x690] ss:$28 sps:$4 sm:$0xff]  }
 0x285   :  { %2350 = vmatpush1.bf16.msra.mxu0 %v5250_v22  ;;  %v5327_v22 = vld [vmem:[%s7314_s9 + $0x2dc] ss:$28 sps:$4 sm:$0xff]  }
 0x286   :  { %2351 = vmatprep.subr.bf16.mxu0 %v5258_v25  ;;  %v5325_v25 = vld [vmem:[%s7314_s9 + $0x2d8] ss:$28 sps:$4 sm:$0xff]  }
 0x289   :  { %2352 = vmatpush1.bf16.msra.mxu0 %v5256_v28  ;;  %v5333_v28 = vld [vmem:[%s7314_s9 + $0x2a4] ss:$28 sps:$4 sm:$0xff]  }
 0x28a   :  { %2353 = vmatprep.subr.bf16.mxu0 %v5264_v30  ;;  %v5331_v30 = vld [vmem:[%s7314_s9 + $0x2a0] ss:$28 sps:$4 sm:$0xff]  }
 0x28d   :  { %2354 = vmatpush1.bf16.msra.mxu0 %v5262_v32  ;;  %v5339_v32 = vld [vmem:[%s7314_s9 + $0x26c] ss:$28 sps:$4 sm:$0xff]  }
 0x28e   :  { %3882 = vmatprep.subr.bf16.mxu0 %v5270_v34  ;;  %v5337_v34 = vld [vmem:[%s7314_s9 + $0x268] ss:$28 sps:$4 sm:$0xff]  }
 0x330   :  { %v2072_v36 = vpop.f32.mrf.mxu0 }
 0x331   :  { %v2073_v38 = vadd.f32 %v4479_v35, %v2072_v36  ;;  %v5345_v36 = vld [vmem:[%s7314_s9 + $0x234] ss:$28 sps:$4 sm:$0xff]  }
 0x332   :  { %v4875_v37 = vpop.f32.mrf.mxu0 }
 0x333   :  { %v2079_v40 = vmax.f32 %v2073_v38, 0.0  ;;  %v5348_v37 = vld [vmem:[%s7314_s9 + $0x5b4] ss:$28 sps:$4 sm:$0xff]  }
 0x334   :  { %v2075_v39 = vpop.f32.mrf.mxu0  ;;  %v5343_v38 = vld [vmem:[%s7314_s9 + $0x230] ss:$28 sps:$4 sm:$0xff]  }
 0x335   :  { %v2076_v13 = vadd.f32 %v4479_v35, %v2075_v39  ;;  %v5340_v35 = vld [vmem:[%s7314_s9 + $0x5e8] ss:$28 sps:$4 sm:$0xff]   ;;  %v5346_v39 = vld [vmem:[%s7314_s9 + $0x5b0] ss:$28 sps:$4 sm:$0xff]  }
 0x336   :  { %v4876_v54 = vpop.f32.mrf.mxu0 }
 0x337   :  { %v2080_v41 = vmax.f32 %v2076_v13, 0.0  ;;  %v5351_v13 = vld [vmem:[%s7314_s9 + $0x1fc] ss:$28 sps:$4 sm:$0xff]  }
 0x338   :  { %v5354_v54 = vld [vmem:[%s7314_s9 + $0x57c] ss:$28 sps:$4 sm:$0xff]  }
 0x339   :  { %v2081_v12 = vpack.c.bf16 %v2080_v41, %v2079_v40  ;;  %v5349_v40 = vld [vmem:[%s7314_s9 + $0x1f8] ss:$28 sps:$4 sm:$0xff]  }
 0x33a   :  { %v5352_v41 = vld [vmem:[%s7314_s9 + $0x578] ss:$28 sps:$4 sm:$0xff]  }
 0x33b   :  { %2329 = vmatmul.mubr.bf16.vlgmr.msra.gmra.mxu1 %v2081_v12  ;;  %2372 = vmatmul.mubr.bf16.vlgmr.msra.gmra.mxu0 %v2081_v12  ;;  %v5355_v12 = vld [vmem:[%s7314_s9 + $0x1c0] ss:$28 sps:$4 sm:$0xff]  }
 0x33c   :  { %3840 = vmatpush1.bf16.msra.mxu1 %v5265_v42  ;;  %3883 = vmatpush1.bf16.msra.mxu0 %v5268_v26  ;;  %v5357_v42 = vld [vmem:[%s7314_s9 + $0x1c4] ss:$28 sps:$4 sm:$0xff]  }
 0x33d   :  { %3841 = vmatprep.subr.bf16.mxu1 %v5273_v43  ;;  %3884 = vmatprep.subr.bf16.mxu0 %v5276_v45  ;;  %v5360_v26 = vld [vmem:[%s7314_s9 + $0x544] ss:$28 sps:$4 sm:$0xff]   ;;  %v5363_v45 = vld [vmem:[%s7314_s9 + $0x194] ss:$28 sps:$4 sm:$0xff]  }
 0x33e   :  { %v5358_v43 = vld [vmem:[%s7314_s9 + $0x540] ss:$28 sps:$4 sm:$0xff]  }
 0x340   :  { %3842 = vmatpush1.bf16.msra.mxu1 %v5271_v46  ;;  %3885 = vmatpush1.bf16.msra.mxu0 %v5274_v23  ;;  %v5366_v46 = vld [vmem:[%s7314_s9 + $0x514] ss:$28 sps:$4 sm:$0xff]   ;;  %v2114_v23 = vld [vmem:[%s7313_s8] sm:$0xf] }
 0x341   :  { %3843 = vmatprep.subr.bf16.mxu1 %v5279_v44  ;;  %3886 = vmatprep.subr.bf16.mxu0 %v5282_v47 }
 0x344   :  { %3844 = vmatpush1.bf16.msra.mxu1 %v5277_v48  ;;  %3887 = vmatpush1.bf16.msra.mxu0 %v5280_v51  ;;  %v2123_v48 = vrot.slane %v2114_v23, %v6434_v5  ;;  %v2131_v51 = vrot.slane %v2114_v23, %v6445_v49 }
 0x345   :  { %3845 = vmatprep.subr.bf16.mxu1 %v5285_v52  ;;  %3888 = vmatprep.subr.bf16.mxu0 %v5288_v53  ;;  %v2119_v52 = vrot.slane %v2114_v23, %v6437_v6  ;;  %v2127_v53 = vrot.slane %v2114_v23, %v6448_v50  ;;  %v5405_v23 = vld [vmem:[%s7314_s9 + $0xc] ss:$28 sps:$4 sm:$0xff]  }
 0x348   :  { %3846 = vmatpush1.bf16.msra.mxu1 %v5283_v55  ;;  %3889 = vmatpush1.bf16.msra.mxu0 %v5286_v56 }
 0x349   :  { %3847 = vmatprep.subr.bf16.mxu1 %v5291_v57  ;;  %3890 = vmatprep.subr.bf16.mxu0 %v5294_v58 }
 0x34c   :  { %3848 = vmatpush1.bf16.msra.mxu1 %v5289_v59  ;;  %3891 = vmatpush1.bf16.msra.mxu0 %v5292_v60 }
 0x34d   :  { %3849 = vmatprep.subr.bf16.mxu1 %v5297_v61  ;;  %3892 = vmatprep.subr.bf16.mxu0 %v5300_v62 }
 0x350   :  { %3850 = vmatpush1.bf16.msra.mxu1 %v5295_v63  ;;  %3893 = vmatpush1.bf16.msra.mxu0 %v5298_v0 }
 0x351   :  { %3851 = vmatprep.subr.bf16.mxu1 %v5303_v1  ;;  %3894 = vmatprep.subr.bf16.mxu0 %v5306_v3 }
 0x354   :  { %3852 = vmatpush1.bf16.msra.mxu1 %v5301_v4  ;;  %3895 = vmatpush1.bf16.msra.mxu0 %v5304_v7 }
 0x355   :  { %3853 = vmatprep.subr.bf16.mxu1 %v5309_v9  ;;  %3896 = vmatprep.subr.bf16.mxu0 %v5312_v10 }
 0x358   :  { %3854 = vmatpush1.bf16.msra.mxu1 %v5307_v11  ;;  %3897 = vmatpush1.bf16.msra.mxu0 %v5310_v14 }
 0x359   :  { %3855 = vmatprep.subr.bf16.mxu1 %v5315_v15  ;;  %3898 = vmatprep.subr.bf16.mxu0 %v5318_v16 }
 0x35c   :  { %3856 = vmatpush2.bf16.msra.mxu1 %v5313_v17  ;;  %3899 = vmatpush2.bf16.msra.mxu0 %v5316_v8 }
 0x35d   :  { %3857 = vmatprep.subr.bf16.mxu1 %v5321_v21  ;;  %3900 = vmatprep.subr.bf16.mxu0 %v5324_v18 }
 0x360   :  { %3858 = vmatpush2.bf16.msra.mxu1 %v5319_v19  ;;  %3901 = vmatpush2.bf16.msra.mxu0 %v5322_v20  ;;  %v5361_v19 = vld [vmem:[%s7314_s9 + $0x190] ss:$28 sps:$4 sm:$0xff]  }
 0x361   :  { %3859 = vmatprep.subr.bf16.mxu1 %v5327_v22  ;;  %3902 = vmatprep.subr.bf16.mxu0 %v5330_v24  ;;  %v5364_v20 = vld [vmem:[%s7314_s9 + $0x510] ss:$28 sps:$4 sm:$0xff]  }
 0x364   :  { %3860 = vmatpush2.bf16.msra.mxu1 %v5325_v25  ;;  %3903 = vmatpush2.bf16.msra.mxu0 %v5328_v27  ;;  %v5369_v25 = vld [vmem:[%s7314_s9 + $0x15c] ss:$28 sps:$4 sm:$0xff]  }
 0x365   :  { %3861 = vmatprep.subr.bf16.mxu1 %v5333_v28  ;;  %3904 = vmatprep.subr.bf16.mxu0 %v5336_v29  ;;  %v5372_v27 = vld [vmem:[%s7314_s9 + $0x4dc] ss:$28 sps:$4 sm:$0xff]  }
 0x366   :  { %v5367_v28 = vld [vmem:[%s7314_s9 + $0x158] ss:$28 sps:$4 sm:$0xff]  }
 0x367   :  { %v5370_v29 = vld [vmem:[%s7314_s9 + $0x4d8] ss:$28 sps:$4 sm:$0xff]  }
 0x368   :  { %3862 = vmatpush2.bf16.msra.mxu1 %v5331_v30  ;;  %3905 = vmatpush2.bf16.msra.mxu0 %v5334_v31  ;;  %v5375_v30 = vld [vmem:[%s7314_s9 + $0x124] ss:$28 sps:$4 sm:$0xff]  }
 0x369   :  { %3863 = vmatprep.subr.bf16.mxu1 %v5339_v32  ;;  %3906 = vmatprep.subr.bf16.mxu0 %v5342_v33  ;;  %v5378_v31 = vld [vmem:[%s7314_s9 + $0x4a4] ss:$28 sps:$4 sm:$0xff]  }
 0x36a   :  { %v5373_v32 = vld [vmem:[%s7314_s9 + $0x120] ss:$28 sps:$4 sm:$0xff]  }
 0x36b   :  { %v5376_v33 = vld [vmem:[%s7314_s9 + $0x4a0] ss:$28 sps:$4 sm:$0xff]  }
 0x36c   :  { %3864 = vmatpush2.bf16.msra.mxu1 %v5337_v34  ;;  %3907 = vmatpush2.bf16.msra.mxu0 %v5340_v35  ;;  %v5381_v34 = vld [vmem:[%s7314_s9 + $0xec] ss:$28 sps:$4 sm:$0xff]  }
 0x36d   :  { %3865 = vmatprep.subr.bf16.mxu1 %v5345_v36  ;;  %3908 = vmatprep.subr.bf16.mxu0 %v5348_v37  ;;  %v5384_v35 = vld [vmem:[%s7314_s9 + $0x46c] ss:$28 sps:$4 sm:$0xff]  }
 0x36e   :  { %v5379_v36 = vld [vmem:[%s7314_s9 + $0xe8] ss:$28 sps:$4 sm:$0xff]  }
 0x36f   :  { %v5382_v37 = vld [vmem:[%s7314_s9 + $0x468] ss:$28 sps:$4 sm:$0xff]  }
 0x370   :  { %3866 = vmatpush2.bf16.msra.mxu1 %v5343_v38  ;;  %3909 = vmatpush2.bf16.msra.mxu0 %v5346_v39  ;;  %v5387_v38 = vld [vmem:[%s7314_s9 + $0xb4] ss:$28 sps:$4 sm:$0xff]  }
 0x371   :  { %3867 = vmatprep.subr.bf16.mxu1 %v5351_v13  ;;  %3910 = vmatprep.subr.bf16.mxu0 %v5354_v54  ;;  %v5390_v39 = vld [vmem:[%s7314_s9 + $0x434] ss:$28 sps:$4 sm:$0xff]  }
 0x372   :  { %v5385_v13 = vld [vmem:[%s7314_s9 + $0xb0] ss:$28 sps:$4 sm:$0xff]  }
 0x373   :  { %v5388_v54 = vld [vmem:[%s7314_s9 + $0x430] ss:$28 sps:$4 sm:$0xff]  }
 0x374   :  { %3868 = vmatpush2.bf16.msra.mxu1 %v5349_v40  ;;  %3911 = vmatpush2.bf16.msra.mxu0 %v5352_v41  ;;  %v5393_v40 = vld [vmem:[%s7314_s9 + $0x7c] ss:$28 sps:$4 sm:$0xff]  }
 0x375   :  { %3869 = vmatprep.subr.bf16.mxu1 %v5357_v42  ;;  %3912 = vmatprep.subr.bf16.mxu0 %v5360_v26  ;;  %v5396_v41 = vld [vmem:[%s7314_s9 + $0x3fc] ss:$28 sps:$4 sm:$0xff]  }
 0x376   :  { %v5391_v42 = vld [vmem:[%s7314_s9 + $0x78] ss:$28 sps:$4 sm:$0xff]  }
 0x377   :  { %v5394_v26 = vld [vmem:[%s7314_s9 + $0x3f8] ss:$28 sps:$4 sm:$0xff]  }
 0x378   :  { %3870 = vmatpush2.bf16.msra.mxu1 %v5355_v12  ;;  %3913 = vmatpush2.bf16.msra.mxu0 %v5358_v43  ;;  %v5399_v12 = vld [vmem:[%s7314_s9 + $0x44] ss:$28 sps:$4 sm:$0xff]  }
 0x379   :  { %3925 = vmatprep.subr.bf16.mxu1 %v5363_v45  ;;  %3968 = vmatprep.subr.bf16.mxu0 %v5366_v46  ;;  %v5402_v43 = vld [vmem:[%s7314_s9 + $0x3c4] ss:$28 sps:$4 sm:$0xff]  }
 0x37a   :  { %v5397_v45 = vld [vmem:[%s7314_s9 + $0x40] ss:$28 sps:$4 sm:$0xff]  }
 0x37b   :  { %v5400_v46 = vld [vmem:[%s7314_s9 + $0x3c0] ss:$28 sps:$4 sm:$0xff]  }
 0x3fb   :  { %v2330_v44 = vpop.f32.mrf.mxu1  ;;  %v2373_v47 = vpop.f32.mrf.mxu0 }
 0x3fc   :  { %v2331_v63 = vadd.f32 %v2330_v44, %v2119_v52  ;;  %v2374_v0 = vadd.f32 %v2373_v47, %v2127_v53  ;;  %v5408_v44 = vld [vmem:[%s7314_s9 + $0x38c] ss:$28 sps:$4 sm:$0xff]  }
 0x3fd   :  { %v2332_v55 = vpop.f32.mrf.mxu1  ;;  %v2375_v56 = vpop.f32.mrf.mxu0  ;;  %v5403_v47 = vld [vmem:[%s7314_s9 + $0x8] ss:$28 sps:$4 sm:$0xff]  }
 0x3fe   :  { %v2333_v59 = vadd.f32 %v2332_v55, %v2123_v48  ;;  %v2376_v60 = vadd.f32 %v2375_v56, %v2131_v51  ;;  %v2382_v17 = vmax.f32 %v2331_v63, 0.0  ;;  %v2384_v8 = vmax.f32 %v2374_v0, 0.0  ;;  %v5412_v55 = vld [vmem:[%s7314_s9 + $0x6d0] ss:$28 sps:$4 sm:$0xff]   ;;  %v5417_v56 = vld [vmem:[%s7314_s9 + $0x31c] ss:$28 sps:$4 sm:$0xff]  }
 0x3ff   :  { %v2334_v57 = vpop.f32.mrf.mxu1  ;;  %v2377_v58 = vpop.f32.mrf.mxu0  ;;  %v5424_v63 = vld [vmem:[%s7314_s9 + $0x660] ss:$28 sps:$4 sm:$0xff]   ;;  %v5429_v0 = vld [vmem:[%s7314_s9 + $0x2ac] ss:$28 sps:$4 sm:$0xff]  }
 0x400   :  { %v2335_v61 = vadd.f32 %v2334_v57, %v2119_v52  ;;  %v2378_v62 = vadd.f32 %v2377_v58, %v2127_v53  ;;  %v2383_v11 = vmax.f32 %v2333_v59, 0.0  ;;  %v2385_v14 = vmax.f32 %v2376_v60, 0.0  ;;  %v5414_v52 = vld [vmem:[%s7314_s9 + $0x6d4] ss:$28 sps:$4 sm:$0xff]   ;;  %v5420_v57 = vld [vmem:[%s7314_s9 + $0x69c] ss:$28 sps:$4 sm:$0xff]  }
 0x401   :  { %v2336_v1 = vpop.f32.mrf.mxu1  ;;  %v2379_v3 = vpop.f32.mrf.mxu0  ;;  %v5409_v53 = vld [vmem:[%s7314_s9 + $0x350] ss:$28 sps:$4 sm:$0xff]   ;;  %v5415_v58 = vld [vmem:[%s7314_s9 + $0x318] ss:$28 sps:$4 sm:$0xff]   ;;  %v5423_v60 = vld [vmem:[%s7314_s9 + $0x2e4] ss:$28 sps:$4 sm:$0xff]  }
 0x402   :  { %v2337_v4 = vadd.f32 %v2336_v1, %v2123_v48  ;;  %v2380_v7 = vadd.f32 %v2379_v3, %v2131_v51  ;;  %v2386_v9 = vmax.f32 %v2335_v61, 0.0  ;;  %v2388_v10 = vmax.f32 %v2378_v62, 0.0  ;;  %v5406_v48 = vld [vmem:[%s7314_s9 + $0x388] ss:$28 sps:$4 sm:$0xff]   ;;  %v5411_v51 = vld [vmem:[%s7314_s9 + $0x354] ss:$28 sps:$4 sm:$0xff]  }
 0x403   :  { %v5418_v59 = vld [vmem:[%s7314_s9 + $0x698] ss:$28 sps:$4 sm:$0xff]   ;;  %v5426_v61 = vld [vmem:[%s7314_s9 + $0x664] ss:$28 sps:$4 sm:$0xff]   ;;  %v5432_v1 = vld [vmem:[%s7314_s9 + $0x62c] ss:$28 sps:$4 sm:$0xff]  }
 0x404   :  { %v2387_v15 = vmax.f32 %v2337_v4, 0.0  ;;  %v2389_v16 = vmax.f32 %v2380_v7, 0.0  ;;  %v6795_v22 = vpack.c.bf16 %v2386_v9, %v2382_v17  ;;  %v6797_v24 = vpack.c.bf16 %v2388_v10, %v2384_v8  ;;  %v5421_v62 = vld [vmem:[%s7314_s9 + $0x2e0] ss:$28 sps:$4 sm:$0xff]   ;;  %v5427_v3 = vld [vmem:[%s7314_s9 + $0x2a8] ss:$28 sps:$4 sm:$0xff]  }
 0x405   :  { %v5430_v4 = vld [vmem:[%s7314_s9 + $0x628] ss:$28 sps:$4 sm:$0xff]   ;;  %v5435_v7 = vld [vmem:[%s7314_s9 + $0x274] ss:$28 sps:$4 sm:$0xff]  }
 0x406   :  { %v6785_v21 = vpack.c.bf16 %v2387_v15, %v2383_v11  ;;  %v6787_v18 = vpack.c.bf16 %v2389_v16, %v2385_v14  ;;  %v5438_v9 = vld [vmem:[%s7314_s9 + $0x5f4] ss:$28 sps:$4 sm:$0xff]   ;;  %v5441_v14 = vld [vmem:[%s7314_s9 + $0x23c] ss:$28 sps:$4 sm:$0xff]   ;;  %v5447_v8 = vld [vmem:[%s7314_s9 + $0x204] ss:$28 sps:$4 sm:$0xff]  }
 0x407   :  { %v5433_v10 = vld [vmem:[%s7314_s9 + $0x270] ss:$28 sps:$4 sm:$0xff]   ;;  %v5444_v15 = vld [vmem:[%s7314_s9 + $0x5bc] ss:$28 sps:$4 sm:$0xff]  }
 0x408   :  { %3871 = vmatprep.mubr.bf16.mxu1 %v6785_v21  ;;  %3914 = vmatprep.mubr.bf16.mxu0 %v6787_v18  ;;  %v5436_v11 = vld [vmem:[%s7314_s9 + $0x5f0] ss:$28 sps:$4 sm:$0xff]   ;;  %v5439_v16 = vld [vmem:[%s7314_s9 + $0x238] ss:$28 sps:$4 sm:$0xff]  }
 0x409   :  { %3872 = vmatmul.mubr.bf16.vlgmr.msra.gmra.mxu1 %v6795_v22  ;;  %3915 = vmatmul.mubr.bf16.vlgmr.msra.gmra.mxu0 %v6797_v24  ;;  %v5442_v17 = vld [vmem:[%s7314_s9 + $0x5b8] ss:$28 sps:$4 sm:$0xff]  }
 0x40a   :  { %3926 = vmatpush1.bf16.msra.mxu1 %v5361_v19  ;;  %3969 = vmatpush1.bf16.msra.mxu0 %v5364_v20  ;;  %v5450_v19 = vld [vmem:[%s7314_s9 + $0x584] ss:$28 sps:$4 sm:$0xff]  }
 0x40b   :  { %3957 = vmatprep.mubr.bf16.mxu1 %v6785_v21  ;;  %4000 = vmatprep.mubr.bf16.mxu0 %v6787_v18  ;;  %v5445_v20 = vld [vmem:[%s7314_s9 + $0x200] ss:$28 sps:$4 sm:$0xff]  }
 0x40c   :  { %3927 = vmatprep.subr.bf16.mxu1 %v5369_v25  ;;  %3970 = vmatprep.subr.bf16.mxu0 %v5372_v27  ;;  %v5448_v25 = vld [vmem:[%s7314_s9 + $0x580] ss:$28 sps:$4 sm:$0xff]   ;;  %v5453_v27 = vld [vmem:[%s7314_s9 + $0x1cc] ss:$28 sps:$4 sm:$0xff]  }
 0x40e   :  { %3928 = vmatpush1.bf16.msra.mxu1 %v5367_v28  ;;  %3971 = vmatpush1.bf16.msra.mxu0 %v5370_v29  ;;  %v5456_v28 = vld [vmem:[%s7314_s9 + $0x54c] ss:$28 sps:$4 sm:$0xff]  }
 0x40f   :  { %3929 = vmatprep.subr.bf16.mxu1 %v5375_v30  ;;  %3972 = vmatprep.subr.bf16.mxu0 %v5378_v31  ;;  %v5451_v29 = vld [vmem:[%s7314_s9 + $0x1c8] ss:$28 sps:$4 sm:$0xff]   ;;  %v5459_v31 = vld [vmem:[%s7314_s9 + $0x19c] ss:$28 sps:$4 sm:$0xff]  }
 0x410   :  { %v5454_v30 = vld [vmem:[%s7314_s9 + $0x548] ss:$28 sps:$4 sm:$0xff]  }
 0x412   :  { %3930 = vmatpush1.bf16.msra.mxu1 %v5373_v32  ;;  %3973 = vmatpush1.bf16.msra.mxu0 %v5376_v33  ;;  %v5462_v32 = vld [vmem:[%s7314_s9 + $0x51c] ss:$28 sps:$4 sm:$0xff]  }
 0x413   :  { %3931 = vmatprep.subr.bf16.mxu1 %v5381_v34  ;;  %3974 = vmatprep.subr.bf16.mxu0 %v5384_v35  ;;  %v5457_v33 = vld [vmem:[%s7314_s9 + $0x198] ss:$28 sps:$4 sm:$0xff]   ;;  %v5465_v35 = vld [vmem:[%s7314_s9 + $0x164] ss:$28 sps:$4 sm:$0xff]  }
 0x414   :  { %v5460_v34 = vld [vmem:[%s7314_s9 + $0x518] ss:$28 sps:$4 sm:$0xff]  }
 0x416   :  { %3932 = vmatpush1.bf16.msra.mxu1 %v5379_v36  ;;  %3975 = vmatpush1.bf16.msra.mxu0 %v5382_v37  ;;  %v5468_v36 = vld [vmem:[%s7314_s9 + $0x4e4] ss:$28 sps:$4 sm:$0xff]  }
 0x417   :  { %3933 = vmatprep.subr.bf16.mxu1 %v5387_v38  ;;  %3976 = vmatprep.subr.bf16.mxu0 %v5390_v39  ;;  %v5463_v37 = vld [vmem:[%s7314_s9 + $0x160] ss:$28 sps:$4 sm:$0xff]   ;;  %v5471_v39 = vld [vmem:[%s7314_s9 + $0x12c] ss:$28 sps:$4 sm:$0xff]  }
 0x418   :  { %v5466_v38 = vld [vmem:[%s7314_s9 + $0x4e0] ss:$28 sps:$4 sm:$0xff]  }
 0x41a   :  { %3934 = vmatpush1.bf16.msra.mxu1 %v5385_v13  ;;  %3977 = vmatpush1.bf16.msra.mxu0 %v5388_v54  ;;  %v5474_v13 = vld [vmem:[%s7314_s9 + $0x4ac] ss:$28 sps:$4 sm:$0xff]  }
 0x41b   :  { %3935 = vmatprep.subr.bf16.mxu1 %v5393_v40  ;;  %3978 = vmatprep.subr.bf16.mxu0 %v5396_v41  ;;  %v5469_v54 = vld [vmem:[%s7314_s9 + $0x128] ss:$28 sps:$4 sm:$0xff]   ;;  %v5477_v41 = vld [vmem:[%s7314_s9 + $0xf4] ss:$28 sps:$4 sm:$0xff]  }
 0x41c   :  { %v5472_v40 = vld [vmem:[%s7314_s9 + $0x4a8] ss:$28 sps:$4 sm:$0xff]  }
 0x41e   :  { %3936 = vmatpush1.bf16.msra.mxu1 %v5391_v42  ;;  %3979 = vmatpush1.bf16.msra.mxu0 %v5394_v26  ;;  %v5480_v42 = vld [vmem:[%s7314_s9 + $0x474] ss:$28 sps:$4 sm:$0xff]  }
 0x41f   :  { %3937 = vmatprep.subr.bf16.mxu1 %v5399_v12  ;;  %3980 = vmatprep.subr.bf16.mxu0 %v5402_v43  ;;  %v5475_v26 = vld [vmem:[%s7314_s9 + $0xf0] ss:$28 sps:$4 sm:$0xff]   ;;  %v5483_v43 = vld [vmem:[%s7314_s9 + $0xbc] ss:$28 sps:$4 sm:$0xff]  }
 0x420   :  { %v5478_v12 = vld [vmem:[%s7314_s9 + $0x470] ss:$28 sps:$4 sm:$0xff]  }
 0x422   :  { %3938 = vmatpush1.bf16.msra.mxu1 %v5397_v45  ;;  %3981 = vmatpush1.bf16.msra.mxu0 %v5400_v46  ;;  %v5486_v45 = vld [vmem:[%s7314_s9 + $0x43c] ss:$28 sps:$4 sm:$0xff]  }
 0x423   :  { %3939 = vmatprep.subr.bf16.mxu1 %v5405_v23  ;;  %3982 = vmatprep.subr.bf16.mxu0 %v5408_v44  ;;  %v5481_v46 = vld [vmem:[%s7314_s9 + $0xb8] ss:$28 sps:$4 sm:$0xff]   ;;  %v5489_v44 = vld [vmem:[%s7314_s9 + $0x84] ss:$28 sps:$4 sm:$0xff]  }
 0x424   :  { %v5484_v23 = vld [vmem:[%s7314_s9 + $0x438] ss:$28 sps:$4 sm:$0xff]  }
 0x426   :  { %3940 = vmatpush1.bf16.msra.mxu1 %v5403_v47  ;;  %3983 = vmatpush1.bf16.msra.mxu0 %v5406_v48  ;;  %v5492_v47 = vld [vmem:[%s7314_s9 + $0x404] ss:$28 sps:$4 sm:$0xff]  }
 0x427   :  { %3941 = vmatprep.subr.bf16.mxu1 %v5411_v51  ;;  %3984 = vmatprep.subr.bf16.mxu0 %v5414_v52  ;;  %v5487_v48 = vld [vmem:[%s7314_s9 + $0x80] ss:$28 sps:$4 sm:$0xff]   ;;  %v5495_v52 = vld [vmem:[%s7314_s9 + $0x4c] ss:$28 sps:$4 sm:$0xff]  }
 0x428   :  { %v5490_v51 = vld [vmem:[%s7314_s9 + $0x400] ss:$28 sps:$4 sm:$0xff]  }
 0x42a   :  { %3942 = vmatpush2.bf16.msra.mxu1 %v5409_v53  ;;  %3985 = vmatpush2.bf16.msra.mxu0 %v5412_v55  ;;  %v5498_v53 = vld [vmem:[%s7314_s9 + $0x3cc] ss:$28 sps:$4 sm:$0xff]  }
 0x42b   :  { %3943 = vmatprep.subr.bf16.mxu1 %v5417_v56  ;;  %3986 = vmatprep.subr.bf16.mxu0 %v5420_v57  ;;  %v5493_v55 = vld [vmem:[%s7314_s9 + $0x48] ss:$28 sps:$4 sm:$0xff]   ;;  %v5501_v57 = vld [vmem:[%s7314_s9 + $0x14] ss:$28 sps:$4 sm:$0xff]  }
 0x42c   :  { %v5496_v56 = vld [vmem:[%s7314_s9 + $0x3c8] ss:$28 sps:$4 sm:$0xff]  }
 0x42e   :  { %3944 = vmatpush2.bf16.msra.mxu1 %v5415_v58  ;;  %3987 = vmatpush2.bf16.msra.mxu0 %v5418_v59  ;;  %v5504_v58 = vld [vmem:[%s7314_s9 + $0x394] ss:$28 sps:$4 sm:$0xff]  }
 0x42f   :  { %3945 = vmatprep.subr.bf16.mxu1 %v5423_v60  ;;  %3988 = vmatprep.subr.bf16.mxu0 %v5426_v61  ;;  %v5499_v59 = vld [vmem:[%s7314_s9 + $0x10] ss:$28 sps:$4 sm:$0xff]   ;;  %v5507_v61 = vld [vmem:[%s7314_s9 + $0x35c] ss:$28 sps:$4 sm:$0xff]  }
 0x430   :  { %v5502_v60 = vld [vmem:[%s7314_s9 + $0x390] ss:$28 sps:$4 sm:$0xff]  }
 0x432   :  { %3946 = vmatpush2.bf16.msra.mxu1 %v5421_v62  ;;  %3989 = vmatpush2.bf16.msra.mxu0 %v5424_v63  ;;  %v5510_v62 = vld [vmem:[%s7314_s9 + $0x6dc] ss:$28 sps:$4 sm:$0xff]  }
 0x433   :  { %3947 = vmatprep.subr.bf16.mxu1 %v5429_v0  ;;  %3990 = vmatprep.subr.bf16.mxu0 %v5432_v1  ;;  %v5505_v63 = vld [vmem:[%s7314_s9 + $0x358] ss:$28 sps:$4 sm:$0xff]   ;;  %v5513_v1 = vld [vmem:[%s7314_s9 + $0x324] ss:$28 sps:$4 sm:$0xff]  }
 0x434   :  { %v5508_v0 = vld [vmem:[%s7314_s9 + $0x6d8] ss:$28 sps:$4 sm:$0xff]  }
 0x436   :  { %3948 = vmatpush2.bf16.msra.mxu1 %v5427_v3  ;;  %3991 = vmatpush2.bf16.msra.mxu0 %v5430_v4  ;;  %v5516_v3 = vld [vmem:[%s7314_s9 + $0x6a4] ss:$28 sps:$4 sm:$0xff]  }
 0x437   :  { %3949 = vmatprep.subr.bf16.mxu1 %v5435_v7  ;;  %3992 = vmatprep.subr.bf16.mxu0 %v5438_v9  ;;  %v5511_v4 = vld [vmem:[%s7314_s9 + $0x320] ss:$28 sps:$4 sm:$0xff]   ;;  %v5519_v9 = vld [vmem:[%s7314_s9 + $0x2ec] ss:$28 sps:$4 sm:$0xff]  }
 0x438   :  { %v5514_v7 = vld [vmem:[%s7314_s9 + $0x6a0] ss:$28 sps:$4 sm:$0xff]  }
 0x43a   :  { %3950 = vmatpush2.bf16.msra.mxu1 %v5433_v10  ;;  %3993 = vmatpush2.bf16.msra.mxu0 %v5436_v11  ;;  %v5522_v10 = vld [vmem:[%s7314_s9 + $0x66c] ss:$28 sps:$4 sm:$0xff]  }
 0x43b   :  { %3951 = vmatprep.subr.bf16.mxu1 %v5441_v14  ;;  %3994 = vmatprep.subr.bf16.mxu0 %v5444_v15  ;;  %v5517_v11 = vld [vmem:[%s7314_s9 + $0x2e8] ss:$28 sps:$4 sm:$0xff]   ;;  %v5525_v15 = vld [vmem:[%s7314_s9 + $0x2b4] ss:$28 sps:$4 sm:$0xff]  }
 0x43c   :  { %v5520_v14 = vld [vmem:[%s7314_s9 + $0x668] ss:$28 sps:$4 sm:$0xff]  }
 0x43e   :  { %3952 = vmatpush2.bf16.msra.mxu1 %v5439_v16  ;;  %3995 = vmatpush2.bf16.msra.mxu0 %v5442_v17  ;;  %v5528_v16 = vld [vmem:[%s7314_s9 + $0x634] ss:$28 sps:$4 sm:$0xff]  }
 0x43f   :  { %3953 = vmatprep.subr.bf16.mxu1 %v5447_v8  ;;  %3996 = vmatprep.subr.bf16.mxu0 %v5450_v19  ;;  %v5523_v17 = vld [vmem:[%s7314_s9 + $0x2b0] ss:$28 sps:$4 sm:$0xff]   ;;  %v5531_v19 = vld [vmem:[%s7314_s9 + $0x27c] ss:$28 sps:$4 sm:$0xff]  }
 0x440   :  { %v5526_v8 = vld [vmem:[%s7314_s9 + $0x630] ss:$28 sps:$4 sm:$0xff]  }
 0x442   :  { %3954 = vmatpush2.bf16.msra.mxu1 %v5445_v20  ;;  %3997 = vmatpush2.bf16.msra.mxu0 %v5448_v25  ;;  %v5534_v20 = vld [vmem:[%s7314_s9 + $0x5fc] ss:$28 sps:$4 sm:$0xff]  }
 0x443   :  { %3955 = vmatprep.subr.bf16.mxu1 %v5453_v27  ;;  %3998 = vmatprep.subr.bf16.mxu0 %v5456_v28  ;;  %v5529_v25 = vld [vmem:[%s7314_s9 + $0x278] ss:$28 sps:$4 sm:$0xff]   ;;  %v5537_v28 = vld [vmem:[%s7314_s9 + $0x244] ss:$28 sps:$4 sm:$0xff]  }
 0x444   :  { %v5532_v27 = vld [vmem:[%s7314_s9 + $0x5f8] ss:$28 sps:$4 sm:$0xff]  }
 0x446   :  { %3956 = vmatpush2.bf16.msra.mxu1 %v5451_v29  ;;  %3999 = vmatpush2.bf16.msra.mxu0 %v5454_v30  ;;  %v5540_v29 = vld [vmem:[%s7314_s9 + $0x5c4] ss:$28 sps:$4 sm:$0xff]  }
 0x447   :  { %4011 = vmatprep.subr.bf16.mxu1 %v5459_v31  ;;  %4054 = vmatprep.subr.bf16.mxu0 %v5462_v32  ;;  %v5535_v30 = vld [vmem:[%s7314_s9 + $0x240] ss:$28 sps:$4 sm:$0xff]   ;;  %v5543_v32 = vld [vmem:[%s7314_s9 + $0x20c] ss:$28 sps:$4 sm:$0xff]  }
 0x448   :  { %v5538_v31 = vld [vmem:[%s7314_s9 + $0x5c0] ss:$28 sps:$4 sm:$0xff]  }
 0x449   :  { %3958 = vmatmul.mubr.bf16.vlgmr.msra.gmra.mxu1 %v6795_v22  ;;  %4001 = vmatmul.mubr.bf16.vlgmr.msra.gmra.mxu0 %v6797_v24 }
 0x44a   :  { %4012 = vmatpush1.bf16.msra.mxu1 %v5457_v33  ;;  %4043 = vmatprep.mubr.bf16.mxu1 %v6785_v21  ;;  %v5546_v33 = vld [vmem:[%s7314_s9 + $0x58c] ss:$28 sps:$4 sm:$0xff]  }
 0x44b   :  { %4055 = vmatpush1.bf16.msra.mxu0 %v5460_v34  ;;  %4086 = vmatprep.mubr.bf16.mxu0 %v6787_v18  ;;  %v5541_v34 = vld [vmem:[%s7314_s9 + $0x208] ss:$28 sps:$4 sm:$0xff]  }
 0x44c   :  { %4013 = vmatprep.subr.bf16.mxu1 %v5465_v35  ;;  %4056 = vmatprep.subr.bf16.mxu0 %v5468_v36  ;;  %v5544_v35 = vld [vmem:[%s7314_s9 + $0x588] ss:$28 sps:$4 sm:$0xff]   ;;  %v5549_v36 = vld [vmem:[%s7314_s9 + $0x1d4] ss:$28 sps:$4 sm:$0xff]  }
 0x44e   :  { %4014 = vmatpush1.bf16.msra.mxu1 %v5463_v37  ;;  %v5552_v37 = vld [vmem:[%s7314_s9 + $0x554] ss:$28 sps:$4 sm:$0xff]  }
 0x44f   :  { %4057 = vmatpush1.bf16.msra.mxu0 %v5466_v38  ;;  %4015 = vmatprep.subr.bf16.mxu1 %v5471_v39  ;;  %v5547_v38 = vld [vmem:[%s7314_s9 + $0x1d0] ss:$28 sps:$4 sm:$0xff]  }
 0x450   :  { %4058 = vmatprep.subr.bf16.mxu0 %v5474_v13  ;;  %v5550_v39 = vld [vmem:[%s7314_s9 + $0x550] ss:$28 sps:$4 sm:$0xff]   ;;  %v5553_v13 = vld [vmem:[%s7314_s9 + $0x360] ss:$28 sps:$4 sm:$0xff]  }
 0x452   :  { %4016 = vmatpush1.bf16.msra.mxu1 %v5469_v54  ;;  %v5554_v54 = vld [vmem:[%s7314_s9 + $0x6e0] ss:$28 sps:$4 sm:$0xff]  }
 0x453   :  { %4059 = vmatpush1.bf16.msra.mxu0 %v5472_v40  ;;  %4017 = vmatprep.subr.bf16.mxu1 %v5477_v41  ;;  %v5555_v40 = vld [vmem:[%s7314_s9 + $0x1a0] ss:$28 sps:$4 sm:$0xff]  }
 0x454   :  { %4060 = vmatprep.subr.bf16.mxu0 %v5480_v42  ;;  %v5556_v41 = vld [vmem:[%s7314_s9 + $0x520] ss:$28 sps:$4 sm:$0xff]   ;;  %v5557_v42 = vld [vmem:[%s7314_s9 + $0x328] ss:$28 sps:$4 sm:$0xff]  }
 0x456   :  { %4018 = vmatpush1.bf16.msra.mxu1 %v5475_v26  ;;  %v5558_v26 = vld [vmem:[%s7314_s9 + $0x6a8] ss:$28 sps:$4 sm:$0xff]  }
 0x457   :  { %4061 = vmatpush1.bf16.msra.mxu0 %v5478_v12  ;;  %4019 = vmatprep.subr.bf16.mxu1 %v5483_v43  ;;  %v5559_v12 = vld [vmem:[%s7314_s9 + $0x168] ss:$28 sps:$4 sm:$0xff]  }
 0x458   :  { %4062 = vmatprep.subr.bf16.mxu0 %v5486_v45  ;;  %v5560_v43 = vld [vmem:[%s7314_s9 + $0x4e8] ss:$28 sps:$4 sm:$0xff]   ;;  %v5561_v45 = vld [vmem:[%s7314_s9 + $0x2f0] ss:$28 sps:$4 sm:$0xff]  }
 0x45a   :  { %4020 = vmatpush1.bf16.msra.mxu1 %v5481_v46  ;;  %v5562_v46 = vld [vmem:[%s7314_s9 + $0x670] ss:$28 sps:$4 sm:$0xff]  }
 0x45b   :  { %4063 = vmatpush1.bf16.msra.mxu0 %v5484_v23  ;;  %4021 = vmatprep.subr.bf16.mxu1 %v5489_v44  ;;  %v5564_v23 = vld [vmem:[%s7314_s9 + $0x4b0] ss:$28 sps:$4 sm:$0xff]   ;;  %v5566_v44 = vld [vmem:[%s7314_s9 + $0x638] ss:$28 sps:$4 sm:$0xff]  }
 0x45c   :  { %4064 = vmatprep.subr.bf16.mxu0 %v5492_v47  ;;  %v5567_v47 = vld [vmem:[%s7314_s9 + $0xf8] ss:$28 sps:$4 sm:$0xff]  }
 0x45e   :  { %4022 = vmatpush1.bf16.msra.mxu1 %v5487_v48  ;;  %v5568_v48 = vld [vmem:[%s7314_s9 + $0x478] ss:$28 sps:$4 sm:$0xff]  }
 0x45f   :  { %4065 = vmatpush1.bf16.msra.mxu0 %v5490_v51  ;;  %4023 = vmatprep.subr.bf16.mxu1 %v5495_v52  ;;  %v5569_v51 = vld [vmem:[%s7314_s9 + $0x280] ss:$28 sps:$4 sm:$0xff]  }
 0x460   :  { %4066 = vmatprep.subr.bf16.mxu0 %v5498_v53  ;;  %v5570_v52 = vld [vmem:[%s7314_s9 + $0x600] ss:$28 sps:$4 sm:$0xff]  }
 0x461   :  { %v5571_v53 = vld [vmem:[%s7314_s9 + $0xc0] ss:$28 sps:$4 sm:$0xff]  }
 0x462   :  { %4024 = vmatpush1.bf16.msra.mxu1 %v5493_v55  ;;  %v5572_v55 = vld [vmem:[%s7314_s9 + $0x440] ss:$28 sps:$4 sm:$0xff]  }
 0x463   :  { %4067 = vmatpush1.bf16.msra.mxu0 %v5496_v56  ;;  %4025 = vmatprep.subr.bf16.mxu1 %v5501_v57  ;;  %v5573_v56 = vld [vmem:[%s7314_s9 + $0x248] ss:$28 sps:$4 sm:$0xff]  }
 0x464   :  { %4068 = vmatprep.subr.bf16.mxu0 %v5504_v58  ;;  %v5574_v57 = vld [vmem:[%s7314_s9 + $0x5c8] ss:$28 sps:$4 sm:$0xff]  }
 0x465   :  { %v5575_v58 = vld [vmem:[%s7314_s9 + $0x88] ss:$28 sps:$4 sm:$0xff]  }
 0x466   :  { %4026 = vmatpush1.bf16.msra.mxu1 %v5499_v59  ;;  %v5576_v59 = vld [vmem:[%s7314_s9 + $0x408] ss:$28 sps:$4 sm:$0xff]  }
 0x467   :  { %4069 = vmatpush1.bf16.msra.mxu0 %v5502_v60  ;;  %4027 = vmatprep.subr.bf16.mxu1 %v5507_v61  ;;  %v5577_v60 = vld [vmem:[%s7314_s9 + $0x210] ss:$28 sps:$4 sm:$0xff]  }
 0x468   :  { %4070 = vmatprep.subr.bf16.mxu0 %v5510_v62  ;;  %v5578_v61 = vld [vmem:[%s7314_s9 + $0x590] ss:$28 sps:$4 sm:$0xff]  }
 0x469   :  { %v5579_v62 = vld [vmem:[%s7314_s9 + $0x50] ss:$28 sps:$4 sm:$0xff]  }
 0x46a   :  { %4028 = vmatpush2.bf16.msra.mxu1 %v5505_v63  ;;  %v5580_v63 = vld [vmem:[%s7314_s9 + $0x3d0] ss:$28 sps:$4 sm:$0xff]  }
 0x46b   :  { %4071 = vmatpush2.bf16.msra.mxu0 %v5508_v0  ;;  %4029 = vmatprep.subr.bf16.mxu1 %v5513_v1  ;;  %v5581_v0 = vld [vmem:[%s7314_s9 + $0x1d8] ss:$28 sps:$4 sm:$0xff]  }
 0x46c   :  { %4072 = vmatprep.subr.bf16.mxu0 %v5516_v3  ;;  %v5582_v1 = vld [vmem:[%s7314_s9 + $0x558] ss:$28 sps:$4 sm:$0xff]  }
 0x46d   :  { %v5583_v3 = vld [vmem:[%s7314_s9 + $0x18] ss:$28 sps:$4 sm:$0xff]  }
 0x46e   :  { %4030 = vmatpush2.bf16.msra.mxu1 %v5511_v4  ;;  %v5584_v4 = vld [vmem:[%s7314_s9 + $0x398] ss:$28 sps:$4 sm:$0xff]  }
 0x46f   :  { %4073 = vmatpush2.bf16.msra.mxu0 %v5514_v7  ;;  %4031 = vmatprep.subr.bf16.mxu1 %v5519_v9  ;;  %v7286_v7 = vld [vmem:[%s7315_s10] sm:$0x7f] }
 0x470   :  { %4074 = vmatprep.subr.bf16.mxu0 %v5522_v10  ;;  %v2655_v9 = vrot.slane %v7286_v7, %v6437_v6  ;;  %v2659_v10 = vrot.slane %v7286_v7, %v6434_v5  ;;  %v2663_v5 = vrot.slane %v7286_v7, %v6448_v50 }
 0x472   :  { %4032 = vmatpush2.bf16.msra.mxu1 %v5517_v11 }
 0x473   :  { %4075 = vmatpush2.bf16.msra.mxu0 %v5520_v14  ;;  %4033 = vmatprep.subr.bf16.mxu1 %v5525_v15 }
 0x474   :  { %4076 = vmatprep.subr.bf16.mxu0 %v5528_v16 }
 0x476   :  { %4034 = vmatpush2.bf16.msra.mxu1 %v5523_v17 }
 0x477   :  { %4077 = vmatpush2.bf16.msra.mxu0 %v5526_v8  ;;  %4035 = vmatprep.subr.bf16.mxu1 %v5531_v19 }
 0x478   :  { %4078 = vmatprep.subr.bf16.mxu0 %v5534_v20 }
 0x47a   :  { %4036 = vmatpush2.bf16.msra.mxu1 %v5529_v25 }
 0x47b   :  { %4079 = vmatpush2.bf16.msra.mxu0 %v5532_v27  ;;  %4037 = vmatprep.subr.bf16.mxu1 %v5537_v28 }
 0x47c   :  { %4080 = vmatprep.subr.bf16.mxu0 %v5540_v29 }
 0x47e   :  { %4038 = vmatpush2.bf16.msra.mxu1 %v5535_v30 }
 0x47f   :  { %4081 = vmatpush2.bf16.msra.mxu0 %v5538_v31  ;;  %4039 = vmatprep.subr.bf16.mxu1 %v5543_v32 }
 0x480   :  { %4082 = vmatprep.subr.bf16.mxu0 %v5546_v33  ;;  %v2667_v33 = vrot.slane %v7286_v7, %v6445_v49  ;;  %v2670_v49 = vsub.s32 4, %v6431_v2 }
 0x482   :  { %4040 = vmatpush2.bf16.msra.mxu1 %v5541_v34 }
 0x483   :  { %4083 = vmatpush2.bf16.msra.mxu0 %v5544_v35  ;;  %4041 = vmatprep.subr.bf16.mxu1 %v5549_v36 }
 0x484   :  { %4084 = vmatprep.subr.bf16.mxu0 %v5552_v37 }
 0x486   :  { %4042 = vmatpush2.bf16.msra.mxu1 %v5547_v38 }
 0x487   :  { %4085 = vmatpush2.bf16.msra.mxu0 %v5550_v39  ;;  %4813 = vmatprep.subr.bf16.mxu1 %v5553_v13 }
 0x488   :  { %4835 = vmatprep.subr.bf16.mxu0 %v5554_v54 }
 0x489   :  { %4044 = vmatmul.mubr.bf16.vlgmr.msra.gmra.mxu1 %v6795_v22 }
 0x48a   :  { %4087 = vmatmul.mubr.bf16.vlgmr.msra.gmra.mxu0 %v6797_v24  ;;  %4814 = vmatpush3.bf16.msra.mxu1 %v5555_v40 }
 0x48b   :  { %4129 = vmatprep.mubr.bf16.mxu1 %v6785_v21  ;;  %4836 = vmatpush3.bf16.msra.mxu0 %v5556_v41  ;;  %v5563_v21 = vld [vmem:[%s7314_s9 + $0x130] ss:$28 sps:$4 sm:$0xff]  }
 0x48c   :  { %4170 = vmatprep.mubr.bf16.mxu0 %v6787_v18  ;;  %4815 = vmatprep.subr.bf16.mxu1 %v5557_v42  ;;  %v5565_v18 = vld [vmem:[%s7314_s9 + $0x2b8] ss:$28 sps:$4 sm:$0xff]   ;;  %s5610_s9 = smov [#allocation2]  }
 0x48d   :  { %4837 = vmatprep.subr.bf16.mxu0 %v5558_v26  ;;  %s4237_s10 = sshll.u32 %s5610_s9, 4  ;;  %s4238_s10 = int_to_ptr.vmem [resolvable:$true] %s4237_s10 }
 0x48e   :  { %4816 = vmatpush3.bf16.msra.mxu1 %v5559_v12  ;;  %s5585_s28 = scalar_lea.vmem %s4238_s10, 896  ;;  %p5590_p1 = scmp.lt.s32.totalorder %s4238_s10, %s4238_s10 }
 0x48f   :  { %4838 = vmatpush3.bf16.msra.mxu0 %v5560_v43  ;;  %4817 = vmatprep.subr.bf16.mxu1 %v5561_v45  ;;  %p5586_p0 = scmp.ne.s32.totalorder %s4238_s10, %s5585_s28  ;;  %p5591_p2 = scmp.lt.s32.totalorder %s5585_s28, %s5585_s28 }
 0x490   :  { %4839 = vmatprep.subr.bf16.mxu0 %v5562_v46 }
 0x491   :  { %p5592_p3 = por %p5591_p2, %p5590_p1 }
 0x492   :  { %4818 = vmatpush3.bf16.msra.mxu1 %v5563_v21 }
 0x493   :  { %4840 = vmatpush3.bf16.msra.mxu0 %v5564_v23  ;;  %4819 = vmatprep.subr.bf16.mxu1 %v5565_v18  ;;  %v2674_v23 = vsub.s32 5, %v6431_v2  ;;  %v2671_v18 = vrot.slane %v7286_v7, %v2670_v49  ;;  %p5593_p4 = pnand %p5592_p3, %p5586_p0 }
 0x494   :  { %4841 = vmatprep.subr.bf16.mxu0 %v5566_v44 }
 0x495   :  { %v2675_v44 = vrot.slane %v7286_v7, %v2674_v23 }
 0x496   :  { %4820 = vmatpush3.bf16.msra.mxu1 %v5567_v47 }
 0x497   :  { %4842 = vmatpush3.bf16.msra.mxu0 %v5568_v48  ;;  %4821 = vmatprep.subr.bf16.mxu1 %v5569_v51 }
 0x498   :  { %4843 = vmatprep.subr.bf16.mxu0 %v5570_v52 }
 0x49a   :  { %4822 = vmatpush3.bf16.msra.mxu1 %v5571_v53 }
 0x49b   :  { %4844 = vmatpush3.bf16.msra.mxu0 %v5572_v55  ;;  %4823 = vmatprep.subr.bf16.mxu1 %v5573_v56 }
 0x49c   :  { %4845 = vmatprep.subr.bf16.mxu0 %v5574_v57 }
 0x49e   :  { %4824 = vmatpush3.bf16.msra.mxu1 %v5575_v58 }
 0x49f   :  { %4846 = vmatpush3.bf16.msra.mxu0 %v5576_v59  ;;  %4825 = vmatprep.subr.bf16.mxu1 %v5577_v60 }
 0x4a0   :  { %4847 = vmatprep.subr.bf16.mxu0 %v5578_v61 }
 0x4a2   :  { %4826 = vmatpush3.bf16.msra.mxu1 %v5579_v62 }
 0x4a3   :  { %4848 = vmatpush3.bf16.msra.mxu0 %v5580_v63  ;;  %4827 = vmatprep.subr.bf16.mxu1 %v5581_v0 }
 0x4a4   :  { %4849 = vmatprep.subr.bf16.mxu0 %v5582_v1 }
 0x4a6   :  { %4828 = vmatpush3.bf16.msra.mxu1 %v5583_v3 }
 0x4a7   :  { %4850 = vmatpush3.bf16.msra.mxu0 %v5584_v4 }
 0x4a9   :  { %4130 = vmatmul.mubr.bf16.vlgmr.msra.gmra.mxu1 %v6795_v22 }
 0x4aa   :  { %4171 = vmatmul.mubr.bf16.vlgmr.msra.gmra.mxu0 %v6797_v24 }
 0x4c9   :  { %v3873_v11 = vpop.f32.mrf.mxu1  ;;  %v3916_v14 = vpop.f32.mrf.mxu0 }
 0x4ca   :  { %v3874_v15 = vadd.f32 %v3873_v11, %v2655_v9 }
 0x4cb   :  { %v3875_v16 = vpop.f32.mrf.mxu1  ;;  %v3918_v17 = vpop.f32.mrf.mxu0 }
 0x4cc   :  { %v3876_v8 = vadd.f32 %v3875_v16, %v2659_v10  ;;  %v3917_v24 = vadd.f32 %v3916_v14, %v3874_v15 }
 0x4cd   :  { %v3877_v22 = vpop.f32.mrf.mxu1  ;;  %v3920_v19 = vpop.f32.mrf.mxu0 }
 0x4ce   :  { %v3919_v20 = vadd.f32 %v3918_v17, %v3876_v8  ;;  %v3878_v25 = vadd.f32 %v3877_v22, %v2655_v9  ;;  %v2678_v9 = vsub.s32 6, %v6431_v2 }
 0x4cf   :  { %v3879_v27 = vpop.f32.mrf.mxu1  ;;  %v3922_v30 = vpop.f32.mrf.mxu0 }
 0x4d0   :  { %v4752_v28 = vpack.c.bf16 %v3919_v20, %v3917_v24  ;;  %v3880_v29 = vadd.f32 %v3879_v27, %v2659_v10  ;;  %v3921_v6 = vadd.f32 %v3920_v19, %v3878_v25  ;;  %v2679_v14 = vrot.slane %v7286_v7, %v2678_v9 }
 0x4d2   :  { %4223 = vst [vmem:[#allocation2] sm:$0xff] %v4752_v28  ;;  %v3923_v31 = vadd.f32 %v3922_v30, %v3880_v29 }
 0x4d4   :  { %v4756_v32 = vpack.c.bf16 %v3923_v31, %v3921_v6 }
 0x4d6   :  { %4228 = vst [vmem:[#allocation2 + $0x1c] sm:$0xff] %v4756_v32 }
 0x509   :  { %v3959_v34 = vpop.f32.mrf.mxu1  ;;  %v4002_v35 = vpop.f32.mrf.mxu0 }
 0x50a   :  { %v3960_v36 = vadd.f32 %v3959_v34, %v2663_v5 }
 0x50b   :  { %v3961_v37 = vpop.f32.mrf.mxu1  ;;  %v4004_v38 = vpop.f32.mrf.mxu0 }
 0x50c   :  { %v3962_v39 = vadd.f32 %v3961_v37, %v2667_v33  ;;  %v4003_v40 = vadd.f32 %v4002_v35, %v3960_v36 }
 0x50d   :  { %v3963_v13 = vpop.f32.mrf.mxu1  ;;  %v4006_v54 = vpop.f32.mrf.mxu0 }
 0x50e   :  { %v4005_v41 = vadd.f32 %v4004_v38, %v3962_v39  ;;  %v3964_v42 = vadd.f32 %v3963_v13, %v2663_v5 }
 0x50f   :  { %v3965_v26 = vpop.f32.mrf.mxu1  ;;  %v4008_v45 = vpop.f32.mrf.mxu0 }
 0x510   :  { %v4753_v12 = vpack.c.bf16 %v4005_v41, %v4003_v40  ;;  %v3966_v43 = vadd.f32 %v3965_v26, %v2667_v33  ;;  %v4007_v50 = vadd.f32 %v4006_v54, %v3964_v42 }
 0x512   :  { %4224 = vst [vmem:[#allocation2 + $0x8] sm:$0xff] %v4753_v12  ;;  %v4009_v46 = vadd.f32 %v4008_v45, %v3966_v43 }
 0x514   :  { %v4757_v21 = vpack.c.bf16 %v4009_v46, %v4007_v50 }
 0x516   :  { %4229 = vst [vmem:[#allocation2 + $0x24] sm:$0xff] %v4757_v21 }
 0x549   :  { %v4045_v47 = vpop.f32.mrf.mxu1 }
 0x54a   :  { %v4046_v48 = vadd.f32 %v4045_v47, %v2671_v18  ;;  %v4088_v51 = vpop.f32.mrf.mxu0 }
 0x54b   :  { %v4047_v52 = vpop.f32.mrf.mxu1 }
 0x54c   :  { %v4048_v53 = vadd.f32 %v4047_v52, %v2675_v44  ;;  %v4090_v55 = vpop.f32.mrf.mxu0  ;;  %v4089_v57 = vadd.f32 %v4088_v51, %v4046_v48 }
 0x54d   :  { %v4049_v56 = vpop.f32.mrf.mxu1 }
 0x54e   :  { %v4091_v58 = vadd.f32 %v4090_v55, %v4048_v53  ;;  %v4050_v59 = vadd.f32 %v4049_v56, %v2671_v18  ;;  %v4092_v60 = vpop.f32.mrf.mxu0 }
 0x54f   :  { %v4051_v61 = vpop.f32.mrf.mxu1 }
 0x550   :  { %v4754_v62 = vpack.c.bf16 %v4091_v58, %v4089_v57  ;;  %v4052_v63 = vadd.f32 %v4051_v61, %v2675_v44  ;;  %v4094_v0 = vpop.f32.mrf.mxu0  ;;  %v4093_v1 = vadd.f32 %v4092_v60, %v4050_v59 }
 0x552   :  { %4225 = vst [vmem:[#allocation2 + $0x10] sm:$0xff] %v4754_v62  ;;  %v4095_v3 = vadd.f32 %v4094_v0, %v4052_v63 }
 0x554   :  { %v4758_v4 = vpack.c.bf16 %v4095_v3, %v4093_v1 }
 0x556   :  { %4230 = vst [vmem:[#allocation2 + $0x2c] sm:$0xff] %v4758_v4 }
 0x569   :  { %v4829_v10 = vpop.f32.mrf.mxu1 }
 0x56a   :  { %v4851_v11 = vpop.f32.mrf.mxu0 }
 0x56b   :  { %v4830_v15 = vpop.f32.mrf.mxu1 }
 0x56c   :  { %v4831_v16 = vadd.f32 %v4830_v15, %v4829_v10  ;;  %v4852_v17 = vpop.f32.mrf.mxu0 }
 0x56d   :  { %v4832_v8 = vpop.f32.mrf.mxu1  ;;  %v4853_v19 = vadd.f32 %v4852_v17, %v4851_v11 }
 0x56e   :  { %v4132_v22 = vadd.f32 %v4831_v16, %v2679_v14  ;;  %v4854_v24 = vpop.f32.mrf.mxu0 }
 0x56f   :  { %v4833_v20 = vpop.f32.mrf.mxu1 }
 0x570   :  { %v4173_v25 = vadd.f32 %v4853_v19, %v4132_v22  ;;  %v4834_v27 = vadd.f32 %v4833_v20, %v4832_v8  ;;  %v4855_v28 = vpop.f32.mrf.mxu0 }
 0x571   :  { %v4856_v6 = vadd.f32 %v4855_v28, %v4854_v24 }
 0x572   :  { %v4755_v29 = vpack.c.bf16 %v4173_v25, %v4173_v25  ;;  %v4135_v30 = vadd.f32 %v4834_v27, %v2679_v14 }
 0x574   :  { %4227 = vst.msk [vmem:[#allocation2 + $0x18] sm:$0xf] %vm4226_vm2, %v4755_v29  ;;  %v4176_v2 = vadd.f32 %v4856_v6, %v4135_v30 }
 0x576   :  { %v4759_v7 = vpack.c.bf16 %v4176_v2, %v4176_v2 }
 0x578   :  { %4231 = vst.msk [vmem:[#allocation2 + $0x34] sm:$0xf] %vm4226_vm2, %v4759_v7 }
 0x579   :  { %5596 = shalt.err (!%p5593_p4)
}
 0x57a   :  { %s5611_s29 = smov 448   ;;  %s5612_s6 = smov 28  }
 0x57b   :  { %4243 = dma.vmem_to_hbm [thread:$0]  %s4238_s10, 896, %s7316_s11, [#allocation3], %s5611_s29, %s5611_s29, %s5612_s6  }
 0x57c   :  { %5605 = dma.done.wait [#allocation3], 896  }
 0x57d   :  { %5606 = vsyncadd [#allocation3], 4294966400 }
 0x57e   :  { %4247 = vsyncpa [#allocation3], 1 }

</bundles_post_ra>
